<compile_context>
chip_gen: v6e
topology: v6e:2x2x1
jax: 0.10.0
libtpu: 0.0.40
codegen_flags: <defaults>
</compile_context>

<pallas_src>
import functools
from typing import NamedTuple

import jax
import jax.numpy as jnp
from jax import lax
from jax.experimental import pallas as pl
from jax.experimental.pallas import tpu as pltpu

NP = 10        # packed per-Gaussian params: [px, py, qa, qb, qc, opacity, r, g, b, depth]
CHUNK = 16     # Gaussians per unrolled chunk (unroll + early-exit granularity)
LANES = 128    # TPU vreg lane width
SUBLANES = 8   # TPU vreg sublane count (f32)


# ----------------------------------------------------------------------------
# Pallas kernel: per-pixel front-to-back alpha blending over sorted Gaussians.
# ----------------------------------------------------------------------------
def _raster_kernel(count_ref, params_ref, bg_ref,
                   color_ref, depth_ref, nt_ref, proc_ref,
                   *, img_h, img_w):
    PR = color_ref.shape[1]          # pixel rows in the lane-dense (PR, 128) tile; PR % 8 == 0
    n_pix = img_h * img_w

    # Lane-dense pixel coordinates from the flat pixel index (float math only;
    # exact for any realistic image size).
    row = lax.broadcasted_iota(jnp.int32, (PR, LANES), 0)
    col = lax.broadcasted_iota(jnp.int32, (PR, LANES), 1)
    lin = row * LANES + col
    linf = lin.astype(jnp.float32)
    pix_y = jnp.floor(linf / jnp.float32(img_w))
    pix_x = linf - pix_y * jnp.float32(img_w)

    # Transmittance carry. Padded pixels start at 0 so they never contribute;
    # the SIGN of T doubles as the sticky "done" flag (negative == saturated),
    # its magnitude stays the last accepted transmittance (for bg blending).
    T0 = jnp.where(lin < n_pix, 1.0, 0.0).astype(jnp.float32)
    zeros = jnp.zeros((PR, LANES), jnp.float32)

    n_valid = count_ref[0]           # number of non-culled Gaussians (sorted first)

    def chunk_cond(carry):
        chunk, alive, *_ = carry
        return jnp.logical_and(chunk * CHUNK < n_valid, alive)

    def chunk_body(carry):
        chunk, _alive, T, c0, c1, c2, D = carry
        base = chunk * CHUNK
        # Static unroll over the chunk: gives the scheduler visibility to
        # co-issue SMEM scalar loads / EUP exp / XLU n_touched reduce with the
        # VPU blend math of neighbouring Gaussians.
        for k in range(CHUNK):
            gi = base + k
            off = gi * NP
            gx = params_ref[off + 0]
            gy = params_ref[off + 1]
            qa = params_ref[off + 2]      # -0.5 * conic_a  (folded host-side)
            qb = params_ref[off + 3]      # -conic_b
            qc = params_ref[off + 4]      # -0.5 * conic_c
            opac = params_ref[off + 5]
            col_r = params_ref[off + 6]
            col_g = params_ref[off + 7]
            col_b = params_ref[off + 8]
            gdepth = params_ref[off + 9]

            dx = gx - pix_x
            dy = gy - pix_y
            power = qa * dx * dx + qc * dy * dy + qb * (dx * dy)
            alpha = jnp.minimum(0.99, opac * jnp.exp(power))
            valid = jnp.logical_and(power <= 0.0, alpha >= (1.0 / 255.0))
            test_T = T * (1.0 - alpha)

            # test_T >= 1e-4 implies T > 0 (alpha <= 0.99), so no extra mask.
            contrib = valid & (test_T >= 1e-4)
            saturate = valid & (T > 0.0) & (test_T < 1e-4)

            w = jnp.where(contrib, alpha * T, 0.0)
            c0 = c0 + col_r * w
            c1 = c1 + col_g * w
            c2 = c2 + col_b * w
            D = D + gdepth * w
            T = jnp.where(contrib, test_T, T)
            T = jnp.where(saturate, -T, T)   # sign flip = sticky done, |T| kept

            # number of pixels this (sorted) Gaussian contributed to
            # TODO(synk): some forks (e.g. MonoGS CUDA) gate this count on
            #             transmittance > 0.5; all accepted contributions
            #             are counted here.
            nt_ref[gi] = jnp.sum(contrib.astype(jnp.float32)).astype(jnp.int32)

        alive = jnp.max(T) > 0.0     # chunked early-exit: all pixels saturated?
        return (chunk + 1, alive, T, c0, c1, c2, D)

    init = (jnp.array(0, jnp.int32), jnp.array(True), T0, zeros, zeros, zeros, zeros)
    final_chunk, _, T, c0, c1, c2, D = lax.while_loop(chunk_cond, chunk_body, init)

    # How many sorted Gaussians actually got an n_touched write; the wrapper
    # zero-masks the rest (replaces the old O(n_pad) scalar pre-zero loop).
    proc_ref[0] = final_chunk * CHUNK

    Tf = jnp.abs(T)                  # recover final transmittance of saturated pixels
    color_ref[0, :, :] = c0 + Tf * bg_ref[0]
    color_ref[1, :, :] = c1 + Tf * bg_ref[1]
    color_ref[2, :, :] = c2 + Tf * bg_ref[2]
    # TODO(synk): some forks normalize depth by accumulated alpha; raw blended depth kept here.
    depth_ref[0, :, :] = D


def _rasterize_pallas(count, params_flat, bg, n_pad, H, W):
    n_pix = H * W
    # Pixel tile padded so PR is a multiple of 8 -> full (8,128) vreg sublanes.
    pr = ((n_pix + LANES * SUBLANES - 1) // (LANES * SUBLANES)) * SUBLANES
    kernel = functools.partial(_raster_kernel, img_h=H, img_w=W)
    color, depth, nt, proc = pl.pallas_call(
        kernel,
        out_shape=(
            jax.ShapeDtypeStruct((3, pr, LANES), jnp.float32),
            jax.ShapeDtypeStruct((1, pr, LANES), jnp.float32),
            jax.ShapeDtypeStruct((n_pad,), jnp.int32),
            jax.ShapeDtypeStruct((1,), jnp.int32),
        ),
        in_specs=[
            pl.BlockSpec(memory_space=pltpu.MemorySpace.SMEM),
            pl.BlockSpec(memory_space=pltpu.MemorySpace.SMEM),
            pl.BlockSpec(memory_space=pltpu.MemorySpace.SMEM),
        ],
        out_specs=(
            pl.BlockSpec(memory_space=pltpu.MemorySpace.VMEM),
            pl.BlockSpec(memory_space=pltpu.MemorySpace.VMEM),
            pl.BlockSpec(memory_space=pltpu.MemorySpace.SMEM),
            pl.BlockSpec(memory_space=pltpu.MemorySpace.SMEM),
        ),
    )(count, params_flat, bg)
    # lane-dense -> channels-first image layout
    # TODO(synk): at real resolutions pick per-tile pixel counts that make this
    #             slice a no-op (pure metadata reshape).
    color = color.reshape(3, pr * LANES)[:, :n_pix].reshape(3, H, W)
    depth = depth.reshape(1, pr * LANES)[:, :n_pix].reshape(1, H, W)
    # Mask n_touched entries the (early-exiting / valid-count-bounded) blend
    # loop never reached.
    nt = jnp.where(jnp.arange(n_pad, dtype=jnp.int32) < proc[0], nt, 0)
    return color, depth, nt


# ----------------------------------------------------------------------------
# Settings + preprocessing (projection, covariance, culling) in plain JAX glue.
# ----------------------------------------------------------------------------
class GaussianRasterizationSettings(NamedTuple):
    image_height: int
    image_width: int
    tanfovx: float
    tanfovy: float
    bg: jnp.ndarray          # (3,)
    scale_modifier: float
    viewmatrix: jnp.ndarray  # (4,4), row-vector convention: p_cam = [p,1] @ viewmatrix
    projmatrix: jnp.ndarray  # (4,4), row-vector convention
    sh_degree: int
    campos: jnp.ndarray      # (3,)


def _build_rotation(q):
    r = q[:, 0]; x = q[:, 1]; y = q[:, 2]; z = q[:, 3]
    row0 = jnp.stack([1 - 2 * (y * y + z * z), 2 * (x * y - r * z), 2 * (x * z + r * y)], axis=-1)
    row1 = jnp.stack([2 * (x * y + r * z), 1 - 2 * (x * x + z * z), 2 * (y * z - r * x)], axis=-1)
    row2 = jnp.stack([2 * (x * z - r * y), 2 * (y * z + r * x), 1 - 2 * (x * x + y * y)], axis=-1)
    return jnp.stack([row0, row1, row2], axis=1)  # (N, 3, 3)


def _preprocess(means3D, opacities, colors, scales, rotations, cov3D_precomp, rs):
    N = means3D.shape[0]
    H, W = rs.image_height, rs.image_width
    fx = W / (2.0 * rs.tanfovx)
    fy = H / (2.0 * rs.tanfovy)

    ones = jnp.ones((N, 1), jnp.float32)
    p_hom = jnp.concatenate([means3D.astype(jnp.float32), ones], axis=1)
    p_view = p_hom @ rs.viewmatrix
    tz = p_view[:, 2]
    in_front = tz > 0.2

    p_proj_h = p_hom @ rs.projmatrix
    p_w = 1.0 / (p_proj_h[:, 3] + 1e-7)
    p_proj = p_proj_h[:, :3] * p_w[:, None]

    if cov3D_precomp is not None:
        c = cov3D_precomp.astype(jnp.float32)  # (N,6): xx, xy, xz, yy, yz, zz
        cov3D = jnp.stack([
            jnp.stack([c[:, 0], c[:, 1], c[:, 2]], -1),
            jnp.stack([c[:, 1], c[:, 3], c[:, 4]], -1),
            jnp.stack([c[:, 2], c[:, 4], c[:, 5]], -1)], axis=1)
    else:
        R = _build_rotation(rotations.astype(jnp.float32))
        s2 = (scales.astype(jnp.float32) * rs.scale_modifier) ** 2
        cov3D = jnp.einsum('nij,nj,nkj->nik', R, s2, R)  # R S^2 R^T

    tz_safe = jnp.where(jnp.abs(tz) < 1e-6, 1e-6, tz)
    limx, limy = 1.3 * rs.tanfovx, 1.3 * rs.tanfovy
    txc = jnp.clip(p_view[:, 0] / tz_safe, -limx, limx) * tz_safe
    tyc = jnp.clip(p_view[:, 1] / tz_safe, -limy, limy) * tz_safe
    zero = jnp.zeros_like(tz)
    J = jnp.stack([
        jnp.stack([fx / tz_safe, zero, -fx * txc / (tz_safe * tz_safe)], -1),
        jnp.stack([zero, fy / tz_safe, -fy * tyc / (tz_safe * tz_safe)], -1)], axis=1)
    Wcam = rs.viewmatrix[:3, :3].T  # world->camera rotation (column-vector convention)
    M = jnp.einsum('nij,jk->nik', J, Wcam)            # (N,2,3)
    cov2d = jnp.einsum('nij,njk,nlk->nil', M, cov3D, M)

    cxx = cov2d[:, 0, 0] + 0.3
    cyy = cov2d[:, 1, 1] + 0.3
    cxy = cov2d[:, 0, 1]
    det = cxx * cyy - cxy * cxy
    det_ok = det != 0.0
    inv_det = jnp.where(det_ok, 1.0 / jnp.where(det_ok, det, 1.0), 0.0)
    con_a = cyy * inv_det
    con_b = -cxy * inv_det
    con_c = cxx * inv_det
    # Fold the -0.5 / sign into the conic host-side so the kernel evaluates
    # power = qa*dx^2 + qc*dy^2 + qb*dx*dy directly (review item).
    qa = -0.5 * con_a
    qb = -con_b
    qc = -0.5 * con_c

    mid = 0.5 * (cxx + cyy)
    sq = jnp.sqrt(jnp.maximum(0.1, mid * mid - det))
    radius = jnp.ceil(3.0 * jnp.sqrt(jnp.maximum(mid + sq, mid - sq)))

    px = ((p_proj[:, 0] + 1.0) * W - 1.0) * 0.5
    py = ((p_proj[:, 1] + 1.0) * H - 1.0) * 0.5

    # tile-overlap culling (16x16 tiles, as in the CUDA rasterizer)
    BX = BY = 16
    gx = (W + BX - 1) // BX
    gy = (H + BY - 1) // BY
    rminx = jnp.clip(jnp.floor((px - radius) / BX), 0, gx)
    rmaxx = jnp.clip(jnp.floor((px + radius + BX - 1) / BX), 0, gx)
    rminy = jnp.clip(jnp.floor((py - radius) / BY), 0, gy)
    rmaxy = jnp.clip(jnp.floor((py + radius + BY - 1) / BY), 0, gy)
    touches = (rmaxx - rminx) * (rmaxy - rminy) > 0

    valid = in_front & det_ok & touches
    radii = jnp.where(valid, radius, 0.0).astype(jnp.int32)
    opac = jnp.where(valid, opacities.reshape(N).astype(jnp.float32), 0.0)

    sanitize = lambda v: jnp.where(valid, jnp.nan_to_num(v), 0.0)
    params = jnp.stack(
        [sanitize(px), sanitize(py), sanitize(qa), sanitize(qb), sanitize(qc),
         opac,
         colors[:, 0].astype(jnp.float32), colors[:, 1].astype(jnp.float32),
         colors[:, 2].astype(jnp.float32), tz], axis=1)  # (N, NP)

    # front-to-back depth sort; culled Gaussians compacted to the back so the
    # kernel can bound its loop by the valid count.
    sort_key = jnp.where(valid, tz, jnp.inf)
    order = jnp.argsort(sort_key)
    n_valid = jnp.sum(valid).astype(jnp.int32).reshape(1)

    n_pad = ((N + CHUNK - 1) // CHUNK) * CHUNK
    params_sorted = params[order]
    if n_pad != N:
        params_sorted = jnp.concatenate(
            [params_sorted, jnp.zeros((n_pad - N, NP), jnp.float32)], axis=0)

    return params_sorted.reshape(-1), order, radii, n_valid, n_pad


class GaussianRasterizer:
    def __init__(self, raster_settings: GaussianRasterizationSettings):
        self.raster_settings = raster_settings

    def __call__(self, means3D, means2D, opacities, shs=None, colors_precomp=None,
                 scales=None, rotations=None, cov3D_precomp=None, theta=None, rho=None):
        rs = self.raster_settings
        if (shs is None) == (colors_precomp is None):
            raise Exception('Please provide excatly one of either SHs or precomputed colors!')
        if ((scales is None or rotations is None) and cov3D_precomp is None) or \
           ((scales is not None or rotations is not None) and cov3D_precomp is not None):
            raise Exception('Please provide exactly one of either scale/rotation pair or '
                            'precomputed 3D covariance!')
        if shs is not None:
            # TODO(synk): SH -> RGB evaluation not implemented; use colors_precomp.
            raise NotImplementedError("SH evaluation path not implemented")
        # means2D / theta / rho only matter for the backward pass in the reference module.

        params_flat, order, radii, n_valid, n_pad = _preprocess(
            means3D, opacities, colors_precomp, scales, rotations, cov3D_precomp, rs)
        N = means3D.shape[0]
        color, depth, nt_sorted = _rasterize_pallas(
            n_valid, params_flat, rs.bg.astype(jnp.float32), n_pad,
            rs.image_height, rs.image_width)
        n_touched = jnp.zeros((N,), jnp.int32).at[order].set(nt_sorted[:N])
        return color, radii, depth, n_touched


# ----------------------------------------------------------------------------
if __name__ == "__main__":
    key = jax.random.PRNGKey(0)
    k1, k2, k3, k4, k5 = jax.random.split(key, 5)
    N, H, W = 64, 16, 16
    tanfovx = tanfovy = 0.8

    means3D = jnp.concatenate([
        jax.random.uniform(k1, (N, 2), minval=-1.5, maxval=1.5),
        jax.random.uniform(k2, (N, 1), minval=2.0, maxval=5.0)], axis=1).astype(jnp.float32)
    scales = jax.random.uniform(k3, (N, 3), minval=0.05, maxval=0.3).astype(jnp.float32)
    q = jax.random.normal(k4, (N, 4), dtype=jnp.float32)
    rotations = q / jnp.linalg.norm(q, axis=1, keepdims=True)
    kk1, kk2 = jax.random.split(k5)
    opacities = jax.random.uniform(kk1, (N, 1), minval=0.3, maxval=0.95).astype(jnp.float32)
    colors = jax.random.uniform(kk2, (N, 3)).astype(jnp.float32)
    means2D = jnp.zeros((N, 3), jnp.float32)  # gradient holder in the torch module; unused

    # Camera at origin looking down +z (row-vector convention).
    viewmatrix = jnp.eye(4, dtype=jnp.float32)
    znear, zfar = 0.01, 100.0
    P = jnp.zeros((4, 4), jnp.float32)
    P = P.at[0, 0].set(1.0 / tanfovx)
    P = P.at[1, 1].set(1.0 / tanfovy)
    P = P.at[2, 2].set(zfar / (zfar - znear))
    P = P.at[2, 3].set(-(zfar * znear) / (zfar - znear))
    P = P.at[3, 2].set(1.0)
    projmatrix = viewmatrix @ P.T  # [p,1] @ projmatrix

    settings = GaussianRasterizationSettings(
        image_height=H, image_width=W, tanfovx=tanfovx, tanfovy=tanfovy,
        bg=jnp.array([0.1, 0.2, 0.3], jnp.float32), scale_modifier=1.0,
        viewmatrix=viewmatrix, projmatrix=projmatrix, sh_degree=0,
        campos=jnp.zeros((3,), jnp.float32))

    rasterizer = GaussianRasterizer(settings)
    color, radii, depth, n_touched = rasterizer(
        means3D, means2D, opacities, colors_precomp=colors,
        scales=scales, rotations=rotations)
    jax.block_until_ready((color, radii, depth, n_touched))

    assert color.shape == (3, H, W) and color.dtype == jnp.float32
    assert depth.shape == (1, H, W) and depth.dtype == jnp.float32
    assert radii.shape == (N,) and radii.dtype == jnp.int32
    assert n_touched.shape == (N,) and n_touched.dtype == jnp.int32
    print("KERNEL_OK")
</pallas_src>

<mosaic_0001>
module attributes {stable_mosaic.version = 11 : i64} {
  func.func @_raster_kernel(%arg0: memref<1xi32, #tpu.memory_space<smem>>, %arg1: memref<640xf32, #tpu.memory_space<smem>>, %arg2: memref<3xf32, #tpu.memory_space<smem>>, %arg3: memref<3x8x128xf32, #tpu.memory_space<vmem>>, %arg4: memref<1x8x128xf32, #tpu.memory_space<vmem>>, %arg5: memref<64xi32, #tpu.memory_space<smem>>, %arg6: memref<1xi32, #tpu.memory_space<smem>>) attributes {dimension_semantics = [], scalar_prefetch = 0 : i64, scratch_operands = 0 : i64, tpu.core_type = #tpu.core_type<tc>} {
    %0 = tpu.iota {dimensions = array<i32: 0>} : vector<8x128xi32>
    %1 = tpu.iota {dimensions = array<i32: 1>} : vector<8x128xi32>
    %c128_i32 = arith.constant 128 : i32
    %2 = vector.broadcast %c128_i32 : i32 to vector<8x128xi32>
    %3 = arith.muli %0, %2 : vector<8x128xi32>
    %4 = arith.addi %3, %1 : vector<8x128xi32>
    %5 = arith.sitofp %4 : vector<8x128xi32> to vector<8x128xf32>
    %cst = arith.constant 1.600000e+01 : f32
    %6 = vector.broadcast %cst : f32 to vector<8x128xf32>
    %7 = arith.divf %5, %6 : vector<8x128xf32>
    %8 = math.floor %7 : vector<8x128xf32>
    %cst_0 = arith.constant 1.600000e+01 : f32
    %9 = vector.broadcast %cst_0 : f32 to vector<8x128xf32>
    %10 = arith.mulf %8, %9 : vector<8x128xf32>
    %11 = arith.subf %5, %10 : vector<8x128xf32>
    %c256_i32 = arith.constant 256 : i32
    %12 = vector.broadcast %c256_i32 : i32 to vector<8x128xi32>
    %13 = arith.cmpi slt, %4, %12 : vector<8x128xi32>
    %cst_1 = arith.constant 1.000000e+00 : f32
    %cst_2 = arith.constant 0.000000e+00 : f32
    %14 = vector.broadcast %cst_1 : f32 to vector<8x128xf32>
    %15 = vector.broadcast %cst_2 : f32 to vector<8x128xf32>
    %16 = arith.select %13, %14, %15 : vector<8x128xi1>, vector<8x128xf32>
    %cst_3 = arith.constant 0.000000e+00 : f32
    %17 = vector.broadcast %cst_3 : f32 to vector<8x128xf32>
    %c0 = arith.constant 0 : index
    %18 = memref.load %arg0[%c0] : memref<1xi32, #tpu.memory_space<smem>>
    %c0_i32 = arith.constant 0 : i32
    %true = arith.constant true
    %19:7 = scf.while (%arg7 = %c0_i32, %arg8 = %true, %arg9 = %16, %arg10 = %17, %arg11 = %17, %arg12 = %17, %arg13 = %17) : (i32, i1, vector<8x128xf32>, vector<8x128xf32>, vector<8x128xf32>, vector<8x128xf32>, vector<8x128xf32>) -> (i32, i1, vector<8x128xf32>, vector<8x128xf32>, vector<8x128xf32>, vector<8x128xf32>, vector<8x128xf32>) {
      %c16_i32_18 = arith.constant 16 : i32
      %47 = arith.muli %arg7, %c16_i32_18 : i32
      %48 = arith.cmpi slt, %47, %18 : i32
      %49 = arith.andi %48, %arg8 : i1
      scf.condition(%49) %arg7, %arg8, %arg9, %arg10, %arg11, %arg12, %arg13 : i32, i1, vector<8x128xf32>, vector<8x128xf32>, vector<8x128xf32>, vector<8x128xf32>, vector<8x128xf32>
    } do {
    ^bb0(%arg7: i32, %arg8: i1, %arg9: vector<8x128xf32>, %arg10: vector<8x128xf32>, %arg11: vector<8x128xf32>, %arg12: vector<8x128xf32>, %arg13: vector<8x128xf32>):
      %c16_i32_18 = arith.constant 16 : i32
      %47 = arith.muli %arg7, %c16_i32_18 : i32
      %c0_i32_19 = arith.constant 0 : i32
      %48 = arith.addi %47, %c0_i32_19 : i32
      %c10_i32 = arith.constant 10 : i32
      %49 = arith.muli %48, %c10_i32 : i32
      %c0_i32_20 = arith.constant 0 : i32
      %50 = arith.addi %49, %c0_i32_20 : i32
      %51 = arith.index_cast %50 : i32 to index
      %52 = memref.load %arg1[%51] : memref<640xf32, #tpu.memory_space<smem>>
      %c1_i32 = arith.constant 1 : i32
      %53 = arith.addi %49, %c1_i32 : i32
      %54 = arith.index_cast %53 : i32 to index
      %55 = memref.load %arg1[%54] : memref<640xf32, #tpu.memory_space<smem>>
      %c2_i32 = arith.constant 2 : i32
      %56 = arith.addi %49, %c2_i32 : i32
      %57 = arith.index_cast %56 : i32 to index
      %58 = memref.load %arg1[%57] : memref<640xf32, #tpu.memory_space<smem>>
      %c3_i32 = arith.constant 3 : i32
      %59 = arith.addi %49, %c3_i32 : i32
      %60 = arith.index_cast %59 : i32 to index
      %61 = memref.load %arg1[%60] : memref<640xf32, #tpu.memory_space<smem>>
      %c4_i32 = arith.constant 4 : i32
      %62 = arith.addi %49, %c4_i32 : i32
      %63 = arith.index_cast %62 : i32 to index
      %64 = memref.load %arg1[%63] : memref<640xf32, #tpu.memory_space<smem>>
      %c5_i32 = arith.constant 5 : i32
      %65 = arith.addi %49, %c5_i32 : i32
      %66 = arith.index_cast %65 : i32 to index
      %67 = memref.load %arg1[%66] : memref<640xf32, #tpu.memory_space<smem>>
      %c6_i32 = arith.constant 6 : i32
      %68 = arith.addi %49, %c6_i32 : i32
      %69 = arith.index_cast %68 : i32 to index
      %70 = memref.load %arg1[%69] : memref<640xf32, #tpu.memory_space<smem>>
      %c7_i32 = arith.constant 7 : i32
      %71 = arith.addi %49, %c7_i32 : i32
      %72 = arith.index_cast %71 : i32 to index
      %73 = memref.load %arg1[%72] : memref<640xf32, #tpu.memory_space<smem>>
      %c8_i32 = arith.constant 8 : i32
      %74 = arith.addi %49, %c8_i32 : i32
      %75 = arith.index_cast %74 : i32 to index
      %76 = memref.load %arg1[%75] : memref<640xf32, #tpu.memory_space<smem>>
      %c9_i32 = arith.constant 9 : i32
      %77 = arith.addi %49, %c9_i32 : i32
      %78 = arith.index_cast %77 : i32 to index
      %79 = memref.load %arg1[%78] : memref<640xf32, #tpu.memory_space<smem>>
      %80 = vector.broadcast %52 : f32 to vector<8x128xf32>
      %81 = arith.subf %80, %11 : vector<8x128xf32>
      %82 = vector.broadcast %55 : f32 to vector<8x128xf32>
      %83 = arith.subf %82, %8 : vector<8x128xf32>
      %84 = vector.broadcast %58 : f32 to vector<8x128xf32>
      %85 = arith.mulf %84, %81 : vector<8x128xf32>
      %86 = arith.mulf %85, %81 : vector<8x128xf32>
      %87 = vector.broadcast %64 : f32 to vector<8x128xf32>
      %88 = arith.mulf %87, %83 : vector<8x128xf32>
      %89 = arith.mulf %88, %83 : vector<8x128xf32>
      %90 = arith.addf %86, %89 : vector<8x128xf32>
      %91 = arith.mulf %81, %83 : vector<8x128xf32>
      %92 = vector.broadcast %61 : f32 to vector<8x128xf32>
      %93 = arith.mulf %92, %91 : vector<8x128xf32>
      %94 = arith.addf %90, %93 : vector<8x128xf32>
      %95 = math.exp %94 : vector<8x128xf32>
      %96 = vector.broadcast %67 : f32 to vector<8x128xf32>
      %97 = arith.mulf %96, %95 : vector<8x128xf32>
      %cst_21 = arith.constant 9.900000e-01 : f32
      %98 = vector.broadcast %cst_21 : f32 to vector<8x128xf32>
      %99 = arith.minimumf %98, %97 : vector<8x128xf32>
      %cst_22 = arith.constant 0.000000e+00 : f32
      %100 = vector.broadcast %cst_22 : f32 to vector<8x128xf32>
      %101 = arith.cmpf ole, %94, %100 : vector<8x128xf32>
      %cst_23 = arith.constant 0.00392156886 : f32
      %102 = vector.broadcast %cst_23 : f32 to vector<8x128xf32>
      %103 = arith.cmpf oge, %99, %102 : vector<8x128xf32>
      %104 = arith.andi %101, %103 : vector<8x128xi1>
      %cst_24 = arith.constant 1.000000e+00 : f32
      %105 = vector.broadcast %cst_24 : f32 to vector<8x128xf32>
      %106 = arith.subf %105, %99 : vector<8x128xf32>
      %107 = arith.mulf %arg9, %106 : vector<8x128xf32>
      %cst_25 = arith.constant 9.99999974E-5 : f32
      %108 = vector.broadcast %cst_25 : f32 to vector<8x128xf32>
      %109 = arith.cmpf oge, %107, %108 : vector<8x128xf32>
      %110 = arith.andi %104, %109 : vector<8x128xi1>
      %cst_26 = arith.constant 0.000000e+00 : f32
      %111 = vector.broadcast %cst_26 : f32 to vector<8x128xf32>
      %112 = arith.cmpf ogt, %arg9, %111 : vector<8x128xf32>
      %113 = arith.andi %104, %112 : vector<8x128xi1>
      %cst_27 = arith.constant 9.99999974E-5 : f32
      %114 = vector.broadcast %cst_27 : f32 to vector<8x128xf32>
      %115 = arith.cmpf olt, %107, %114 : vector<8x128xf32>
      %116 = arith.andi %113, %115 : vector<8x128xi1>
      %117 = arith.mulf %99, %arg9 : vector<8x128xf32>
      %cst_28 = arith.constant 0.000000e+00 : f32
      %118 = vector.broadcast %cst_28 : f32 to vector<8x128xf32>
      %119 = arith.select %110, %117, %118 : vector<8x128xi1>, vector<8x128xf32>
      %120 = vector.broadcast %70 : f32 to vector<8x128xf32>
      %121 = arith.mulf %120, %119 : vector<8x128xf32>
      %122 = arith.addf %arg10, %121 : vector<8x128xf32>
      %123 = vector.broadcast %73 : f32 to vector<8x128xf32>
      %124 = arith.mulf %123, %119 : vector<8x128xf32>
      %125 = arith.addf %arg11, %124 : vector<8x128xf32>
      %126 = vector.broadcast %76 : f32 to vector<8x128xf32>
      %127 = arith.mulf %126, %119 : vector<8x128xf32>
      %128 = arith.addf %arg12, %127 : vector<8x128xf32>
      %129 = vector.broadcast %79 : f32 to vector<8x128xf32>
      %130 = arith.mulf %129, %119 : vector<8x128xf32>
      %131 = arith.addf %arg13, %130 : vector<8x128xf32>
      %132 = arith.select %110, %107, %arg9 : vector<8x128xi1>, vector<8x128xf32>
      %cst_29 = arith.constant 0.000000e+00 : f32
      %133 = vector.broadcast %cst_29 : f32 to vector<8x128xf32>
      %134 = arith.subf %133, %132 : vector<8x128xf32>
      %135 = arith.select %116, %134, %132 : vector<8x128xi1>, vector<8x128xf32>
      %136 = arith.extui %110 : vector<8x128xi1> to vector<8x128xi32>
      %137 = arith.sitofp %136 : vector<8x128xi32> to vector<8x128xf32>
      %138 = vector.shape_cast %137 : vector<8x128xf32> to vector<1x8x128xf32>
      %cst_30 = arith.constant dense<0.000000e+00> : vector<1xf32>
      %139 = vector.multi_reduction <add>, %138, %cst_30 [1, 2] : vector<1x8x128xf32> to vector<1xf32>
      %140 = vector.shape_cast %139 : vector<1xf32> to vector<1x1x1xf32>
      %141 = vector.extract %140[0, 0, 0] : f32 from vector<1x1x1xf32>
      %142 = arith.fptosi %141 : f32 to i32
      %143 = arith.index_cast %48 : i32 to index
      %144 = memref.load %arg5[%143] : memref<64xi32, #tpu.memory_space<smem>>
      memref.store %142, %arg5[%143] : memref<64xi32, #tpu.memory_space<smem>>
      %c1_i32_31 = arith.constant 1 : i32
      %145 = arith.addi %47, %c1_i32_31 : i32
      %c10_i32_32 = arith.constant 10 : i32
      %146 = arith.muli %145, %c10_i32_32 : i32
      %c0_i32_33 = arith.constant 0 : i32
      %147 = arith.addi %146, %c0_i32_33 : i32
      %148 = arith.index_cast %147 : i32 to index
      %149 = memref.load %arg1[%148] : memref<640xf32, #tpu.memory_space<smem>>
      %c1_i32_34 = arith.constant 1 : i32
      %150 = arith.addi %146, %c1_i32_34 : i32
      %151 = arith.index_cast %150 : i32 to index
      %152 = memref.load %arg1[%151] : memref<640xf32, #tpu.memory_space<smem>>
      %c2_i32_35 = arith.constant 2 : i32
      %153 = arith.addi %146, %c2_i32_35 : i32
      %154 = arith.index_cast %153 : i32 to index
      %155 = memref.load %arg1[%154] : memref<640xf32, #tpu.memory_space<smem>>
      %c3_i32_36 = arith.constant 3 : i32
      %156 = arith.addi %146, %c3_i32_36 : i32
      %157 = arith.index_cast %156 : i32 to index
      %158 = memref.load %arg1[%157] : memref<640xf32, #tpu.memory_space<smem>>
      %c4_i32_37 = arith.constant 4 : i32
      %159 = arith.addi %146, %c4_i32_37 : i32
      %160 = arith.index_cast %159 : i32 to index
      %161 = memref.load %arg1[%160] : memref<640xf32, #tpu.memory_space<smem>>
      %c5_i32_38 = arith.constant 5 : i32
      %162 = arith.addi %146, %c5_i32_38 : i32
      %163 = arith.index_cast %162 : i32 to index
      %164 = memref.load %arg1[%163] : memref<640xf32, #tpu.memory_space<smem>>
      %c6_i32_39 = arith.constant 6 : i32
      %165 = arith.addi %146, %c6_i32_39 : i32
      %166 = arith.index_cast %165 : i32 to index
      %167 = memref.load %arg1[%166] : memref<640xf32, #tpu.memory_space<smem>>
      %c7_i32_40 = arith.constant 7 : i32
      %168 = arith.addi %146, %c7_i32_40 : i32
      %169 = arith.index_cast %168 : i32 to index
      %170 = memref.load %arg1[%169] : memref<640xf32, #tpu.memory_space<smem>>
      %c8_i32_41 = arith.constant 8 : i32
      %171 = arith.addi %146, %c8_i32_41 : i32
      %172 = arith.index_cast %171 : i32 to index
      %173 = memref.load %arg1[%172] : memref<640xf32, #tpu.memory_space<smem>>
      %c9_i32_42 = arith.constant 9 : i32
      %174 = arith.addi %146, %c9_i32_42 : i32
      %175 = arith.index_cast %174 : i32 to index
      %176 = memref.load %arg1[%175] : memref<640xf32, #tpu.memory_space<smem>>
      %177 = vector.broadcast %149 : f32 to vector<8x128xf32>
      %178 = arith.subf %177, %11 : vector<8x128xf32>
      %179 = vector.broadcast %152 : f32 to vector<8x128xf32>
      %180 = arith.subf %179, %8 : vector<8x128xf32>
      %181 = vector.broadcast %155 : f32 to vector<8x128xf32>
      %182 = arith.mulf %181, %178 : vector<8x128xf32>
      %183 = arith.mulf %182, %178 : vector<8x128xf32>
      %184 = vector.broadcast %161 : f32 to vector<8x128xf32>
      %185 = arith.mulf %184, %180 : vector<8x128xf32>
      %186 = arith.mulf %185, %180 : vector<8x128xf32>
      %187 = arith.addf %183, %186 : vector<8x128xf32>
      %188 = arith.mulf %178, %180 : vector<8x128xf32>
      %189 = vector.broadcast %158 : f32 to vector<8x128xf32>
      %190 = arith.mulf %189, %188 : vector<8x128xf32>
      %191 = arith.addf %187, %190 : vector<8x128xf32>
      %192 = math.exp %191 : vector<8x128xf32>
      %193 = vector.broadcast %164 : f32 to vector<8x128xf32>
      %194 = arith.mulf %193, %192 : vector<8x128xf32>
      %cst_43 = arith.constant 9.900000e-01 : f32
      %195 = vector.broadcast %cst_43 : f32 to vector<8x128xf32>
      %196 = arith.minimumf %195, %194 : vector<8x128xf32>
      %cst_44 = arith.constant 0.000000e+00 : f32
      %197 = vector.broadcast %cst_44 : f32 to vector<8x128xf32>
      %198 = arith.cmpf ole, %191, %197 : vector<8x128xf32>
      %cst_45 = arith.constant 0.00392156886 : f32
      %199 = vector.broadcast %cst_45 : f32 to vector<8x128xf32>
      %200 = arith.cmpf oge, %196, %199 : vector<8x128xf32>
      %201 = arith.andi %198, %200 : vector<8x128xi1>
      %cst_46 = arith.constant 1.000000e+00 : f32
      %202 = vector.broadcast %cst_46 : f32 to vector<8x128xf32>
      %203 = arith.subf %202, %196 : vector<8x128xf32>
      %204 = arith.mulf %135, %203 : vector<8x128xf32>
      %cst_47 = arith.constant 9.99999974E-5 : f32
      %205 = vector.broadcast %cst_47 : f32 to vector<8x128xf32>
      %206 = arith.cmpf oge, %204, %205 : vector<8x128xf32>
      %207 = arith.andi %201, %206 : vector<8x128xi1>
      %cst_48 = arith.constant 0.000000e+00 : f32
      %208 = vector.broadcast %cst_48 : f32 to vector<8x128xf32>
      %209 = arith.cmpf ogt, %135, %208 : vector<8x128xf32>
      %210 = arith.andi %201, %209 : vector<8x128xi1>
      %cst_49 = arith.constant 9.99999974E-5 : f32
      %211 = vector.broadcast %cst_49 : f32 to vector<8x128xf32>
      %212 = arith.cmpf olt, %204, %211 : vector<8x128xf32>
      %213 = arith.andi %210, %212 : vector<8x128xi1>
      %214 = arith.mulf %196, %135 : vector<8x128xf32>
      %cst_50 = arith.constant 0.000000e+00 : f32
      %215 = vector.broadcast %cst_50 : f32 to vector<8x128xf32>
      %216 = arith.select %207, %214, %215 : vector<8x128xi1>, vector<8x128xf32>
      %217 = vector.broadcast %167 : f32 to vector<8x128xf32>
      %218 = arith.mulf %217, %216 : vector<8x128xf32>
      %219 = arith.addf %122, %218 : vector<8x128xf32>
      %220 = vector.broadcast %170 : f32 to vector<8x128xf32>
      %221 = arith.mulf %220, %216 : vector<8x128xf32>
      %222 = arith.addf %125, %221 : vector<8x128xf32>
      %223 = vector.broadcast %173 : f32 to vector<8x128xf32>
      %224 = arith.mulf %223, %216 : vector<8x128xf32>
      %225 = arith.addf %128, %224 : vector<8x128xf32>
      %226 = vector.broadcast %176 : f32 to vector<8x128xf32>
      %227 = arith.mulf %226, %216 : vector<8x128xf32>
      %228 = arith.addf %131, %227 : vector<8x128xf32>
      %229 = arith.select %207, %204, %135 : vector<8x128xi1>, vector<8x128xf32>
      %cst_51 = arith.constant 0.000000e+00 : f32
      %230 = vector.broadcast %cst_51 : f32 to vector<8x128xf32>
      %231 = arith.subf %230, %229 : vector<8x128xf32>
      %232 = arith.select %213, %231, %229 : vector<8x128xi1>, vector<8x128xf32>
      %233 = arith.extui %207 : vector<8x128xi1> to vector<8x128xi32>
      %234 = arith.sitofp %233 : vector<8x128xi32> to vector<8x128xf32>
      %235 = vector.shape_cast %234 : vector<8x128xf32> to vector<1x8x128xf32>
      %cst_52 = arith.constant dense<0.000000e+00> : vector<1xf32>
      %236 = vector.multi_reduction <add>, %235, %cst_52 [1, 2] : vector<1x8x128xf32> to vector<1xf32>
      %237 = vector.shape_cast %236 : vector<1xf32> to vector<1x1x1xf32>
      %238 = vector.extract %237[0, 0, 0] : f32 from vector<1x1x1xf32>
      %239 = arith.fptosi %238 : f32 to i32
      %240 = arith.index_cast %145 : i32 to index
      %241 = memref.load %arg5[%240] : memref<64xi32, #tpu.memory_space<smem>>
      memref.store %239, %arg5[%240] : memref<64xi32, #tpu.memory_space<smem>>
      %c2_i32_53 = arith.constant 2 : i32
      %242 = arith.addi %47, %c2_i32_53 : i32
      %c10_i32_54 = arith.constant 10 : i32
      %243 = arith.muli %242, %c10_i32_54 : i32
      %c0_i32_55 = arith.constant 0 : i32
      %244 = arith.addi %243, %c0_i32_55 : i32
      %245 = arith.index_cast %244 : i32 to index
      %246 = memref.load %arg1[%245] : memref<640xf32, #tpu.memory_space<smem>>
      %c1_i32_56 = arith.constant 1 : i32
      %247 = arith.addi %243, %c1_i32_56 : i32
      %248 = arith.index_cast %247 : i32 to index
      %249 = memref.load %arg1[%248] : memref<640xf32, #tpu.memory_space<smem>>
      %c2_i32_57 = arith.constant 2 : i32
      %250 = arith.addi %243, %c2_i32_57 : i32
      %251 = arith.index_cast %250 : i32 to index
      %252 = memref.load %arg1[%251] : memref<640xf32, #tpu.memory_space<smem>>
      %c3_i32_58 = arith.constant 3 : i32
      %253 = arith.addi %243, %c3_i32_58 : i32
      %254 = arith.index_cast %253 : i32 to index
      %255 = memref.load %arg1[%254] : memref<640xf32, #tpu.memory_space<smem>>
      %c4_i32_59 = arith.constant 4 : i32
      %256 = arith.addi %243, %c4_i32_59 : i32
      %257 = arith.index_cast %256 : i32 to index
      %258 = memref.load %arg1[%257] : memref<640xf32, #tpu.memory_space<smem>>
      %c5_i32_60 = arith.constant 5 : i32
      %259 = arith.addi %243, %c5_i32_60 : i32
      %260 = arith.index_cast %259 : i32 to index
      %261 = memref.load %arg1[%260] : memref<640xf32, #tpu.memory_space<smem>>
      %c6_i32_61 = arith.constant 6 : i32
      %262 = arith.addi %243, %c6_i32_61 : i32
      %263 = arith.index_cast %262 : i32 to index
      %264 = memref.load %arg1[%263] : memref<640xf32, #tpu.memory_space<smem>>
      %c7_i32_62 = arith.constant 7 : i32
      %265 = arith.addi %243, %c7_i32_62 : i32
      %266 = arith.index_cast %265 : i32 to index
      %267 = memref.load %arg1[%266] : memref<640xf32, #tpu.memory_space<smem>>
      %c8_i32_63 = arith.constant 8 : i32
      %268 = arith.addi %243, %c8_i32_63 : i32
      %269 = arith.index_cast %268 : i32 to index
      %270 = memref.load %arg1[%269] : memref<640xf32, #tpu.memory_space<smem>>
      %c9_i32_64 = arith.constant 9 : i32
      %271 = arith.addi %243, %c9_i32_64 : i32
      %272 = arith.index_cast %271 : i32 to index
      %273 = memref.load %arg1[%272] : memref<640xf32, #tpu.memory_space<smem>>
      %274 = vector.broadcast %246 : f32 to vector<8x128xf32>
      %275 = arith.subf %274, %11 : vector<8x128xf32>
      %276 = vector.broadcast %249 : f32 to vector<8x128xf32>
      %277 = arith.subf %276, %8 : vector<8x128xf32>
      %278 = vector.broadcast %252 : f32 to vector<8x128xf32>
      %279 = arith.mulf %278, %275 : vector<8x128xf32>
      %280 = arith.mulf %279, %275 : vector<8x128xf32>
      %281 = vector.broadcast %258 : f32 to vector<8x128xf32>
      %282 = arith.mulf %281, %277 : vector<8x128xf32>
      %283 = arith.mulf %282, %277 : vector<8x128xf32>
      %284 = arith.addf %280, %283 : vector<8x128xf32>
      %285 = arith.mulf %275, %277 : vector<8x128xf32>
      %286 = vector.broadcast %255 : f32 to vector<8x128xf32>
      %287 = arith.mulf %286, %285 : vector<8x128xf32>
      %288 = arith.addf %284, %287 : vector<8x128xf32>
      %289 = math.exp %288 : vector<8x128xf32>
      %290 = vector.broadcast %261 : f32 to vector<8x128xf32>
      %291 = arith.mulf %290, %289 : vector<8x128xf32>
      %cst_65 = arith.constant 9.900000e-01 : f32
      %292 = vector.broadcast %cst_65 : f32 to vector<8x128xf32>
      %293 = arith.minimumf %292, %291 : vector<8x128xf32>
      %cst_66 = arith.constant 0.000000e+00 : f32
      %294 = vector.broadcast %cst_66 : f32 to vector<8x128xf32>
      %295 = arith.cmpf ole, %288, %294 : vector<8x128xf32>
      %cst_67 = arith.constant 0.00392156886 : f32
      %296 = vector.broadcast %cst_67 : f32 to vector<8x128xf32>
      %297 = arith.cmpf oge, %293, %296 : vector<8x128xf32>
      %298 = arith.andi %295, %297 : vector<8x128xi1>
      %cst_68 = arith.constant 1.000000e+00 : f32
      %299 = vector.broadcast %cst_68 : f32 to vector<8x128xf32>
      %300 = arith.subf %299, %293 : vector<8x128xf32>
      %301 = arith.mulf %232, %300 : vector<8x128xf32>
      %cst_69 = arith.constant 9.99999974E-5 : f32
      %302 = vector.broadcast %cst_69 : f32 to vector<8x128xf32>
      %303 = arith.cmpf oge, %301, %302 : vector<8x128xf32>
      %304 = arith.andi %298, %303 : vector<8x128xi1>
      %cst_70 = arith.constant 0.000000e+00 : f32
      %305 = vector.broadcast %cst_70 : f32 to vector<8x128xf32>
      %306 = arith.cmpf ogt, %232, %305 : vector<8x128xf32>
      %307 = arith.andi %298, %306 : vector<8x128xi1>
      %cst_71 = arith.constant 9.99999974E-5 : f32
      %308 = vector.broadcast %cst_71 : f32 to vector<8x128xf32>
      %309 = arith.cmpf olt, %301, %308 : vector<8x128xf32>
      %310 = arith.andi %307, %309 : vector<8x128xi1>
      %311 = arith.mulf %293, %232 : vector<8x128xf32>
      %cst_72 = arith.constant 0.000000e+00 : f32
      %312 = vector.broadcast %cst_72 : f32 to vector<8x128xf32>
      %313 = arith.select %304, %311, %312 : vector<8x128xi1>, vector<8x128xf32>
      %314 = vector.broadcast %264 : f32 to vector<8x128xf32>
      %315 = arith.mulf %314, %313 : vector<8x128xf32>
      %316 = arith.addf %219, %315 : vector<8x128xf32>
      %317 = vector.broadcast %267 : f32 to vector<8x128xf32>
      %318 = arith.mulf %317, %313 : vector<8x128xf32>
      %319 = arith.addf %222, %318 : vector<8x128xf32>
      %320 = vector.broadcast %270 : f32 to vector<8x128xf32>
      %321 = arith.mulf %320, %313 : vector<8x128xf32>
      %322 = arith.addf %225, %321 : vector<8x128xf32>
      %323 = vector.broadcast %273 : f32 to vector<8x128xf32>
      %324 = arith.mulf %323, %313 : vector<8x128xf32>
      %325 = arith.addf %228, %324 : vector<8x128xf32>
      %326 = arith.select %304, %301, %232 : vector<8x128xi1>, vector<8x128xf32>
      %cst_73 = arith.constant 0.000000e+00 : f32
      %327 = vector.broadcast %cst_73 : f32 to vector<8x128xf32>
      %328 = arith.subf %327, %326 : vector<8x128xf32>
      %329 = arith.select %310, %328, %326 : vector<8x128xi1>, vector<8x128xf32>
      %330 = arith.extui %304 : vector<8x128xi1> to vector<8x128xi32>
      %331 = arith.sitofp %330 : vector<8x128xi32> to vector<8x128xf32>
      %332 = vector.shape_cast %331 : vector<8x128xf32> to vector<1x8x128xf32>
      %cst_74 = arith.constant dense<0.000000e+00> : vector<1xf32>
      %333 = vector.multi_reduction <add>, %332, %cst_74 [1, 2] : vector<1x8x128xf32> to vector<1xf32>
      %334 = vector.shape_cast %333 : vector<1xf32> to vector<1x1x1xf32>
      %335 = vector.extract %334[0, 0, 0] : f32 from vector<1x1x1xf32>
      %336 = arith.fptosi %335 : f32 to i32
      %337 = arith.index_cast %242 : i32 to index
      %338 = memref.load %arg5[%337] : memref<64xi32, #tpu.memory_space<smem>>
      memref.store %336, %arg5[%337] : memref<64xi32, #tpu.memory_space<smem>>
      %c3_i32_75 = arith.constant 3 : i32
      %339 = arith.addi %47, %c3_i32_75 : i32
      %c10_i32_76 = arith.constant 10 : i32
      %340 = arith.muli %339, %c10_i32_76 : i32
      %c0_i32_77 = arith.constant 0 : i32
      %341 = arith.addi %340, %c0_i32_77 : i32
      %342 = arith.index_cast %341 : i32 to index
      %343 = memref.load %arg1[%342] : memref<640xf32, #tpu.memory_space<smem>>
      %c1_i32_78 = arith.constant 1 : i32
      %344 = arith.addi %340, %c1_i32_78 : i32
      %345 = arith.index_cast %344 : i32 to index
      %346 = memref.load %arg1[%345] : memref<640xf32, #tpu.memory_space<smem>>
      %c2_i32_79 = arith.constant 2 : i32
      %347 = arith.addi %340, %c2_i32_79 : i32
      %348 = arith.index_cast %347 : i32 to index
      %349 = memref.load %arg1[%348] : memref<640xf32, #tpu.memory_space<smem>>
      %c3_i32_80 = arith.constant 3 : i32
      %350 = arith.addi %340, %c3_i32_80 : i32
      %351 = arith.index_cast %350 : i32 to index
      %352 = memref.load %arg1[%351] : memref<640xf32, #tpu.memory_space<smem>>
      %c4_i32_81 = arith.constant 4 : i32
      %353 = arith.addi %340, %c4_i32_81 : i32
      %354 = arith.index_cast %353 : i32 to index
      %355 = memref.load %arg1[%354] : memref<640xf32, #tpu.memory_space<smem>>
      %c5_i32_82 = arith.constant 5 : i32
      %356 = arith.addi %340, %c5_i32_82 : i32
      %357 = arith.index_cast %356 : i32 to index
      %358 = memref.load %arg1[%357] : memref<640xf32, #tpu.memory_space<smem>>
      %c6_i32_83 = arith.constant 6 : i32
      %359 = arith.addi %340, %c6_i32_83 : i32
      %360 = arith.index_cast %359 : i32 to index
      %361 = memref.load %arg1[%360] : memref<640xf32, #tpu.memory_space<smem>>
      %c7_i32_84 = arith.constant 7 : i32
      %362 = arith.addi %340, %c7_i32_84 : i32
      %363 = arith.index_cast %362 : i32 to index
      %364 = memref.load %arg1[%363] : memref<640xf32, #tpu.memory_space<smem>>
      %c8_i32_85 = arith.constant 8 : i32
      %365 = arith.addi %340, %c8_i32_85 : i32
      %366 = arith.index_cast %365 : i32 to index
      %367 = memref.load %arg1[%366] : memref<640xf32, #tpu.memory_space<smem>>
      %c9_i32_86 = arith.constant 9 : i32
      %368 = arith.addi %340, %c9_i32_86 : i32
      %369 = arith.index_cast %368 : i32 to index
      %370 = memref.load %arg1[%369] : memref<640xf32, #tpu.memory_space<smem>>
      %371 = vector.broadcast %343 : f32 to vector<8x128xf32>
      %372 = arith.subf %371, %11 : vector<8x128xf32>
      %373 = vector.broadcast %346 : f32 to vector<8x128xf32>
      %374 = arith.subf %373, %8 : vector<8x128xf32>
      %375 = vector.broadcast %349 : f32 to vector<8x128xf32>
      %376 = arith.mulf %375, %372 : vector<8x128xf32>
      %377 = arith.mulf %376, %372 : vector<8x128xf32>
      %378 = vector.broadcast %355 : f32 to vector<8x128xf32>
      %379 = arith.mulf %378, %374 : vector<8x128xf32>
      %380 = arith.mulf %379, %374 : vector<8x128xf32>
      %381 = arith.addf %377, %380 : vector<8x128xf32>
      %382 = arith.mulf %372, %374 : vector<8x128xf32>
      %383 = vector.broadcast %352 : f32 to vector<8x128xf32>
      %384 = arith.mulf %383, %382 : vector<8x128xf32>
      %385 = arith.addf %381, %384 : vector<8x128xf32>
      %386 = math.exp %385 : vector<8x128xf32>
      %387 = vector.broadcast %358 : f32 to vector<8x128xf32>
      %388 = arith.mulf %387, %386 : vector<8x128xf32>
      %cst_87 = arith.constant 9.900000e-01 : f32
      %389 = vector.broadcast %cst_87 : f32 to vector<8x128xf32>
      %390 = arith.minimumf %389, %388 : vector<8x128xf32>
      %cst_88 = arith.constant 0.000000e+00 : f32
      %391 = vector.broadcast %cst_88 : f32 to vector<8x128xf32>
      %392 = arith.cmpf ole, %385, %391 : vector<8x128xf32>
      %cst_89 = arith.constant 0.00392156886 : f32
      %393 = vector.broadcast %cst_89 : f32 to vector<8x128xf32>
      %394 = arith.cmpf oge, %390, %393 : vector<8x128xf32>
      %395 = arith.andi %392, %394 : vector<8x128xi1>
      %cst_90 = arith.constant 1.000000e+00 : f32
      %396 = vector.broadcast %cst_90 : f32 to vector<8x128xf32>
      %397 = arith.subf %396, %390 : vector<8x128xf32>
      %398 = arith.mulf %329, %397 : vector<8x128xf32>
      %cst_91 = arith.constant 9.99999974E-5 : f32
      %399 = vector.broadcast %cst_91 : f32 to vector<8x128xf32>
      %400 = arith.cmpf oge, %398, %399 : vector<8x128xf32>
      %401 = arith.andi %395, %400 : vector<8x128xi1>
      %cst_92 = arith.constant 0.000000e+00 : f32
      %402 = vector.broadcast %cst_92 : f32 to vector<8x128xf32>
      %403 = arith.cmpf ogt, %329, %402 : vector<8x128xf32>
      %404 = arith.andi %395, %403 : vector<8x128xi1>
      %cst_93 = arith.constant 9.99999974E-5 : f32
      %405 = vector.broadcast %cst_93 : f32 to vector<8x128xf32>
      %406 = arith.cmpf olt, %398, %405 : vector<8x128xf32>
      %407 = arith.andi %404, %406 : vector<8x128xi1>
      %408 = arith.mulf %390, %329 : vector<8x128xf32>
      %cst_94 = arith.constant 0.000000e+00 : f32
      %409 = vector.broadcast %cst_94 : f32 to vector<8x128xf32>
      %410 = arith.select %401, %408, %409 : vector<8x128xi1>, vector<8x128xf32>
      %411 = vector.broadcast %361 : f32 to vector<8x128xf32>
      %412 = arith.mulf %411, %410 : vector<8x128xf32>
      %413 = arith.addf %316, %412 : vector<8x128xf32>
      %414 = vector.broadcast %364 : f32 to vector<8x128xf32>
      %415 = arith.mulf %414, %410 : vector<8x128xf32>
      %416 = arith.addf %319, %415 : vector<8x128xf32>
      %417 = vector.broadcast %367 : f32 to vector<8x128xf32>
      %418 = arith.mulf %417, %410 : vector<8x128xf32>
      %419 = arith.addf %322, %418 : vector<8x128xf32>
      %420 = vector.broadcast %370 : f32 to vector<8x128xf32>
      %421 = arith.mulf %420, %410 : vector<8x128xf32>
      %422 = arith.addf %325, %421 : vector<8x128xf32>
      %423 = arith.select %401, %398, %329 : vector<8x128xi1>, vector<8x128xf32>
      %cst_95 = arith.constant 0.000000e+00 : f32
      %424 = vector.broadcast %cst_95 : f32 to vector<8x128xf32>
      %425 = arith.subf %424, %423 : vector<8x128xf32>
      %426 = arith.select %407, %425, %423 : vector<8x128xi1>, vector<8x128xf32>
      %427 = arith.extui %401 : vector<8x128xi1> to vector<8x128xi32>
      %428 = arith.sitofp %427 : vector<8x128xi32> to vector<8x128xf32>
      %429 = vector.shape_cast %428 : vector<8x128xf32> to vector<1x8x128xf32>
      %cst_96 = arith.constant dense<0.000000e+00> : vector<1xf32>
      %430 = vector.multi_reduction <add>, %429, %cst_96 [1, 2] : vector<1x8x128xf32> to vector<1xf32>
      %431 = vector.shape_cast %430 : vector<1xf32> to vector<1x1x1xf32>
      %432 = vector.extract %431[0, 0, 0] : f32 from vector<1x1x1xf32>
      %433 = arith.fptosi %432 : f32 to i32
      %434 = arith.index_cast %339 : i32 to index
      %435 = memref.load %arg5[%434] : memref<64xi32, #tpu.memory_space<smem>>
      memref.store %433, %arg5[%434] : memref<64xi32, #tpu.memory_space<smem>>
      %c4_i32_97 = arith.constant 4 : i32
      %436 = arith.addi %47, %c4_i32_97 : i32
      %c10_i32_98 = arith.constant 10 : i32
      %437 = arith.muli %436, %c10_i32_98 : i32
      %c0_i32_99 = arith.constant 0 : i32
      %438 = arith.addi %437, %c0_i32_99 : i32
      %439 = arith.index_cast %438 : i32 to index
      %440 = memref.load %arg1[%439] : memref<640xf32, #tpu.memory_space<smem>>
      %c1_i32_100 = arith.constant 1 : i32
      %441 = arith.addi %437, %c1_i32_100 : i32
      %442 = arith.index_cast %441 : i32 to index
      %443 = memref.load %arg1[%442] : memref<640xf32, #tpu.memory_space<smem>>
      %c2_i32_101 = arith.constant 2 : i32
      %444 = arith.addi %437, %c2_i32_101 : i32
      %445 = arith.index_cast %444 : i32 to index
      %446 = memref.load %arg1[%445] : memref<640xf32, #tpu.memory_space<smem>>
      %c3_i32_102 = arith.constant 3 : i32
      %447 = arith.addi %437, %c3_i32_102 : i32
      %448 = arith.index_cast %447 : i32 to index
      %449 = memref.load %arg1[%448] : memref<640xf32, #tpu.memory_space<smem>>
      %c4_i32_103 = arith.constant 4 : i32
      %450 = arith.addi %437, %c4_i32_103 : i32
      %451 = arith.index_cast %450 : i32 to index
      %452 = memref.load %arg1[%451] : memref<640xf32, #tpu.memory_space<smem>>
      %c5_i32_104 = arith.constant 5 : i32
      %453 = arith.addi %437, %c5_i32_104 : i32
      %454 = arith.index_cast %453 : i32 to index
      %455 = memref.load %arg1[%454] : memref<640xf32, #tpu.memory_space<smem>>
      %c6_i32_105 = arith.constant 6 : i32
      %456 = arith.addi %437, %c6_i32_105 : i32
      %457 = arith.index_cast %456 : i32 to index
      %458 = memref.load %arg1[%457] : memref<640xf32, #tpu.memory_space<smem>>
      %c7_i32_106 = arith.constant 7 : i32
      %459 = arith.addi %437, %c7_i32_106 : i32
      %460 = arith.index_cast %459 : i32 to index
      %461 = memref.load %arg1[%460] : memref<640xf32, #tpu.memory_space<smem>>
      %c8_i32_107 = arith.constant 8 : i32
      %462 = arith.addi %437, %c8_i32_107 : i32
      %463 = arith.index_cast %462 : i32 to index
      %464 = memref.load %arg1[%463] : memref<640xf32, #tpu.memory_space<smem>>
      %c9_i32_108 = arith.constant 9 : i32
      %465 = arith.addi %437, %c9_i32_108 : i32
      %466 = arith.index_cast %465 : i32 to index
      %467 = memref.load %arg1[%466] : memref<640xf32, #tpu.memory_space<smem>>
      %468 = vector.broadcast %440 : f32 to vector<8x128xf32>
      %469 = arith.subf %468, %11 : vector<8x128xf32>
      %470 = vector.broadcast %443 : f32 to vector<8x128xf32>
      %471 = arith.subf %470, %8 : vector<8x128xf32>
      %472 = vector.broadcast %446 : f32 to vector<8x128xf32>
      %473 = arith.mulf %472, %469 : vector<8x128xf32>
      %474 = arith.mulf %473, %469 : vector<8x128xf32>
      %475 = vector.broadcast %452 : f32 to vector<8x128xf32>
      %476 = arith.mulf %475, %471 : vector<8x128xf32>
      %477 = arith.mulf %476, %471 : vector<8x128xf32>
      %478 = arith.addf %474, %477 : vector<8x128xf32>
      %479 = arith.mulf %469, %471 : vector<8x128xf32>
      %480 = vector.broadcast %449 : f32 to vector<8x128xf32>
      %481 = arith.mulf %480, %479 : vector<8x128xf32>
      %482 = arith.addf %478, %481 : vector<8x128xf32>
      %483 = math.exp %482 : vector<8x128xf32>
      %484 = vector.broadcast %455 : f32 to vector<8x128xf32>
      %485 = arith.mulf %484, %483 : vector<8x128xf32>
      %cst_109 = arith.constant 9.900000e-01 : f32
      %486 = vector.broadcast %cst_109 : f32 to vector<8x128xf32>
      %487 = arith.minimumf %486, %485 : vector<8x128xf32>
      %cst_110 = arith.constant 0.000000e+00 : f32
      %488 = vector.broadcast %cst_110 : f32 to vector<8x128xf32>
      %489 = arith.cmpf ole, %482, %488 : vector<8x128xf32>
      %cst_111 = arith.constant 0.00392156886 : f32
      %490 = vector.broadcast %cst_111 : f32 to vector<8x128xf32>
      %491 = arith.cmpf oge, %487, %490 : vector<8x128xf32>
      %492 = arith.andi %489, %491 : vector<8x128xi1>
      %cst_112 = arith.constant 1.000000e+00 : f32
      %493 = vector.broadcast %cst_112 : f32 to vector<8x128xf32>
      %494 = arith.subf %493, %487 : vector<8x128xf32>
      %495 = arith.mulf %426, %494 : vector<8x128xf32>
      %cst_113 = arith.constant 9.99999974E-5 : f32
      %496 = vector.broadcast %cst_113 : f32 to vector<8x128xf32>
      %497 = arith.cmpf oge, %495, %496 : vector<8x128xf32>
      %498 = arith.andi %492, %497 : vector<8x128xi1>
      %cst_114 = arith.constant 0.000000e+00 : f32
      %499 = vector.broadcast %cst_114 : f32 to vector<8x128xf32>
      %500 = arith.cmpf ogt, %426, %499 : vector<8x128xf32>
      %501 = arith.andi %492, %500 : vector<8x128xi1>
      %cst_115 = arith.constant 9.99999974E-5 : f32
      %502 = vector.broadcast %cst_115 : f32 to vector<8x128xf32>
      %503 = arith.cmpf olt, %495, %502 : vector<8x128xf32>
      %504 = arith.andi %501, %503 : vector<8x128xi1>
      %505 = arith.mulf %487, %426 : vector<8x128xf32>
      %cst_116 = arith.constant 0.000000e+00 : f32
      %506 = vector.broadcast %cst_116 : f32 to vector<8x128xf32>
      %507 = arith.select %498, %505, %506 : vector<8x128xi1>, vector<8x128xf32>
      %508 = vector.broadcast %458 : f32 to vector<8x128xf32>
      %509 = arith.mulf %508, %507 : vector<8x128xf32>
      %510 = arith.addf %413, %509 : vector<8x128xf32>
      %511 = vector.broadcast %461 : f32 to vector<8x128xf32>
      %512 = arith.mulf %511, %507 : vector<8x128xf32>
      %513 = arith.addf %416, %512 : vector<8x128xf32>
      %514 = vector.broadcast %464 : f32 to vector<8x128xf32>
      %515 = arith.mulf %514, %507 : vector<8x128xf32>
      %516 = arith.addf %419, %515 : vector<8x128xf32>
      %517 = vector.broadcast %467 : f32 to vector<8x128xf32>
      %518 = arith.mulf %517, %507 : vector<8x128xf32>
      %519 = arith.addf %422, %518 : vector<8x128xf32>
      %520 = arith.select %498, %495, %426 : vector<8x128xi1>, vector<8x128xf32>
      %cst_117 = arith.constant 0.000000e+00 : f32
      %521 = vector.broadcast %cst_117 : f32 to vector<8x128xf32>
      %522 = arith.subf %521, %520 : vector<8x128xf32>
      %523 = arith.select %504, %522, %520 : vector<8x128xi1>, vector<8x128xf32>
      %524 = arith.extui %498 : vector<8x128xi1> to vector<8x128xi32>
      %525 = arith.sitofp %524 : vector<8x128xi32> to vector<8x128xf32>
      %526 = vector.shape_cast %525 : vector<8x128xf32> to vector<1x8x128xf32>
      %cst_118 = arith.constant dense<0.000000e+00> : vector<1xf32>
      %527 = vector.multi_reduction <add>, %526, %cst_118 [1, 2] : vector<1x8x128xf32> to vector<1xf32>
      %528 = vector.shape_cast %527 : vector<1xf32> to vector<1x1x1xf32>
      %529 = vector.extract %528[0, 0, 0] : f32 from vector<1x1x1xf32>
      %530 = arith.fptosi %529 : f32 to i32
      %531 = arith.index_cast %436 : i32 to index
      %532 = memref.load %arg5[%531] : memref<64xi32, #tpu.memory_space<smem>>
      memref.store %530, %arg5[%531] : memref<64xi32, #tpu.memory_space<smem>>
      %c5_i32_119 = arith.constant 5 : i32
      %533 = arith.addi %47, %c5_i32_119 : i32
      %c10_i32_120 = arith.constant 10 : i32
      %534 = arith.muli %533, %c10_i32_120 : i32
      %c0_i32_121 = arith.constant 0 : i32
      %535 = arith.addi %534, %c0_i32_121 : i32
      %536 = arith.index_cast %535 : i32 to index
      %537 = memref.load %arg1[%536] : memref<640xf32, #tpu.memory_space<smem>>
      %c1_i32_122 = arith.constant 1 : i32
      %538 = arith.addi %534, %c1_i32_122 : i32
      %539 = arith.index_cast %538 : i32 to index
      %540 = memref.load %arg1[%539] : memref<640xf32, #tpu.memory_space<smem>>
      %c2_i32_123 = arith.constant 2 : i32
      %541 = arith.addi %534, %c2_i32_123 : i32
      %542 = arith.index_cast %541 : i32 to index
      %543 = memref.load %arg1[%542] : memref<640xf32, #tpu.memory_space<smem>>
      %c3_i32_124 = arith.constant 3 : i32
      %544 = arith.addi %534, %c3_i32_124 : i32
      %545 = arith.index_cast %544 : i32 to index
      %546 = memref.load %arg1[%545] : memref<640xf32, #tpu.memory_space<smem>>
      %c4_i32_125 = arith.constant 4 : i32
      %547 = arith.addi %534, %c4_i32_125 : i32
      %548 = arith.index_cast %547 : i32 to index
      %549 = memref.load %arg1[%548] : memref<640xf32, #tpu.memory_space<smem>>
      %c5_i32_126 = arith.constant 5 : i32
      %550 = arith.addi %534, %c5_i32_126 : i32
      %551 = arith.index_cast %550 : i32 to index
      %552 = memref.load %arg1[%551] : memref<640xf32, #tpu.memory_space<smem>>
      %c6_i32_127 = arith.constant 6 : i32
      %553 = arith.addi %534, %c6_i32_127 : i32
      %554 = arith.index_cast %553 : i32 to index
      %555 = memref.load %arg1[%554] : memref<640xf32, #tpu.memory_space<smem>>
      %c7_i32_128 = arith.constant 7 : i32
      %556 = arith.addi %534, %c7_i32_128 : i32
      %557 = arith.index_cast %556 : i32 to index
      %558 = memref.load %arg1[%557] : memref<640xf32, #tpu.memory_space<smem>>
      %c8_i32_129 = arith.constant 8 : i32
      %559 = arith.addi %534, %c8_i32_129 : i32
      %560 = arith.index_cast %559 : i32 to index
      %561 = memref.load %arg1[%560] : memref<640xf32, #tpu.memory_space<smem>>
      %c9_i32_130 = arith.constant 9 : i32
      %562 = arith.addi %534, %c9_i32_130 : i32
      %563 = arith.index_cast %562 : i32 to index
      %564 = memref.load %arg1[%563] : memref<640xf32, #tpu.memory_space<smem>>
      %565 = vector.broadcast %537 : f32 to vector<8x128xf32>
      %566 = arith.subf %565, %11 : vector<8x128xf32>
      %567 = vector.broadcast %540 : f32 to vector<8x128xf32>
      %568 = arith.subf %567, %8 : vector<8x128xf32>
      %569 = vector.broadcast %543 : f32 to vector<8x128xf32>
      %570 = arith.mulf %569, %566 : vector<8x128xf32>
      %571 = arith.mulf %570, %566 : vector<8x128xf32>
      %572 = vector.broadcast %549 : f32 to vector<8x128xf32>
      %573 = arith.mulf %572, %568 : vector<8x128xf32>
      %574 = arith.mulf %573, %568 : vector<8x128xf32>
      %575 = arith.addf %571, %574 : vector<8x128xf32>
      %576 = arith.mulf %566, %568 : vector<8x128xf32>
      %577 = vector.broadcast %546 : f32 to vector<8x128xf32>
      %578 = arith.mulf %577, %576 : vector<8x128xf32>
      %579 = arith.addf %575, %578 : vector<8x128xf32>
      %580 = math.exp %579 : vector<8x128xf32>
      %581 = vector.broadcast %552 : f32 to vector<8x128xf32>
      %582 = arith.mulf %581, %580 : vector<8x128xf32>
      %cst_131 = arith.constant 9.900000e-01 : f32
      %583 = vector.broadcast %cst_131 : f32 to vector<8x128xf32>
      %584 = arith.minimumf %583, %582 : vector<8x128xf32>
      %cst_132 = arith.constant 0.000000e+00 : f32
      %585 = vector.broadcast %cst_132 : f32 to vector<8x128xf32>
      %586 = arith.cmpf ole, %579, %585 : vector<8x128xf32>
      %cst_133 = arith.constant 0.00392156886 : f32
      %587 = vector.broadcast %cst_133 : f32 to vector<8x128xf32>
      %588 = arith.cmpf oge, %584, %587 : vector<8x128xf32>
      %589 = arith.andi %586, %588 : vector<8x128xi1>
      %cst_134 = arith.constant 1.000000e+00 : f32
      %590 = vector.broadcast %cst_134 : f32 to vector<8x128xf32>
      %591 = arith.subf %590, %584 : vector<8x128xf32>
      %592 = arith.mulf %523, %591 : vector<8x128xf32>
      %cst_135 = arith.constant 9.99999974E-5 : f32
      %593 = vector.broadcast %cst_135 : f32 to vector<8x128xf32>
      %594 = arith.cmpf oge, %592, %593 : vector<8x128xf32>
      %595 = arith.andi %589, %594 : vector<8x128xi1>
      %cst_136 = arith.constant 0.000000e+00 : f32
      %596 = vector.broadcast %cst_136 : f32 to vector<8x128xf32>
      %597 = arith.cmpf ogt, %523, %596 : vector<8x128xf32>
      %598 = arith.andi %589, %597 : vector<8x128xi1>
      %cst_137 = arith.constant 9.99999974E-5 : f32
      %599 = vector.broadcast %cst_137 : f32 to vector<8x128xf32>
      %600 = arith.cmpf olt, %592, %599 : vector<8x128xf32>
      %601 = arith.andi %598, %600 : vector<8x128xi1>
      %602 = arith.mulf %584, %523 : vector<8x128xf32>
      %cst_138 = arith.constant 0.000000e+00 : f32
      %603 = vector.broadcast %cst_138 : f32 to vector<8x128xf32>
      %604 = arith.select %595, %602, %603 : vector<8x128xi1>, vector<8x128xf32>
      %605 = vector.broadcast %555 : f32 to vector<8x128xf32>
      %606 = arith.mulf %605, %604 : vector<8x128xf32>
      %607 = arith.addf %510, %606 : vector<8x128xf32>
      %608 = vector.broadcast %558 : f32 to vector<8x128xf32>
      %609 = arith.mulf %608, %604 : vector<8x128xf32>
      %610 = arith.addf %513, %609 : vector<8x128xf32>
      %611 = vector.broadcast %561 : f32 to vector<8x128xf32>
      %612 = arith.mulf %611, %604 : vector<8x128xf32>
      %613 = arith.addf %516, %612 : vector<8x128xf32>
      %614 = vector.broadcast %564 : f32 to vector<8x128xf32>
      %615 = arith.mulf %614, %604 : vector<8x128xf32>
      %616 = arith.addf %519, %615 : vector<8x128xf32>
      %617 = arith.select %595, %592, %523 : vector<8x128xi1>, vector<8x128xf32>
      %cst_139 = arith.constant 0.000000e+00 : f32
      %618 = vector.broadcast %cst_139 : f32 to vector<8x128xf32>
      %619 = arith.subf %618, %617 : vector<8x128xf32>
      %620 = arith.select %601, %619, %617 : vector<8x128xi1>, vector<8x128xf32>
      %621 = arith.extui %595 : vector<8x128xi1> to vector<8x128xi32>
      %622 = arith.sitofp %621 : vector<8x128xi32> to vector<8x128xf32>
      %623 = vector.shape_cast %622 : vector<8x128xf32> to vector<1x8x128xf32>
      %cst_140 = arith.constant dense<0.000000e+00> : vector<1xf32>
      %624 = vector.multi_reduction <add>, %623, %cst_140 [1, 2] : vector<1x8x128xf32> to vector<1xf32>
      %625 = vector.shape_cast %624 : vector<1xf32> to vector<1x1x1xf32>
      %626 = vector.extract %625[0, 0, 0] : f32 from vector<1x1x1xf32>
      %627 = arith.fptosi %626 : f32 to i32
      %628 = arith.index_cast %533 : i32 to index
      %629 = memref.load %arg5[%628] : memref<64xi32, #tpu.memory_space<smem>>
      memref.store %627, %arg5[%628] : memref<64xi32, #tpu.memory_space<smem>>
      %c6_i32_141 = arith.constant 6 : i32
      %630 = arith.addi %47, %c6_i32_141 : i32
      %c10_i32_142 = arith.constant 10 : i32
      %631 = arith.muli %630, %c10_i32_142 : i32
      %c0_i32_143 = arith.constant 0 : i32
      %632 = arith.addi %631, %c0_i32_143 : i32
      %633 = arith.index_cast %632 : i32 to index
      %634 = memref.load %arg1[%633] : memref<640xf32, #tpu.memory_space<smem>>
      %c1_i32_144 = arith.constant 1 : i32
      %635 = arith.addi %631, %c1_i32_144 : i32
      %636 = arith.index_cast %635 : i32 to index
      %637 = memref.load %arg1[%636] : memref<640xf32, #tpu.memory_space<smem>>
      %c2_i32_145 = arith.constant 2 : i32
      %638 = arith.addi %631, %c2_i32_145 : i32
      %639 = arith.index_cast %638 : i32 to index
      %640 = memref.load %arg1[%639] : memref<640xf32, #tpu.memory_space<smem>>
      %c3_i32_146 = arith.constant 3 : i32
      %641 = arith.addi %631, %c3_i32_146 : i32
      %642 = arith.index_cast %641 : i32 to index
      %643 = memref.load %arg1[%642] : memref<640xf32, #tpu.memory_space<smem>>
      %c4_i32_147 = arith.constant 4 : i32
      %644 = arith.addi %631, %c4_i32_147 : i32
      %645 = arith.index_cast %644 : i32 to index
      %646 = memref.load %arg1[%645] : memref<640xf32, #tpu.memory_space<smem>>
      %c5_i32_148 = arith.constant 5 : i32
      %647 = arith.addi %631, %c5_i32_148 : i32
      %648 = arith.index_cast %647 : i32 to index
      %649 = memref.load %arg1[%648] : memref<640xf32, #tpu.memory_space<smem>>
      %c6_i32_149 = arith.constant 6 : i32
      %650 = arith.addi %631, %c6_i32_149 : i32
      %651 = arith.index_cast %650 : i32 to index
      %652 = memref.load %arg1[%651] : memref<640xf32, #tpu.memory_space<smem>>
      %c7_i32_150 = arith.constant 7 : i32
      %653 = arith.addi %631, %c7_i32_150 : i32
      %654 = arith.index_cast %653 : i32 to index
      %655 = memref.load %arg1[%654] : memref<640xf32, #tpu.memory_space<smem>>
      %c8_i32_151 = arith.constant 8 : i32
      %656 = arith.addi %631, %c8_i32_151 : i32
      %657 = arith.index_cast %656 : i32 to index
      %658 = memref.load %arg1[%657] : memref<640xf32, #tpu.memory_space<smem>>
      %c9_i32_152 = arith.constant 9 : i32
      %659 = arith.addi %631, %c9_i32_152 : i32
      %660 = arith.index_cast %659 : i32 to index
      %661 = memref.load %arg1[%660] : memref<640xf32, #tpu.memory_space<smem>>
      %662 = vector.broadcast %634 : f32 to vector<8x128xf32>
      %663 = arith.subf %662, %11 : vector<8x128xf32>
      %664 = vector.broadcast %637 : f32 to vector<8x128xf32>
      %665 = arith.subf %664, %8 : vector<8x128xf32>
      %666 = vector.broadcast %640 : f32 to vector<8x128xf32>
      %667 = arith.mulf %666, %663 : vector<8x128xf32>
      %668 = arith.mulf %667, %663 : vector<8x128xf32>
      %669 = vector.broadcast %646 : f32 to vector<8x128xf32>
      %670 = arith.mulf %669, %665 : vector<8x128xf32>
      %671 = arith.mulf %670, %665 : vector<8x128xf32>
      %672 = arith.addf %668, %671 : vector<8x128xf32>
      %673 = arith.mulf %663, %665 : vector<8x128xf32>
      %674 = vector.broadcast %643 : f32 to vector<8x128xf32>
      %675 = arith.mulf %674, %673 : vector<8x128xf32>
      %676 = arith.addf %672, %675 : vector<8x128xf32>
      %677 = math.exp %676 : vector<8x128xf32>
      %678 = vector.broadcast %649 : f32 to vector<8x128xf32>
      %679 = arith.mulf %678, %677 : vector<8x128xf32>
      %cst_153 = arith.constant 9.900000e-01 : f32
      %680 = vector.broadcast %cst_153 : f32 to vector<8x128xf32>
      %681 = arith.minimumf %680, %679 : vector<8x128xf32>
      %cst_154 = arith.constant 0.000000e+00 : f32
      %682 = vector.broadcast %cst_154 : f32 to vector<8x128xf32>
      %683 = arith.cmpf ole, %676, %682 : vector<8x128xf32>
      %cst_155 = arith.constant 0.00392156886 : f32
      %684 = vector.broadcast %cst_155 : f32 to vector<8x128xf32>
      %685 = arith.cmpf oge, %681, %684 : vector<8x128xf32>
      %686 = arith.andi %683, %685 : vector<8x128xi1>
      %cst_156 = arith.constant 1.000000e+00 : f32
      %687 = vector.broadcast %cst_156 : f32 to vector<8x128xf32>
      %688 = arith.subf %687, %681 : vector<8x128xf32>
      %689 = arith.mulf %620, %688 : vector<8x128xf32>
      %cst_157 = arith.constant 9.99999974E-5 : f32
      %690 = vector.broadcast %cst_157 : f32 to vector<8x128xf32>
      %691 = arith.cmpf oge, %689, %690 : vector<8x128xf32>
      %692 = arith.andi %686, %691 : vector<8x128xi1>
      %cst_158 = arith.constant 0.000000e+00 : f32
      %693 = vector.broadcast %cst_158 : f32 to vector<8x128xf32>
      %694 = arith.cmpf ogt, %620, %693 : vector<8x128xf32>
      %695 = arith.andi %686, %694 : vector<8x128xi1>
      %cst_159 = arith.constant 9.99999974E-5 : f32
      %696 = vector.broadcast %cst_159 : f32 to vector<8x128xf32>
      %697 = arith.cmpf olt, %689, %696 : vector<8x128xf32>
      %698 = arith.andi %695, %697 : vector<8x128xi1>
      %699 = arith.mulf %681, %620 : vector<8x128xf32>
      %cst_160 = arith.constant 0.000000e+00 : f32
      %700 = vector.broadcast %cst_160 : f32 to vector<8x128xf32>
      %701 = arith.select %692, %699, %700 : vector<8x128xi1>, vector<8x128xf32>
      %702 = vector.broadcast %652 : f32 to vector<8x128xf32>
      %703 = arith.mulf %702, %701 : vector<8x128xf32>
      %704 = arith.addf %607, %703 : vector<8x128xf32>
      %705 = vector.broadcast %655 : f32 to vector<8x128xf32>
      %706 = arith.mulf %705, %701 : vector<8x128xf32>
      %707 = arith.addf %610, %706 : vector<8x128xf32>
      %708 = vector.broadcast %658 : f32 to vector<8x128xf32>
      %709 = arith.mulf %708, %701 : vector<8x128xf32>
      %710 = arith.addf %613, %709 : vector<8x128xf32>
      %711 = vector.broadcast %661 : f32 to vector<8x128xf32>
      %712 = arith.mulf %711, %701 : vector<8x128xf32>
      %713 = arith.addf %616, %712 : vector<8x128xf32>
      %714 = arith.select %692, %689, %620 : vector<8x128xi1>, vector<8x128xf32>
      %cst_161 = arith.constant 0.000000e+00 : f32
      %715 = vector.broadcast %cst_161 : f32 to vector<8x128xf32>
      %716 = arith.subf %715, %714 : vector<8x128xf32>
      %717 = arith.select %698, %716, %714 : vector<8x128xi1>, vector<8x128xf32>
      %718 = arith.extui %692 : vector<8x128xi1> to vector<8x128xi32>
      %719 = arith.sitofp %718 : vector<8x128xi32> to vector<8x128xf32>
      %720 = vector.shape_cast %719 : vector<8x128xf32> to vector<1x8x128xf32>
      %cst_162 = arith.constant dense<0.000000e+00> : vector<1xf32>
      %721 = vector.multi_reduction <add>, %720, %cst_162 [1, 2] : vector<1x8x128xf32> to vector<1xf32>
      %722 = vector.shape_cast %721 : vector<1xf32> to vector<1x1x1xf32>
      %723 = vector.extract %722[0, 0, 0] : f32 from vector<1x1x1xf32>
      %724 = arith.fptosi %723 : f32 to i32
      %725 = arith.index_cast %630 : i32 to index
      %726 = memref.load %arg5[%725] : memref<64xi32, #tpu.memory_space<smem>>
      memref.store %724, %arg5[%725] : memref<64xi32, #tpu.memory_space<smem>>
      %c7_i32_163 = arith.constant 7 : i32
      %727 = arith.addi %47, %c7_i32_163 : i32
      %c10_i32_164 = arith.constant 10 : i32
      %728 = arith.muli %727, %c10_i32_164 : i32
      %c0_i32_165 = arith.constant 0 : i32
      %729 = arith.addi %728, %c0_i32_165 : i32
      %730 = arith.index_cast %729 : i32 to index
      %731 = memref.load %arg1[%730] : memref<640xf32, #tpu.memory_space<smem>>
      %c1_i32_166 = arith.constant 1 : i32
      %732 = arith.addi %728, %c1_i32_166 : i32
      %733 = arith.index_cast %732 : i32 to index
      %734 = memref.load %arg1[%733] : memref<640xf32, #tpu.memory_space<smem>>
      %c2_i32_167 = arith.constant 2 : i32
      %735 = arith.addi %728, %c2_i32_167 : i32
      %736 = arith.index_cast %735 : i32 to index
      %737 = memref.load %arg1[%736] : memref<640xf32, #tpu.memory_space<smem>>
      %c3_i32_168 = arith.constant 3 : i32
      %738 = arith.addi %728, %c3_i32_168 : i32
      %739 = arith.index_cast %738 : i32 to index
      %740 = memref.load %arg1[%739] : memref<640xf32, #tpu.memory_space<smem>>
      %c4_i32_169 = arith.constant 4 : i32
      %741 = arith.addi %728, %c4_i32_169 : i32
      %742 = arith.index_cast %741 : i32 to index
      %743 = memref.load %arg1[%742] : memref<640xf32, #tpu.memory_space<smem>>
      %c5_i32_170 = arith.constant 5 : i32
      %744 = arith.addi %728, %c5_i32_170 : i32
      %745 = arith.index_cast %744 : i32 to index
      %746 = memref.load %arg1[%745] : memref<640xf32, #tpu.memory_space<smem>>
      %c6_i32_171 = arith.constant 6 : i32
      %747 = arith.addi %728, %c6_i32_171 : i32
      %748 = arith.index_cast %747 : i32 to index
      %749 = memref.load %arg1[%748] : memref<640xf32, #tpu.memory_space<smem>>
      %c7_i32_172 = arith.constant 7 : i32
      %750 = arith.addi %728, %c7_i32_172 : i32
      %751 = arith.index_cast %750 : i32 to index
      %752 = memref.load %arg1[%751] : memref<640xf32, #tpu.memory_space<smem>>
      %c8_i32_173 = arith.constant 8 : i32
      %753 = arith.addi %728, %c8_i32_173 : i32
      %754 = arith.index_cast %753 : i32 to index
      %755 = memref.load %arg1[%754] : memref<640xf32, #tpu.memory_space<smem>>
      %c9_i32_174 = arith.constant 9 : i32
      %756 = arith.addi %728, %c9_i32_174 : i32
      %757 = arith.index_cast %756 : i32 to index
      %758 = memref.load %arg1[%757] : memref<640xf32, #tpu.memory_space<smem>>
      %759 = vector.broadcast %731 : f32 to vector<8x128xf32>
      %760 = arith.subf %759, %11 : vector<8x128xf32>
      %761 = vector.broadcast %734 : f32 to vector<8x128xf32>
      %762 = arith.subf %761, %8 : vector<8x128xf32>
      %763 = vector.broadcast %737 : f32 to vector<8x128xf32>
      %764 = arith.mulf %763, %760 : vector<8x128xf32>
      %765 = arith.mulf %764, %760 : vector<8x128xf32>
      %766 = vector.broadcast %743 : f32 to vector<8x128xf32>
      %767 = arith.mulf %766, %762 : vector<8x128xf32>
      %768 = arith.mulf %767, %762 : vector<8x128xf32>
      %769 = arith.addf %765, %768 : vector<8x128xf32>
      %770 = arith.mulf %760, %762 : vector<8x128xf32>
      %771 = vector.broadcast %740 : f32 to vector<8x128xf32>
      %772 = arith.mulf %771, %770 : vector<8x128xf32>
      %773 = arith.addf %769, %772 : vector<8x128xf32>
      %774 = math.exp %773 : vector<8x128xf32>
      %775 = vector.broadcast %746 : f32 to vector<8x128xf32>
      %776 = arith.mulf %775, %774 : vector<8x128xf32>
      %cst_175 = arith.constant 9.900000e-01 : f32
      %777 = vector.broadcast %cst_175 : f32 to vector<8x128xf32>
      %778 = arith.minimumf %777, %776 : vector<8x128xf32>
      %cst_176 = arith.constant 0.000000e+00 : f32
      %779 = vector.broadcast %cst_176 : f32 to vector<8x128xf32>
      %780 = arith.cmpf ole, %773, %779 : vector<8x128xf32>
      %cst_177 = arith.constant 0.00392156886 : f32
      %781 = vector.broadcast %cst_177 : f32 to vector<8x128xf32>
      %782 = arith.cmpf oge, %778, %781 : vector<8x128xf32>
      %783 = arith.andi %780, %782 : vector<8x128xi1>
      %cst_178 = arith.constant 1.000000e+00 : f32
      %784 = vector.broadcast %cst_178 : f32 to vector<8x128xf32>
      %785 = arith.subf %784, %778 : vector<8x128xf32>
      %786 = arith.mulf %717, %785 : vector<8x128xf32>
      %cst_179 = arith.constant 9.99999974E-5 : f32
      %787 = vector.broadcast %cst_179 : f32 to vector<8x128xf32>
      %788 = arith.cmpf oge, %786, %787 : vector<8x128xf32>
      %789 = arith.andi %783, %788 : vector<8x128xi1>
      %cst_180 = arith.constant 0.000000e+00 : f32
      %790 = vector.broadcast %cst_180 : f32 to vector<8x128xf32>
      %791 = arith.cmpf ogt, %717, %790 : vector<8x128xf32>
      %792 = arith.andi %783, %791 : vector<8x128xi1>
      %cst_181 = arith.constant 9.99999974E-5 : f32
      %793 = vector.broadcast %cst_181 : f32 to vector<8x128xf32>
      %794 = arith.cmpf olt, %786, %793 : vector<8x128xf32>
      %795 = arith.andi %792, %794 : vector<8x128xi1>
      %796 = arith.mulf %778, %717 : vector<8x128xf32>
      %cst_182 = arith.constant 0.000000e+00 : f32
      %797 = vector.broadcast %cst_182 : f32 to vector<8x128xf32>
      %798 = arith.select %789, %796, %797 : vector<8x128xi1>, vector<8x128xf32>
      %799 = vector.broadcast %749 : f32 to vector<8x128xf32>
      %800 = arith.mulf %799, %798 : vector<8x128xf32>
      %801 = arith.addf %704, %800 : vector<8x128xf32>
      %802 = vector.broadcast %752 : f32 to vector<8x128xf32>
      %803 = arith.mulf %802, %798 : vector<8x128xf32>
      %804 = arith.addf %707, %803 : vector<8x128xf32>
      %805 = vector.broadcast %755 : f32 to vector<8x128xf32>
      %806 = arith.mulf %805, %798 : vector<8x128xf32>
      %807 = arith.addf %710, %806 : vector<8x128xf32>
      %808 = vector.broadcast %758 : f32 to vector<8x128xf32>
      %809 = arith.mulf %808, %798 : vector<8x128xf32>
      %810 = arith.addf %713, %809 : vector<8x128xf32>
      %811 = arith.select %789, %786, %717 : vector<8x128xi1>, vector<8x128xf32>
      %cst_183 = arith.constant 0.000000e+00 : f32
      %812 = vector.broadcast %cst_183 : f32 to vector<8x128xf32>
      %813 = arith.subf %812, %811 : vector<8x128xf32>
      %814 = arith.select %795, %813, %811 : vector<8x128xi1>, vector<8x128xf32>
      %815 = arith.extui %789 : vector<8x128xi1> to vector<8x128xi32>
      %816 = arith.sitofp %815 : vector<8x128xi32> to vector<8x128xf32>
      %817 = vector.shape_cast %816 : vector<8x128xf32> to vector<1x8x128xf32>
      %cst_184 = arith.constant dense<0.000000e+00> : vector<1xf32>
      %818 = vector.multi_reduction <add>, %817, %cst_184 [1, 2] : vector<1x8x128xf32> to vector<1xf32>
      %819 = vector.shape_cast %818 : vector<1xf32> to vector<1x1x1xf32>
      %820 = vector.extract %819[0, 0, 0] : f32 from vector<1x1x1xf32>
      %821 = arith.fptosi %820 : f32 to i32
      %822 = arith.index_cast %727 : i32 to index
      %823 = memref.load %arg5[%822] : memref<64xi32, #tpu.memory_space<smem>>
      memref.store %821, %arg5[%822] : memref<64xi32, #tpu.memory_space<smem>>
      %c8_i32_185 = arith.constant 8 : i32
      %824 = arith.addi %47, %c8_i32_185 : i32
      %c10_i32_186 = arith.constant 10 : i32
      %825 = arith.muli %824, %c10_i32_186 : i32
      %c0_i32_187 = arith.constant 0 : i32
      %826 = arith.addi %825, %c0_i32_187 : i32
      %827 = arith.index_cast %826 : i32 to index
      %828 = memref.load %arg1[%827] : memref<640xf32, #tpu.memory_space<smem>>
      %c1_i32_188 = arith.constant 1 : i32
      %829 = arith.addi %825, %c1_i32_188 : i32
      %830 = arith.index_cast %829 : i32 to index
      %831 = memref.load %arg1[%830] : memref<640xf32, #tpu.memory_space<smem>>
      %c2_i32_189 = arith.constant 2 : i32
      %832 = arith.addi %825, %c2_i32_189 : i32
      %833 = arith.index_cast %832 : i32 to index
      %834 = memref.load %arg1[%833] : memref<640xf32, #tpu.memory_space<smem>>
      %c3_i32_190 = arith.constant 3 : i32
      %835 = arith.addi %825, %c3_i32_190 : i32
      %836 = arith.index_cast %835 : i32 to index
      %837 = memref.load %arg1[%836] : memref<640xf32, #tpu.memory_space<smem>>
      %c4_i32_191 = arith.constant 4 : i32
      %838 = arith.addi %825, %c4_i32_191 : i32
      %839 = arith.index_cast %838 : i32 to index
      %840 = memref.load %arg1[%839] : memref<640xf32, #tpu.memory_space<smem>>
      %c5_i32_192 = arith.constant 5 : i32
      %841 = arith.addi %825, %c5_i32_192 : i32
      %842 = arith.index_cast %841 : i32 to index
      %843 = memref.load %arg1[%842] : memref<640xf32, #tpu.memory_space<smem>>
      %c6_i32_193 = arith.constant 6 : i32
      %844 = arith.addi %825, %c6_i32_193 : i32
      %845 = arith.index_cast %844 : i32 to index
      %846 = memref.load %arg1[%845] : memref<640xf32, #tpu.memory_space<smem>>
      %c7_i32_194 = arith.constant 7 : i32
      %847 = arith.addi %825, %c7_i32_194 : i32
      %848 = arith.index_cast %847 : i32 to index
      %849 = memref.load %arg1[%848] : memref<640xf32, #tpu.memory_space<smem>>
      %c8_i32_195 = arith.constant 8 : i32
      %850 = arith.addi %825, %c8_i32_195 : i32
      %851 = arith.index_cast %850 : i32 to index
      %852 = memref.load %arg1[%851] : memref<640xf32, #tpu.memory_space<smem>>
      %c9_i32_196 = arith.constant 9 : i32
      %853 = arith.addi %825, %c9_i32_196 : i32
      %854 = arith.index_cast %853 : i32 to index
      %855 = memref.load %arg1[%854] : memref<640xf32, #tpu.memory_space<smem>>
      %856 = vector.broadcast %828 : f32 to vector<8x128xf32>
      %857 = arith.subf %856, %11 : vector<8x128xf32>
      %858 = vector.broadcast %831 : f32 to vector<8x128xf32>
      %859 = arith.subf %858, %8 : vector<8x128xf32>
      %860 = vector.broadcast %834 : f32 to vector<8x128xf32>
      %861 = arith.mulf %860, %857 : vector<8x128xf32>
      %862 = arith.mulf %861, %857 : vector<8x128xf32>
      %863 = vector.broadcast %840 : f32 to vector<8x128xf32>
      %864 = arith.mulf %863, %859 : vector<8x128xf32>
      %865 = arith.mulf %864, %859 : vector<8x128xf32>
      %866 = arith.addf %862, %865 : vector<8x128xf32>
      %867 = arith.mulf %857, %859 : vector<8x128xf32>
      %868 = vector.broadcast %837 : f32 to vector<8x128xf32>
      %869 = arith.mulf %868, %867 : vector<8x128xf32>
      %870 = arith.addf %866, %869 : vector<8x128xf32>
      %871 = math.exp %870 : vector<8x128xf32>
      %872 = vector.broadcast %843 : f32 to vector<8x128xf32>
      %873 = arith.mulf %872, %871 : vector<8x128xf32>
      %cst_197 = arith.constant 9.900000e-01 : f32
      %874 = vector.broadcast %cst_197 : f32 to vector<8x128xf32>
      %875 = arith.minimumf %874, %873 : vector<8x128xf32>
      %cst_198 = arith.constant 0.000000e+00 : f32
      %876 = vector.broadcast %cst_198 : f32 to vector<8x128xf32>
      %877 = arith.cmpf ole, %870, %876 : vector<8x128xf32>
      %cst_199 = arith.constant 0.00392156886 : f32
      %878 = vector.broadcast %cst_199 : f32 to vector<8x128xf32>
      %879 = arith.cmpf oge, %875, %878 : vector<8x128xf32>
      %880 = arith.andi %877, %879 : vector<8x128xi1>
      %cst_200 = arith.constant 1.000000e+00 : f32
      %881 = vector.broadcast %cst_200 : f32 to vector<8x128xf32>
      %882 = arith.subf %881, %875 : vector<8x128xf32>
      %883 = arith.mulf %814, %882 : vector<8x128xf32>
      %cst_201 = arith.constant 9.99999974E-5 : f32
      %884 = vector.broadcast %cst_201 : f32 to vector<8x128xf32>
      %885 = arith.cmpf oge, %883, %884 : vector<8x128xf32>
      %886 = arith.andi %880, %885 : vector<8x128xi1>
      %cst_202 = arith.constant 0.000000e+00 : f32
      %887 = vector.broadcast %cst_202 : f32 to vector<8x128xf32>
      %888 = arith.cmpf ogt, %814, %887 : vector<8x128xf32>
      %889 = arith.andi %880, %888 : vector<8x128xi1>
      %cst_203 = arith.constant 9.99999974E-5 : f32
      %890 = vector.broadcast %cst_203 : f32 to vector<8x128xf32>
      %891 = arith.cmpf olt, %883, %890 : vector<8x128xf32>
      %892 = arith.andi %889, %891 : vector<8x128xi1>
      %893 = arith.mulf %875, %814 : vector<8x128xf32>
      %cst_204 = arith.constant 0.000000e+00 : f32
      %894 = vector.broadcast %cst_204 : f32 to vector<8x128xf32>
      %895 = arith.select %886, %893, %894 : vector<8x128xi1>, vector<8x128xf32>
      %896 = vector.broadcast %846 : f32 to vector<8x128xf32>
      %897 = arith.mulf %896, %895 : vector<8x128xf32>
      %898 = arith.addf %801, %897 : vector<8x128xf32>
      %899 = vector.broadcast %849 : f32 to vector<8x128xf32>
      %900 = arith.mulf %899, %895 : vector<8x128xf32>
      %901 = arith.addf %804, %900 : vector<8x128xf32>
      %902 = vector.broadcast %852 : f32 to vector<8x128xf32>
      %903 = arith.mulf %902, %895 : vector<8x128xf32>
      %904 = arith.addf %807, %903 : vector<8x128xf32>
      %905 = vector.broadcast %855 : f32 to vector<8x128xf32>
      %906 = arith.mulf %905, %895 : vector<8x128xf32>
      %907 = arith.addf %810, %906 : vector<8x128xf32>
      %908 = arith.select %886, %883, %814 : vector<8x128xi1>, vector<8x128xf32>
      %cst_205 = arith.constant 0.000000e+00 : f32
      %909 = vector.broadcast %cst_205 : f32 to vector<8x128xf32>
      %910 = arith.subf %909, %908 : vector<8x128xf32>
      %911 = arith.select %892, %910, %908 : vector<8x128xi1>, vector<8x128xf32>
      %912 = arith.extui %886 : vector<8x128xi1> to vector<8x128xi32>
      %913 = arith.sitofp %912 : vector<8x128xi32> to vector<8x128xf32>
      %914 = vector.shape_cast %913 : vector<8x128xf32> to vector<1x8x128xf32>
      %cst_206 = arith.constant dense<0.000000e+00> : vector<1xf32>
      %915 = vector.multi_reduction <add>, %914, %cst_206 [1, 2] : vector<1x8x128xf32> to vector<1xf32>
      %916 = vector.shape_cast %915 : vector<1xf32> to vector<1x1x1xf32>
      %917 = vector.extract %916[0, 0, 0] : f32 from vector<1x1x1xf32>
      %918 = arith.fptosi %917 : f32 to i32
      %919 = arith.index_cast %824 : i32 to index
      %920 = memref.load %arg5[%919] : memref<64xi32, #tpu.memory_space<smem>>
      memref.store %918, %arg5[%919] : memref<64xi32, #tpu.memory_space<smem>>
      %c9_i32_207 = arith.constant 9 : i32
      %921 = arith.addi %47, %c9_i32_207 : i32
      %c10_i32_208 = arith.constant 10 : i32
      %922 = arith.muli %921, %c10_i32_208 : i32
      %c0_i32_209 = arith.constant 0 : i32
      %923 = arith.addi %922, %c0_i32_209 : i32
      %924 = arith.index_cast %923 : i32 to index
      %925 = memref.load %arg1[%924] : memref<640xf32, #tpu.memory_space<smem>>
      %c1_i32_210 = arith.constant 1 : i32
      %926 = arith.addi %922, %c1_i32_210 : i32
      %927 = arith.index_cast %926 : i32 to index
      %928 = memref.load %arg1[%927] : memref<640xf32, #tpu.memory_space<smem>>
      %c2_i32_211 = arith.constant 2 : i32
      %929 = arith.addi %922, %c2_i32_211 : i32
      %930 = arith.index_cast %929 : i32 to index
      %931 = memref.load %arg1[%930] : memref<640xf32, #tpu.memory_space<smem>>
      %c3_i32_212 = arith.constant 3 : i32
      %932 = arith.addi %922, %c3_i32_212 : i32
      %933 = arith.index_cast %932 : i32 to index
      %934 = memref.load %arg1[%933] : memref<640xf32, #tpu.memory_space<smem>>
      %c4_i32_213 = arith.constant 4 : i32
      %935 = arith.addi %922, %c4_i32_213 : i32
      %936 = arith.index_cast %935 : i32 to index
      %937 = memref.load %arg1[%936] : memref<640xf32, #tpu.memory_space<smem>>
      %c5_i32_214 = arith.constant 5 : i32
      %938 = arith.addi %922, %c5_i32_214 : i32
      %939 = arith.index_cast %938 : i32 to index
      %940 = memref.load %arg1[%939] : memref<640xf32, #tpu.memory_space<smem>>
      %c6_i32_215 = arith.constant 6 : i32
      %941 = arith.addi %922, %c6_i32_215 : i32
      %942 = arith.index_cast %941 : i32 to index
      %943 = memref.load %arg1[%942] : memref<640xf32, #tpu.memory_space<smem>>
      %c7_i32_216 = arith.constant 7 : i32
      %944 = arith.addi %922, %c7_i32_216 : i32
      %945 = arith.index_cast %944 : i32 to index
      %946 = memref.load %arg1[%945] : memref<640xf32, #tpu.memory_space<smem>>
      %c8_i32_217 = arith.constant 8 : i32
      %947 = arith.addi %922, %c8_i32_217 : i32
      %948 = arith.index_cast %947 : i32 to index
      %949 = memref.load %arg1[%948] : memref<640xf32, #tpu.memory_space<smem>>
      %c9_i32_218 = arith.constant 9 : i32
      %950 = arith.addi %922, %c9_i32_218 : i32
      %951 = arith.index_cast %950 : i32 to index
      %952 = memref.load %arg1[%951] : memref<640xf32, #tpu.memory_space<smem>>
      %953 = vector.broadcast %925 : f32 to vector<8x128xf32>
      %954 = arith.subf %953, %11 : vector<8x128xf32>
      %955 = vector.broadcast %928 : f32 to vector<8x128xf32>
      %956 = arith.subf %955, %8 : vector<8x128xf32>
      %957 = vector.broadcast %931 : f32 to vector<8x128xf32>
      %958 = arith.mulf %957, %954 : vector<8x128xf32>
      %959 = arith.mulf %958, %954 : vector<8x128xf32>
      %960 = vector.broadcast %937 : f32 to vector<8x128xf32>
      %961 = arith.mulf %960, %956 : vector<8x128xf32>
      %962 = arith.mulf %961, %956 : vector<8x128xf32>
      %963 = arith.addf %959, %962 : vector<8x128xf32>
      %964 = arith.mulf %954, %956 : vector<8x128xf32>
      %965 = vector.broadcast %934 : f32 to vector<8x128xf32>
      %966 = arith.mulf %965, %964 : vector<8x128xf32>
      %967 = arith.addf %963, %966 : vector<8x128xf32>
      %968 = math.exp %967 : vector<8x128xf32>
      %969 = vector.broadcast %940 : f32 to vector<8x128xf32>
      %970 = arith.mulf %969, %968 : vector<8x128xf32>
      %cst_219 = arith.constant 9.900000e-01 : f32
      %971 = vector.broadcast %cst_219 : f32 to vector<8x128xf32>
      %972 = arith.minimumf %971, %970 : vector<8x128xf32>
      %cst_220 = arith.constant 0.000000e+00 : f32
      %973 = vector.broadcast %cst_220 : f32 to vector<8x128xf32>
      %974 = arith.cmpf ole, %967, %973 : vector<8x128xf32>
      %cst_221 = arith.constant 0.00392156886 : f32
      %975 = vector.broadcast %cst_221 : f32 to vector<8x128xf32>
      %976 = arith.cmpf oge, %972, %975 : vector<8x128xf32>
      %977 = arith.andi %974, %976 : vector<8x128xi1>
      %cst_222 = arith.constant 1.000000e+00 : f32
      %978 = vector.broadcast %cst_222 : f32 to vector<8x128xf32>
      %979 = arith.subf %978, %972 : vector<8x128xf32>
      %980 = arith.mulf %911, %979 : vector<8x128xf32>
      %cst_223 = arith.constant 9.99999974E-5 : f32
      %981 = vector.broadcast %cst_223 : f32 to vector<8x128xf32>
      %982 = arith.cmpf oge, %980, %981 : vector<8x128xf32>
      %983 = arith.andi %977, %982 : vector<8x128xi1>
      %cst_224 = arith.constant 0.000000e+00 : f32
      %984 = vector.broadcast %cst_224 : f32 to vector<8x128xf32>
      %985 = arith.cmpf ogt, %911, %984 : vector<8x128xf32>
      %986 = arith.andi %977, %985 : vector<8x128xi1>
      %cst_225 = arith.constant 9.99999974E-5 : f32
      %987 = vector.broadcast %cst_225 : f32 to vector<8x128xf32>
      %988 = arith.cmpf olt, %980, %987 : vector<8x128xf32>
      %989 = arith.andi %986, %988 : vector<8x128xi1>
      %990 = arith.mulf %972, %911 : vector<8x128xf32>
      %cst_226 = arith.constant 0.000000e+00 : f32
      %991 = vector.broadcast %cst_226 : f32 to vector<8x128xf32>
      %992 = arith.select %983, %990, %991 : vector<8x128xi1>, vector<8x128xf32>
      %993 = vector.broadcast %943 : f32 to vector<8x128xf32>
      %994 = arith.mulf %993, %992 : vector<8x128xf32>
      %995 = arith.addf %898, %994 : vector<8x128xf32>
      %996 = vector.broadcast %946 : f32 to vector<8x128xf32>
      %997 = arith.mulf %996, %992 : vector<8x128xf32>
      %998 = arith.addf %901, %997 : vector<8x128xf32>
      %999 = vector.broadcast %949 : f32 to vector<8x128xf32>
      %1000 = arith.mulf %999, %992 : vector<8x128xf32>
      %1001 = arith.addf %904, %1000 : vector<8x128xf32>
      %1002 = vector.broadcast %952 : f32 to vector<8x128xf32>
      %1003 = arith.mulf %1002, %992 : vector<8x128xf32>
      %1004 = arith.addf %907, %1003 : vector<8x128xf32>
      %1005 = arith.select %983, %980, %911 : vector<8x128xi1>, vector<8x128xf32>
      %cst_227 = arith.constant 0.000000e+00 : f32
      %1006 = vector.broadcast %cst_227 : f32 to vector<8x128xf32>
      %1007 = arith.subf %1006, %1005 : vector<8x128xf32>
      %1008 = arith.select %989, %1007, %1005 : vector<8x128xi1>, vector<8x128xf32>
      %1009 = arith.extui %983 : vector<8x128xi1> to vector<8x128xi32>
      %1010 = arith.sitofp %1009 : vector<8x128xi32> to vector<8x128xf32>
      %1011 = vector.shape_cast %1010 : vector<8x128xf32> to vector<1x8x128xf32>
      %cst_228 = arith.constant dense<0.000000e+00> : vector<1xf32>
      %1012 = vector.multi_reduction <add>, %1011, %cst_228 [1, 2] : vector<1x8x128xf32> to vector<1xf32>
      %1013 = vector.shape_cast %1012 : vector<1xf32> to vector<1x1x1xf32>
      %1014 = vector.extract %1013[0, 0, 0] : f32 from vector<1x1x1xf32>
      %1015 = arith.fptosi %1014 : f32 to i32
      %1016 = arith.index_cast %921 : i32 to index
      %1017 = memref.load %arg5[%1016] : memref<64xi32, #tpu.memory_space<smem>>
      memref.store %1015, %arg5[%1016] : memref<64xi32, #tpu.memory_space<smem>>
      %c10_i32_229 = arith.constant 10 : i32
      %1018 = arith.addi %47, %c10_i32_229 : i32
      %c10_i32_230 = arith.constant 10 : i32
      %1019 = arith.muli %1018, %c10_i32_230 : i32
      %c0_i32_231 = arith.constant 0 : i32
      %1020 = arith.addi %1019, %c0_i32_231 : i32
      %1021 = arith.index_cast %1020 : i32 to index
      %1022 = memref.load %arg1[%1021] : memref<640xf32, #tpu.memory_space<smem>>
      %c1_i32_232 = arith.constant 1 : i32
      %1023 = arith.addi %1019, %c1_i32_232 : i32
      %1024 = arith.index_cast %1023 : i32 to index
      %1025 = memref.load %arg1[%1024] : memref<640xf32, #tpu.memory_space<smem>>
      %c2_i32_233 = arith.constant 2 : i32
      %1026 = arith.addi %1019, %c2_i32_233 : i32
      %1027 = arith.index_cast %1026 : i32 to index
      %1028 = memref.load %arg1[%1027] : memref<640xf32, #tpu.memory_space<smem>>
      %c3_i32_234 = arith.constant 3 : i32
      %1029 = arith.addi %1019, %c3_i32_234 : i32
      %1030 = arith.index_cast %1029 : i32 to index
      %1031 = memref.load %arg1[%1030] : memref<640xf32, #tpu.memory_space<smem>>
      %c4_i32_235 = arith.constant 4 : i32
      %1032 = arith.addi %1019, %c4_i32_235 : i32
      %1033 = arith.index_cast %1032 : i32 to index
      %1034 = memref.load %arg1[%1033] : memref<640xf32, #tpu.memory_space<smem>>
      %c5_i32_236 = arith.constant 5 : i32
      %1035 = arith.addi %1019, %c5_i32_236 : i32
      %1036 = arith.index_cast %1035 : i32 to index
      %1037 = memref.load %arg1[%1036] : memref<640xf32, #tpu.memory_space<smem>>
      %c6_i32_237 = arith.constant 6 : i32
      %1038 = arith.addi %1019, %c6_i32_237 : i32
      %1039 = arith.index_cast %1038 : i32 to index
      %1040 = memref.load %arg1[%1039] : memref<640xf32, #tpu.memory_space<smem>>
      %c7_i32_238 = arith.constant 7 : i32
      %1041 = arith.addi %1019, %c7_i32_238 : i32
      %1042 = arith.index_cast %1041 : i32 to index
      %1043 = memref.load %arg1[%1042] : memref<640xf32, #tpu.memory_space<smem>>
      %c8_i32_239 = arith.constant 8 : i32
      %1044 = arith.addi %1019, %c8_i32_239 : i32
      %1045 = arith.index_cast %1044 : i32 to index
      %1046 = memref.load %arg1[%1045] : memref<640xf32, #tpu.memory_space<smem>>
      %c9_i32_240 = arith.constant 9 : i32
      %1047 = arith.addi %1019, %c9_i32_240 : i32
      %1048 = arith.index_cast %1047 : i32 to index
      %1049 = memref.load %arg1[%1048] : memref<640xf32, #tpu.memory_space<smem>>
      %1050 = vector.broadcast %1022 : f32 to vector<8x128xf32>
      %1051 = arith.subf %1050, %11 : vector<8x128xf32>
      %1052 = vector.broadcast %1025 : f32 to vector<8x128xf32>
      %1053 = arith.subf %1052, %8 : vector<8x128xf32>
      %1054 = vector.broadcast %1028 : f32 to vector<8x128xf32>
      %1055 = arith.mulf %1054, %1051 : vector<8x128xf32>
      %1056 = arith.mulf %1055, %1051 : vector<8x128xf32>
      %1057 = vector.broadcast %1034 : f32 to vector<8x128xf32>
      %1058 = arith.mulf %1057, %1053 : vector<8x128xf32>
      %1059 = arith.mulf %1058, %1053 : vector<8x128xf32>
      %1060 = arith.addf %1056, %1059 : vector<8x128xf32>
      %1061 = arith.mulf %1051, %1053 : vector<8x128xf32>
      %1062 = vector.broadcast %1031 : f32 to vector<8x128xf32>
      %1063 = arith.mulf %1062, %1061 : vector<8x128xf32>
      %1064 = arith.addf %1060, %1063 : vector<8x128xf32>
      %1065 = math.exp %1064 : vector<8x128xf32>
      %1066 = vector.broadcast %1037 : f32 to vector<8x128xf32>
      %1067 = arith.mulf %1066, %1065 : vector<8x128xf32>
      %cst_241 = arith.constant 9.900000e-01 : f32
      %1068 = vector.broadcast %cst_241 : f32 to vector<8x128xf32>
      %1069 = arith.minimumf %1068, %1067 : vector<8x128xf32>
      %cst_242 = arith.constant 0.000000e+00 : f32
      %1070 = vector.broadcast %cst_242 : f32 to vector<8x128xf32>
      %1071 = arith.cmpf ole, %1064, %1070 : vector<8x128xf32>
      %cst_243 = arith.constant 0.00392156886 : f32
      %1072 = vector.broadcast %cst_243 : f32 to vector<8x128xf32>
      %1073 = arith.cmpf oge, %1069, %1072 : vector<8x128xf32>
      %1074 = arith.andi %1071, %1073 : vector<8x128xi1>
      %cst_244 = arith.constant 1.000000e+00 : f32
      %1075 = vector.broadcast %cst_244 : f32 to vector<8x128xf32>
      %1076 = arith.subf %1075, %1069 : vector<8x128xf32>
      %1077 = arith.mulf %1008, %1076 : vector<8x128xf32>
      %cst_245 = arith.constant 9.99999974E-5 : f32
      %1078 = vector.broadcast %cst_245 : f32 to vector<8x128xf32>
      %1079 = arith.cmpf oge, %1077, %1078 : vector<8x128xf32>
      %1080 = arith.andi %1074, %1079 : vector<8x128xi1>
      %cst_246 = arith.constant 0.000000e+00 : f32
      %1081 = vector.broadcast %cst_246 : f32 to vector<8x128xf32>
      %1082 = arith.cmpf ogt, %1008, %1081 : vector<8x128xf32>
      %1083 = arith.andi %1074, %1082 : vector<8x128xi1>
      %cst_247 = arith.constant 9.99999974E-5 : f32
      %1084 = vector.broadcast %cst_247 : f32 to vector<8x128xf32>
      %1085 = arith.cmpf olt, %1077, %1084 : vector<8x128xf32>
      %1086 = arith.andi %1083, %1085 : vector<8x128xi1>
      %1087 = arith.mulf %1069, %1008 : vector<8x128xf32>
      %cst_248 = arith.constant 0.000000e+00 : f32
      %1088 = vector.broadcast %cst_248 : f32 to vector<8x128xf32>
      %1089 = arith.select %1080, %1087, %1088 : vector<8x128xi1>, vector<8x128xf32>
      %1090 = vector.broadcast %1040 : f32 to vector<8x128xf32>
      %1091 = arith.mulf %1090, %1089 : vector<8x128xf32>
      %1092 = arith.addf %995, %1091 : vector<8x128xf32>
      %1093 = vector.broadcast %1043 : f32 to vector<8x128xf32>
      %1094 = arith.mulf %1093, %1089 : vector<8x128xf32>
      %1095 = arith.addf %998, %1094 : vector<8x128xf32>
      %1096 = vector.broadcast %1046 : f32 to vector<8x128xf32>
      %1097 = arith.mulf %1096, %1089 : vector<8x128xf32>
      %1098 = arith.addf %1001, %1097 : vector<8x128xf32>
      %1099 = vector.broadcast %1049 : f32 to vector<8x128xf32>
      %1100 = arith.mulf %1099, %1089 : vector<8x128xf32>
      %1101 = arith.addf %1004, %1100 : vector<8x128xf32>
      %1102 = arith.select %1080, %1077, %1008 : vector<8x128xi1>, vector<8x128xf32>
      %cst_249 = arith.constant 0.000000e+00 : f32
      %1103 = vector.broadcast %cst_249 : f32 to vector<8x128xf32>
      %1104 = arith.subf %1103, %1102 : vector<8x128xf32>
      %1105 = arith.select %1086, %1104, %1102 : vector<8x128xi1>, vector<8x128xf32>
      %1106 = arith.extui %1080 : vector<8x128xi1> to vector<8x128xi32>
      %1107 = arith.sitofp %1106 : vector<8x128xi32> to vector<8x128xf32>
      %1108 = vector.shape_cast %1107 : vector<8x128xf32> to vector<1x8x128xf32>
      %cst_250 = arith.constant dense<0.000000e+00> : vector<1xf32>
      %1109 = vector.multi_reduction <add>, %1108, %cst_250 [1, 2] : vector<1x8x128xf32> to vector<1xf32>
      %1110 = vector.shape_cast %1109 : vector<1xf32> to vector<1x1x1xf32>
      %1111 = vector.extract %1110[0, 0, 0] : f32 from vector<1x1x1xf32>
      %1112 = arith.fptosi %1111 : f32 to i32
      %1113 = arith.index_cast %1018 : i32 to index
      %1114 = memref.load %arg5[%1113] : memref<64xi32, #tpu.memory_space<smem>>
      memref.store %1112, %arg5[%1113] : memref<64xi32, #tpu.memory_space<smem>>
      %c11_i32 = arith.constant 11 : i32
      %1115 = arith.addi %47, %c11_i32 : i32
      %c10_i32_251 = arith.constant 10 : i32
      %1116 = arith.muli %1115, %c10_i32_251 : i32
      %c0_i32_252 = arith.constant 0 : i32
      %1117 = arith.addi %1116, %c0_i32_252 : i32
      %1118 = arith.index_cast %1117 : i32 to index
      %1119 = memref.load %arg1[%1118] : memref<640xf32, #tpu.memory_space<smem>>
      %c1_i32_253 = arith.constant 1 : i32
      %1120 = arith.addi %1116, %c1_i32_253 : i32
      %1121 = arith.index_cast %1120 : i32 to index
      %1122 = memref.load %arg1[%1121] : memref<640xf32, #tpu.memory_space<smem>>
      %c2_i32_254 = arith.constant 2 : i32
      %1123 = arith.addi %1116, %c2_i32_254 : i32
      %1124 = arith.index_cast %1123 : i32 to index
      %1125 = memref.load %arg1[%1124] : memref<640xf32, #tpu.memory_space<smem>>
      %c3_i32_255 = arith.constant 3 : i32
      %1126 = arith.addi %1116, %c3_i32_255 : i32
      %1127 = arith.index_cast %1126 : i32 to index
      %1128 = memref.load %arg1[%1127] : memref<640xf32, #tpu.memory_space<smem>>
      %c4_i32_256 = arith.constant 4 : i32
      %1129 = arith.addi %1116, %c4_i32_256 : i32
      %1130 = arith.index_cast %1129 : i32 to index
      %1131 = memref.load %arg1[%1130] : memref<640xf32, #tpu.memory_space<smem>>
      %c5_i32_257 = arith.constant 5 : i32
      %1132 = arith.addi %1116, %c5_i32_257 : i32
      %1133 = arith.index_cast %1132 : i32 to index
      %1134 = memref.load %arg1[%1133] : memref<640xf32, #tpu.memory_space<smem>>
      %c6_i32_258 = arith.constant 6 : i32
      %1135 = arith.addi %1116, %c6_i32_258 : i32
      %1136 = arith.index_cast %1135 : i32 to index
      %1137 = memref.load %arg1[%1136] : memref<640xf32, #tpu.memory_space<smem>>
      %c7_i32_259 = arith.constant 7 : i32
      %1138 = arith.addi %1116, %c7_i32_259 : i32
      %1139 = arith.index_cast %1138 : i32 to index
      %1140 = memref.load %arg1[%1139] : memref<640xf32, #tpu.memory_space<smem>>
      %c8_i32_260 = arith.constant 8 : i32
      %1141 = arith.addi %1116, %c8_i32_260 : i32
      %1142 = arith.index_cast %1141 : i32 to index
      %1143 = memref.load %arg1[%1142] : memref<640xf32, #tpu.memory_space<smem>>
      %c9_i32_261 = arith.constant 9 : i32
      %1144 = arith.addi %1116, %c9_i32_261 : i32
      %1145 = arith.index_cast %1144 : i32 to index
      %1146 = memref.load %arg1[%1145] : memref<640xf32, #tpu.memory_space<smem>>
      %1147 = vector.broadcast %1119 : f32 to vector<8x128xf32>
      %1148 = arith.subf %1147, %11 : vector<8x128xf32>
      %1149 = vector.broadcast %1122 : f32 to vector<8x128xf32>
      %1150 = arith.subf %1149, %8 : vector<8x128xf32>
      %1151 = vector.broadcast %1125 : f32 to vector<8x128xf32>
      %1152 = arith.mulf %1151, %1148 : vector<8x128xf32>
      %1153 = arith.mulf %1152, %1148 : vector<8x128xf32>
      %1154 = vector.broadcast %1131 : f32 to vector<8x128xf32>
      %1155 = arith.mulf %1154, %1150 : vector<8x128xf32>
      %1156 = arith.mulf %1155, %1150 : vector<8x128xf32>
      %1157 = arith.addf %1153, %1156 : vector<8x128xf32>
      %1158 = arith.mulf %1148, %1150 : vector<8x128xf32>
      %1159 = vector.broadcast %1128 : f32 to vector<8x128xf32>
      %1160 = arith.mulf %1159, %1158 : vector<8x128xf32>
      %1161 = arith.addf %1157, %1160 : vector<8x128xf32>
      %1162 = math.exp %1161 : vector<8x128xf32>
      %1163 = vector.broadcast %1134 : f32 to vector<8x128xf32>
      %1164 = arith.mulf %1163, %1162 : vector<8x128xf32>
      %cst_262 = arith.constant 9.900000e-01 : f32
      %1165 = vector.broadcast %cst_262 : f32 to vector<8x128xf32>
      %1166 = arith.minimumf %1165, %1164 : vector<8x128xf32>
      %cst_263 = arith.constant 0.000000e+00 : f32
      %1167 = vector.broadcast %cst_263 : f32 to vector<8x128xf32>
      %1168 = arith.cmpf ole, %1161, %1167 : vector<8x128xf32>
      %cst_264 = arith.constant 0.00392156886 : f32
      %1169 = vector.broadcast %cst_264 : f32 to vector<8x128xf32>
      %1170 = arith.cmpf oge, %1166, %1169 : vector<8x128xf32>
      %1171 = arith.andi %1168, %1170 : vector<8x128xi1>
      %cst_265 = arith.constant 1.000000e+00 : f32
      %1172 = vector.broadcast %cst_265 : f32 to vector<8x128xf32>
      %1173 = arith.subf %1172, %1166 : vector<8x128xf32>
      %1174 = arith.mulf %1105, %1173 : vector<8x128xf32>
      %cst_266 = arith.constant 9.99999974E-5 : f32
      %1175 = vector.broadcast %cst_266 : f32 to vector<8x128xf32>
      %1176 = arith.cmpf oge, %1174, %1175 : vector<8x128xf32>
      %1177 = arith.andi %1171, %1176 : vector<8x128xi1>
      %cst_267 = arith.constant 0.000000e+00 : f32
      %1178 = vector.broadcast %cst_267 : f32 to vector<8x128xf32>
      %1179 = arith.cmpf ogt, %1105, %1178 : vector<8x128xf32>
      %1180 = arith.andi %1171, %1179 : vector<8x128xi1>
      %cst_268 = arith.constant 9.99999974E-5 : f32
      %1181 = vector.broadcast %cst_268 : f32 to vector<8x128xf32>
      %1182 = arith.cmpf olt, %1174, %1181 : vector<8x128xf32>
      %1183 = arith.andi %1180, %1182 : vector<8x128xi1>
      %1184 = arith.mulf %1166, %1105 : vector<8x128xf32>
      %cst_269 = arith.constant 0.000000e+00 : f32
      %1185 = vector.broadcast %cst_269 : f32 to vector<8x128xf32>
      %1186 = arith.select %1177, %1184, %1185 : vector<8x128xi1>, vector<8x128xf32>
      %1187 = vector.broadcast %1137 : f32 to vector<8x128xf32>
      %1188 = arith.mulf %1187, %1186 : vector<8x128xf32>
      %1189 = arith.addf %1092, %1188 : vector<8x128xf32>
      %1190 = vector.broadcast %1140 : f32 to vector<8x128xf32>
      %1191 = arith.mulf %1190, %1186 : vector<8x128xf32>
      %1192 = arith.addf %1095, %1191 : vector<8x128xf32>
      %1193 = vector.broadcast %1143 : f32 to vector<8x128xf32>
      %1194 = arith.mulf %1193, %1186 : vector<8x128xf32>
      %1195 = arith.addf %1098, %1194 : vector<8x128xf32>
      %1196 = vector.broadcast %1146 : f32 to vector<8x128xf32>
      %1197 = arith.mulf %1196, %1186 : vector<8x128xf32>
      %1198 = arith.addf %1101, %1197 : vector<8x128xf32>
      %1199 = arith.select %1177, %1174, %1105 : vector<8x128xi1>, vector<8x128xf32>
      %cst_270 = arith.constant 0.000000e+00 : f32
      %1200 = vector.broadcast %cst_270 : f32 to vector<8x128xf32>
      %1201 = arith.subf %1200, %1199 : vector<8x128xf32>
      %1202 = arith.select %1183, %1201, %1199 : vector<8x128xi1>, vector<8x128xf32>
      %1203 = arith.extui %1177 : vector<8x128xi1> to vector<8x128xi32>
      %1204 = arith.sitofp %1203 : vector<8x128xi32> to vector<8x128xf32>
      %1205 = vector.shape_cast %1204 : vector<8x128xf32> to vector<1x8x128xf32>
      %cst_271 = arith.constant dense<0.000000e+00> : vector<1xf32>
      %1206 = vector.multi_reduction <add>, %1205, %cst_271 [1, 2] : vector<1x8x128xf32> to vector<1xf32>
      %1207 = vector.shape_cast %1206 : vector<1xf32> to vector<1x1x1xf32>
      %1208 = vector.extract %1207[0, 0, 0] : f32 from vector<1x1x1xf32>
      %1209 = arith.fptosi %1208 : f32 to i32
      %1210 = arith.index_cast %1115 : i32 to index
      %1211 = memref.load %arg5[%1210] : memref<64xi32, #tpu.memory_space<smem>>
      memref.store %1209, %arg5[%1210] : memref<64xi32, #tpu.memory_space<smem>>
      %c12_i32 = arith.constant 12 : i32
      %1212 = arith.addi %47, %c12_i32 : i32
      %c10_i32_272 = arith.constant 10 : i32
      %1213 = arith.muli %1212, %c10_i32_272 : i32
      %c0_i32_273 = arith.constant 0 : i32
      %1214 = arith.addi %1213, %c0_i32_273 : i32
      %1215 = arith.index_cast %1214 : i32 to index
      %1216 = memref.load %arg1[%1215] : memref<640xf32, #tpu.memory_space<smem>>
      %c1_i32_274 = arith.constant 1 : i32
      %1217 = arith.addi %1213, %c1_i32_274 : i32
      %1218 = arith.index_cast %1217 : i32 to index
      %1219 = memref.load %arg1[%1218] : memref<640xf32, #tpu.memory_space<smem>>
      %c2_i32_275 = arith.constant 2 : i32
      %1220 = arith.addi %1213, %c2_i32_275 : i32
      %1221 = arith.index_cast %1220 : i32 to index
      %1222 = memref.load %arg1[%1221] : memref<640xf32, #tpu.memory_space<smem>>
      %c3_i32_276 = arith.constant 3 : i32
      %1223 = arith.addi %1213, %c3_i32_276 : i32
      %1224 = arith.index_cast %1223 : i32 to index
      %1225 = memref.load %arg1[%1224] : memref<640xf32, #tpu.memory_space<smem>>
      %c4_i32_277 = arith.constant 4 : i32
      %1226 = arith.addi %1213, %c4_i32_277 : i32
      %1227 = arith.index_cast %1226 : i32 to index
      %1228 = memref.load %arg1[%1227] : memref<640xf32, #tpu.memory_space<smem>>
      %c5_i32_278 = arith.constant 5 : i32
      %1229 = arith.addi %1213, %c5_i32_278 : i32
      %1230 = arith.index_cast %1229 : i32 to index
      %1231 = memref.load %arg1[%1230] : memref<640xf32, #tpu.memory_space<smem>>
      %c6_i32_279 = arith.constant 6 : i32
      %1232 = arith.addi %1213, %c6_i32_279 : i32
      %1233 = arith.index_cast %1232 : i32 to index
      %1234 = memref.load %arg1[%1233] : memref<640xf32, #tpu.memory_space<smem>>
      %c7_i32_280 = arith.constant 7 : i32
      %1235 = arith.addi %1213, %c7_i32_280 : i32
      %1236 = arith.index_cast %1235 : i32 to index
      %1237 = memref.load %arg1[%1236] : memref<640xf32, #tpu.memory_space<smem>>
      %c8_i32_281 = arith.constant 8 : i32
      %1238 = arith.addi %1213, %c8_i32_281 : i32
      %1239 = arith.index_cast %1238 : i32 to index
      %1240 = memref.load %arg1[%1239] : memref<640xf32, #tpu.memory_space<smem>>
      %c9_i32_282 = arith.constant 9 : i32
      %1241 = arith.addi %1213, %c9_i32_282 : i32
      %1242 = arith.index_cast %1241 : i32 to index
      %1243 = memref.load %arg1[%1242] : memref<640xf32, #tpu.memory_space<smem>>
      %1244 = vector.broadcast %1216 : f32 to vector<8x128xf32>
      %1245 = arith.subf %1244, %11 : vector<8x128xf32>
      %1246 = vector.broadcast %1219 : f32 to vector<8x128xf32>
      %1247 = arith.subf %1246, %8 : vector<8x128xf32>
      %1248 = vector.broadcast %1222 : f32 to vector<8x128xf32>
      %1249 = arith.mulf %1248, %1245 : vector<8x128xf32>
      %1250 = arith.mulf %1249, %1245 : vector<8x128xf32>
      %1251 = vector.broadcast %1228 : f32 to vector<8x128xf32>
      %1252 = arith.mulf %1251, %1247 : vector<8x128xf32>
      %1253 = arith.mulf %1252, %1247 : vector<8x128xf32>
      %1254 = arith.addf %1250, %1253 : vector<8x128xf32>
      %1255 = arith.mulf %1245, %1247 : vector<8x128xf32>
      %1256 = vector.broadcast %1225 : f32 to vector<8x128xf32>
      %1257 = arith.mulf %1256, %1255 : vector<8x128xf32>
      %1258 = arith.addf %1254, %1257 : vector<8x128xf32>
      %1259 = math.exp %1258 : vector<8x128xf32>
      %1260 = vector.broadcast %1231 : f32 to vector<8x128xf32>
      %1261 = arith.mulf %1260, %1259 : vector<8x128xf32>
      %cst_283 = arith.constant 9.900000e-01 : f32
      %1262 = vector.broadcast %cst_283 : f32 to vector<8x128xf32>
      %1263 = arith.minimumf %1262, %1261 : vector<8x128xf32>
      %cst_284 = arith.constant 0.000000e+00 : f32
      %1264 = vector.broadcast %cst_284 : f32 to vector<8x128xf32>
      %1265 = arith.cmpf ole, %1258, %1264 : vector<8x128xf32>
      %cst_285 = arith.constant 0.00392156886 : f32
      %1266 = vector.broadcast %cst_285 : f32 to vector<8x128xf32>
      %1267 = arith.cmpf oge, %1263, %1266 : vector<8x128xf32>
      %1268 = arith.andi %1265, %1267 : vector<8x128xi1>
      %cst_286 = arith.constant 1.000000e+00 : f32
      %1269 = vector.broadcast %cst_286 : f32 to vector<8x128xf32>
      %1270 = arith.subf %1269, %1263 : vector<8x128xf32>
      %1271 = arith.mulf %1202, %1270 : vector<8x128xf32>
      %cst_287 = arith.constant 9.99999974E-5 : f32
      %1272 = vector.broadcast %cst_287 : f32 to vector<8x128xf32>
      %1273 = arith.cmpf oge, %1271, %1272 : vector<8x128xf32>
      %1274 = arith.andi %1268, %1273 : vector<8x128xi1>
      %cst_288 = arith.constant 0.000000e+00 : f32
      %1275 = vector.broadcast %cst_288 : f32 to vector<8x128xf32>
      %1276 = arith.cmpf ogt, %1202, %1275 : vector<8x128xf32>
      %1277 = arith.andi %1268, %1276 : vector<8x128xi1>
      %cst_289 = arith.constant 9.99999974E-5 : f32
      %1278 = vector.broadcast %cst_289 : f32 to vector<8x128xf32>
      %1279 = arith.cmpf olt, %1271, %1278 : vector<8x128xf32>
      %1280 = arith.andi %1277, %1279 : vector<8x128xi1>
      %1281 = arith.mulf %1263, %1202 : vector<8x128xf32>
      %cst_290 = arith.constant 0.000000e+00 : f32
      %1282 = vector.broadcast %cst_290 : f32 to vector<8x128xf32>
      %1283 = arith.select %1274, %1281, %1282 : vector<8x128xi1>, vector<8x128xf32>
      %1284 = vector.broadcast %1234 : f32 to vector<8x128xf32>
      %1285 = arith.mulf %1284, %1283 : vector<8x128xf32>
      %1286 = arith.addf %1189, %1285 : vector<8x128xf32>
      %1287 = vector.broadcast %1237 : f32 to vector<8x128xf32>
      %1288 = arith.mulf %1287, %1283 : vector<8x128xf32>
      %1289 = arith.addf %1192, %1288 : vector<8x128xf32>
      %1290 = vector.broadcast %1240 : f32 to vector<8x128xf32>
      %1291 = arith.mulf %1290, %1283 : vector<8x128xf32>
      %1292 = arith.addf %1195, %1291 : vector<8x128xf32>
      %1293 = vector.broadcast %1243 : f32 to vector<8x128xf32>
      %1294 = arith.mulf %1293, %1283 : vector<8x128xf32>
      %1295 = arith.addf %1198, %1294 : vector<8x128xf32>
      %1296 = arith.select %1274, %1271, %1202 : vector<8x128xi1>, vector<8x128xf32>
      %cst_291 = arith.constant 0.000000e+00 : f32
      %1297 = vector.broadcast %cst_291 : f32 to vector<8x128xf32>
      %1298 = arith.subf %1297, %1296 : vector<8x128xf32>
      %1299 = arith.select %1280, %1298, %1296 : vector<8x128xi1>, vector<8x128xf32>
      %1300 = arith.extui %1274 : vector<8x128xi1> to vector<8x128xi32>
      %1301 = arith.sitofp %1300 : vector<8x128xi32> to vector<8x128xf32>
      %1302 = vector.shape_cast %1301 : vector<8x128xf32> to vector<1x8x128xf32>
      %cst_292 = arith.constant dense<0.000000e+00> : vector<1xf32>
      %1303 = vector.multi_reduction <add>, %1302, %cst_292 [1, 2] : vector<1x8x128xf32> to vector<1xf32>
      %1304 = vector.shape_cast %1303 : vector<1xf32> to vector<1x1x1xf32>
      %1305 = vector.extract %1304[0, 0, 0] : f32 from vector<1x1x1xf32>
      %1306 = arith.fptosi %1305 : f32 to i32
      %1307 = arith.index_cast %1212 : i32 to index
      %1308 = memref.load %arg5[%1307] : memref<64xi32, #tpu.memory_space<smem>>
      memref.store %1306, %arg5[%1307] : memref<64xi32, #tpu.memory_space<smem>>
      %c13_i32 = arith.constant 13 : i32
      %1309 = arith.addi %47, %c13_i32 : i32
      %c10_i32_293 = arith.constant 10 : i32
      %1310 = arith.muli %1309, %c10_i32_293 : i32
      %c0_i32_294 = arith.constant 0 : i32
      %1311 = arith.addi %1310, %c0_i32_294 : i32
      %1312 = arith.index_cast %1311 : i32 to index
      %1313 = memref.load %arg1[%1312] : memref<640xf32, #tpu.memory_space<smem>>
      %c1_i32_295 = arith.constant 1 : i32
      %1314 = arith.addi %1310, %c1_i32_295 : i32
      %1315 = arith.index_cast %1314 : i32 to index
      %1316 = memref.load %arg1[%1315] : memref<640xf32, #tpu.memory_space<smem>>
      %c2_i32_296 = arith.constant 2 : i32
      %1317 = arith.addi %1310, %c2_i32_296 : i32
      %1318 = arith.index_cast %1317 : i32 to index
      %1319 = memref.load %arg1[%1318] : memref<640xf32, #tpu.memory_space<smem>>
      %c3_i32_297 = arith.constant 3 : i32
      %1320 = arith.addi %1310, %c3_i32_297 : i32
      %1321 = arith.index_cast %1320 : i32 to index
      %1322 = memref.load %arg1[%1321] : memref<640xf32, #tpu.memory_space<smem>>
      %c4_i32_298 = arith.constant 4 : i32
      %1323 = arith.addi %1310, %c4_i32_298 : i32
      %1324 = arith.index_cast %1323 : i32 to index
      %1325 = memref.load %arg1[%1324] : memref<640xf32, #tpu.memory_space<smem>>
      %c5_i32_299 = arith.constant 5 : i32
      %1326 = arith.addi %1310, %c5_i32_299 : i32
      %1327 = arith.index_cast %1326 : i32 to index
      %1328 = memref.load %arg1[%1327] : memref<640xf32, #tpu.memory_space<smem>>
      %c6_i32_300 = arith.constant 6 : i32
      %1329 = arith.addi %1310, %c6_i32_300 : i32
      %1330 = arith.index_cast %1329 : i32 to index
      %1331 = memref.load %arg1[%1330] : memref<640xf32, #tpu.memory_space<smem>>
      %c7_i32_301 = arith.constant 7 : i32
      %1332 = arith.addi %1310, %c7_i32_301 : i32
      %1333 = arith.index_cast %1332 : i32 to index
      %1334 = memref.load %arg1[%1333] : memref<640xf32, #tpu.memory_space<smem>>
      %c8_i32_302 = arith.constant 8 : i32
      %1335 = arith.addi %1310, %c8_i32_302 : i32
      %1336 = arith.index_cast %1335 : i32 to index
      %1337 = memref.load %arg1[%1336] : memref<640xf32, #tpu.memory_space<smem>>
      %c9_i32_303 = arith.constant 9 : i32
      %1338 = arith.addi %1310, %c9_i32_303 : i32
      %1339 = arith.index_cast %1338 : i32 to index
      %1340 = memref.load %arg1[%1339] : memref<640xf32, #tpu.memory_space<smem>>
      %1341 = vector.broadcast %1313 : f32 to vector<8x128xf32>
      %1342 = arith.subf %1341, %11 : vector<8x128xf32>
      %1343 = vector.broadcast %1316 : f32 to vector<8x128xf32>
      %1344 = arith.subf %1343, %8 : vector<8x128xf32>
      %1345 = vector.broadcast %1319 : f32 to vector<8x128xf32>
      %1346 = arith.mulf %1345, %1342 : vector<8x128xf32>
      %1347 = arith.mulf %1346, %1342 : vector<8x128xf32>
      %1348 = vector.broadcast %1325 : f32 to vector<8x128xf32>
      %1349 = arith.mulf %1348, %1344 : vector<8x128xf32>
      %1350 = arith.mulf %1349, %1344 : vector<8x128xf32>
      %1351 = arith.addf %1347, %1350 : vector<8x128xf32>
      %1352 = arith.mulf %1342, %1344 : vector<8x128xf32>
      %1353 = vector.broadcast %1322 : f32 to vector<8x128xf32>
      %1354 = arith.mulf %1353, %1352 : vector<8x128xf32>
      %1355 = arith.addf %1351, %1354 : vector<8x128xf32>
      %1356 = math.exp %1355 : vector<8x128xf32>
      %1357 = vector.broadcast %1328 : f32 to vector<8x128xf32>
      %1358 = arith.mulf %1357, %1356 : vector<8x128xf32>
      %cst_304 = arith.constant 9.900000e-01 : f32
      %1359 = vector.broadcast %cst_304 : f32 to vector<8x128xf32>
      %1360 = arith.minimumf %1359, %1358 : vector<8x128xf32>
      %cst_305 = arith.constant 0.000000e+00 : f32
      %1361 = vector.broadcast %cst_305 : f32 to vector<8x128xf32>
      %1362 = arith.cmpf ole, %1355, %1361 : vector<8x128xf32>
      %cst_306 = arith.constant 0.00392156886 : f32
      %1363 = vector.broadcast %cst_306 : f32 to vector<8x128xf32>
      %1364 = arith.cmpf oge, %1360, %1363 : vector<8x128xf32>
      %1365 = arith.andi %1362, %1364 : vector<8x128xi1>
      %cst_307 = arith.constant 1.000000e+00 : f32
      %1366 = vector.broadcast %cst_307 : f32 to vector<8x128xf32>
      %1367 = arith.subf %1366, %1360 : vector<8x128xf32>
      %1368 = arith.mulf %1299, %1367 : vector<8x128xf32>
      %cst_308 = arith.constant 9.99999974E-5 : f32
      %1369 = vector.broadcast %cst_308 : f32 to vector<8x128xf32>
      %1370 = arith.cmpf oge, %1368, %1369 : vector<8x128xf32>
      %1371 = arith.andi %1365, %1370 : vector<8x128xi1>
      %cst_309 = arith.constant 0.000000e+00 : f32
      %1372 = vector.broadcast %cst_309 : f32 to vector<8x128xf32>
      %1373 = arith.cmpf ogt, %1299, %1372 : vector<8x128xf32>
      %1374 = arith.andi %1365, %1373 : vector<8x128xi1>
      %cst_310 = arith.constant 9.99999974E-5 : f32
      %1375 = vector.broadcast %cst_310 : f32 to vector<8x128xf32>
      %1376 = arith.cmpf olt, %1368, %1375 : vector<8x128xf32>
      %1377 = arith.andi %1374, %1376 : vector<8x128xi1>
      %1378 = arith.mulf %1360, %1299 : vector<8x128xf32>
      %cst_311 = arith.constant 0.000000e+00 : f32
      %1379 = vector.broadcast %cst_311 : f32 to vector<8x128xf32>
      %1380 = arith.select %1371, %1378, %1379 : vector<8x128xi1>, vector<8x128xf32>
      %1381 = vector.broadcast %1331 : f32 to vector<8x128xf32>
      %1382 = arith.mulf %1381, %1380 : vector<8x128xf32>
      %1383 = arith.addf %1286, %1382 : vector<8x128xf32>
      %1384 = vector.broadcast %1334 : f32 to vector<8x128xf32>
      %1385 = arith.mulf %1384, %1380 : vector<8x128xf32>
      %1386 = arith.addf %1289, %1385 : vector<8x128xf32>
      %1387 = vector.broadcast %1337 : f32 to vector<8x128xf32>
      %1388 = arith.mulf %1387, %1380 : vector<8x128xf32>
      %1389 = arith.addf %1292, %1388 : vector<8x128xf32>
      %1390 = vector.broadcast %1340 : f32 to vector<8x128xf32>
      %1391 = arith.mulf %1390, %1380 : vector<8x128xf32>
      %1392 = arith.addf %1295, %1391 : vector<8x128xf32>
      %1393 = arith.select %1371, %1368, %1299 : vector<8x128xi1>, vector<8x128xf32>
      %cst_312 = arith.constant 0.000000e+00 : f32
      %1394 = vector.broadcast %cst_312 : f32 to vector<8x128xf32>
      %1395 = arith.subf %1394, %1393 : vector<8x128xf32>
      %1396 = arith.select %1377, %1395, %1393 : vector<8x128xi1>, vector<8x128xf32>
      %1397 = arith.extui %1371 : vector<8x128xi1> to vector<8x128xi32>
      %1398 = arith.sitofp %1397 : vector<8x128xi32> to vector<8x128xf32>
      %1399 = vector.shape_cast %1398 : vector<8x128xf32> to vector<1x8x128xf32>
      %cst_313 = arith.constant dense<0.000000e+00> : vector<1xf32>
      %1400 = vector.multi_reduction <add>, %1399, %cst_313 [1, 2] : vector<1x8x128xf32> to vector<1xf32>
      %1401 = vector.shape_cast %1400 : vector<1xf32> to vector<1x1x1xf32>
      %1402 = vector.extract %1401[0, 0, 0] : f32 from vector<1x1x1xf32>
      %1403 = arith.fptosi %1402 : f32 to i32
      %1404 = arith.index_cast %1309 : i32 to index
      %1405 = memref.load %arg5[%1404] : memref<64xi32, #tpu.memory_space<smem>>
      memref.store %1403, %arg5[%1404] : memref<64xi32, #tpu.memory_space<smem>>
      %c14_i32 = arith.constant 14 : i32
      %1406 = arith.addi %47, %c14_i32 : i32
      %c10_i32_314 = arith.constant 10 : i32
      %1407 = arith.muli %1406, %c10_i32_314 : i32
      %c0_i32_315 = arith.constant 0 : i32
      %1408 = arith.addi %1407, %c0_i32_315 : i32
      %1409 = arith.index_cast %1408 : i32 to index
      %1410 = memref.load %arg1[%1409] : memref<640xf32, #tpu.memory_space<smem>>
      %c1_i32_316 = arith.constant 1 : i32
      %1411 = arith.addi %1407, %c1_i32_316 : i32
      %1412 = arith.index_cast %1411 : i32 to index
      %1413 = memref.load %arg1[%1412] : memref<640xf32, #tpu.memory_space<smem>>
      %c2_i32_317 = arith.constant 2 : i32
      %1414 = arith.addi %1407, %c2_i32_317 : i32
      %1415 = arith.index_cast %1414 : i32 to index
      %1416 = memref.load %arg1[%1415] : memref<640xf32, #tpu.memory_space<smem>>
      %c3_i32_318 = arith.constant 3 : i32
      %1417 = arith.addi %1407, %c3_i32_318 : i32
      %1418 = arith.index_cast %1417 : i32 to index
      %1419 = memref.load %arg1[%1418] : memref<640xf32, #tpu.memory_space<smem>>
      %c4_i32_319 = arith.constant 4 : i32
      %1420 = arith.addi %1407, %c4_i32_319 : i32
      %1421 = arith.index_cast %1420 : i32 to index
      %1422 = memref.load %arg1[%1421] : memref<640xf32, #tpu.memory_space<smem>>
      %c5_i32_320 = arith.constant 5 : i32
      %1423 = arith.addi %1407, %c5_i32_320 : i32
      %1424 = arith.index_cast %1423 : i32 to index
      %1425 = memref.load %arg1[%1424] : memref<640xf32, #tpu.memory_space<smem>>
      %c6_i32_321 = arith.constant 6 : i32
      %1426 = arith.addi %1407, %c6_i32_321 : i32
      %1427 = arith.index_cast %1426 : i32 to index
      %1428 = memref.load %arg1[%1427] : memref<640xf32, #tpu.memory_space<smem>>
      %c7_i32_322 = arith.constant 7 : i32
      %1429 = arith.addi %1407, %c7_i32_322 : i32
      %1430 = arith.index_cast %1429 : i32 to index
      %1431 = memref.load %arg1[%1430] : memref<640xf32, #tpu.memory_space<smem>>
      %c8_i32_323 = arith.constant 8 : i32
      %1432 = arith.addi %1407, %c8_i32_323 : i32
      %1433 = arith.index_cast %1432 : i32 to index
      %1434 = memref.load %arg1[%1433] : memref<640xf32, #tpu.memory_space<smem>>
      %c9_i32_324 = arith.constant 9 : i32
      %1435 = arith.addi %1407, %c9_i32_324 : i32
      %1436 = arith.index_cast %1435 : i32 to index
      %1437 = memref.load %arg1[%1436] : memref<640xf32, #tpu.memory_space<smem>>
      %1438 = vector.broadcast %1410 : f32 to vector<8x128xf32>
      %1439 = arith.subf %1438, %11 : vector<8x128xf32>
      %1440 = vector.broadcast %1413 : f32 to vector<8x128xf32>
      %1441 = arith.subf %1440, %8 : vector<8x128xf32>
      %1442 = vector.broadcast %1416 : f32 to vector<8x128xf32>
      %1443 = arith.mulf %1442, %1439 : vector<8x128xf32>
      %1444 = arith.mulf %1443, %1439 : vector<8x128xf32>
      %1445 = vector.broadcast %1422 : f32 to vector<8x128xf32>
      %1446 = arith.mulf %1445, %1441 : vector<8x128xf32>
      %1447 = arith.mulf %1446, %1441 : vector<8x128xf32>
      %1448 = arith.addf %1444, %1447 : vector<8x128xf32>
      %1449 = arith.mulf %1439, %1441 : vector<8x128xf32>
      %1450 = vector.broadcast %1419 : f32 to vector<8x128xf32>
      %1451 = arith.mulf %1450, %1449 : vector<8x128xf32>
      %1452 = arith.addf %1448, %1451 : vector<8x128xf32>
      %1453 = math.exp %1452 : vector<8x128xf32>
      %1454 = vector.broadcast %1425 : f32 to vector<8x128xf32>
      %1455 = arith.mulf %1454, %1453 : vector<8x128xf32>
      %cst_325 = arith.constant 9.900000e-01 : f32
      %1456 = vector.broadcast %cst_325 : f32 to vector<8x128xf32>
      %1457 = arith.minimumf %1456, %1455 : vector<8x128xf32>
      %cst_326 = arith.constant 0.000000e+00 : f32
      %1458 = vector.broadcast %cst_326 : f32 to vector<8x128xf32>
      %1459 = arith.cmpf ole, %1452, %1458 : vector<8x128xf32>
      %cst_327 = arith.constant 0.00392156886 : f32
      %1460 = vector.broadcast %cst_327 : f32 to vector<8x128xf32>
      %1461 = arith.cmpf oge, %1457, %1460 : vector<8x128xf32>
      %1462 = arith.andi %1459, %1461 : vector<8x128xi1>
      %cst_328 = arith.constant 1.000000e+00 : f32
      %1463 = vector.broadcast %cst_328 : f32 to vector<8x128xf32>
      %1464 = arith.subf %1463, %1457 : vector<8x128xf32>
      %1465 = arith.mulf %1396, %1464 : vector<8x128xf32>
      %cst_329 = arith.constant 9.99999974E-5 : f32
      %1466 = vector.broadcast %cst_329 : f32 to vector<8x128xf32>
      %1467 = arith.cmpf oge, %1465, %1466 : vector<8x128xf32>
      %1468 = arith.andi %1462, %1467 : vector<8x128xi1>
      %cst_330 = arith.constant 0.000000e+00 : f32
      %1469 = vector.broadcast %cst_330 : f32 to vector<8x128xf32>
      %1470 = arith.cmpf ogt, %1396, %1469 : vector<8x128xf32>
      %1471 = arith.andi %1462, %1470 : vector<8x128xi1>
      %cst_331 = arith.constant 9.99999974E-5 : f32
      %1472 = vector.broadcast %cst_331 : f32 to vector<8x128xf32>
      %1473 = arith.cmpf olt, %1465, %1472 : vector<8x128xf32>
      %1474 = arith.andi %1471, %1473 : vector<8x128xi1>
      %1475 = arith.mulf %1457, %1396 : vector<8x128xf32>
      %cst_332 = arith.constant 0.000000e+00 : f32
      %1476 = vector.broadcast %cst_332 : f32 to vector<8x128xf32>
      %1477 = arith.select %1468, %1475, %1476 : vector<8x128xi1>, vector<8x128xf32>
      %1478 = vector.broadcast %1428 : f32 to vector<8x128xf32>
      %1479 = arith.mulf %1478, %1477 : vector<8x128xf32>
      %1480 = arith.addf %1383, %1479 : vector<8x128xf32>
      %1481 = vector.broadcast %1431 : f32 to vector<8x128xf32>
      %1482 = arith.mulf %1481, %1477 : vector<8x128xf32>
      %1483 = arith.addf %1386, %1482 : vector<8x128xf32>
      %1484 = vector.broadcast %1434 : f32 to vector<8x128xf32>
      %1485 = arith.mulf %1484, %1477 : vector<8x128xf32>
      %1486 = arith.addf %1389, %1485 : vector<8x128xf32>
      %1487 = vector.broadcast %1437 : f32 to vector<8x128xf32>
      %1488 = arith.mulf %1487, %1477 : vector<8x128xf32>
      %1489 = arith.addf %1392, %1488 : vector<8x128xf32>
      %1490 = arith.select %1468, %1465, %1396 : vector<8x128xi1>, vector<8x128xf32>
      %cst_333 = arith.constant 0.000000e+00 : f32
      %1491 = vector.broadcast %cst_333 : f32 to vector<8x128xf32>
      %1492 = arith.subf %1491, %1490 : vector<8x128xf32>
      %1493 = arith.select %1474, %1492, %1490 : vector<8x128xi1>, vector<8x128xf32>
      %1494 = arith.extui %1468 : vector<8x128xi1> to vector<8x128xi32>
      %1495 = arith.sitofp %1494 : vector<8x128xi32> to vector<8x128xf32>
      %1496 = vector.shape_cast %1495 : vector<8x128xf32> to vector<1x8x128xf32>
      %cst_334 = arith.constant dense<0.000000e+00> : vector<1xf32>
      %1497 = vector.multi_reduction <add>, %1496, %cst_334 [1, 2] : vector<1x8x128xf32> to vector<1xf32>
      %1498 = vector.shape_cast %1497 : vector<1xf32> to vector<1x1x1xf32>
      %1499 = vector.extract %1498[0, 0, 0] : f32 from vector<1x1x1xf32>
      %1500 = arith.fptosi %1499 : f32 to i32
      %1501 = arith.index_cast %1406 : i32 to index
      %1502 = memref.load %arg5[%1501] : memref<64xi32, #tpu.memory_space<smem>>
      memref.store %1500, %arg5[%1501] : memref<64xi32, #tpu.memory_space<smem>>
      %c15_i32 = arith.constant 15 : i32
      %1503 = arith.addi %47, %c15_i32 : i32
      %c10_i32_335 = arith.constant 10 : i32
      %1504 = arith.muli %1503, %c10_i32_335 : i32
      %c0_i32_336 = arith.constant 0 : i32
      %1505 = arith.addi %1504, %c0_i32_336 : i32
      %1506 = arith.index_cast %1505 : i32 to index
      %1507 = memref.load %arg1[%1506] : memref<640xf32, #tpu.memory_space<smem>>
      %c1_i32_337 = arith.constant 1 : i32
      %1508 = arith.addi %1504, %c1_i32_337 : i32
      %1509 = arith.index_cast %1508 : i32 to index
      %1510 = memref.load %arg1[%1509] : memref<640xf32, #tpu.memory_space<smem>>
      %c2_i32_338 = arith.constant 2 : i32
      %1511 = arith.addi %1504, %c2_i32_338 : i32
      %1512 = arith.index_cast %1511 : i32 to index
      %1513 = memref.load %arg1[%1512] : memref<640xf32, #tpu.memory_space<smem>>
      %c3_i32_339 = arith.constant 3 : i32
      %1514 = arith.addi %1504, %c3_i32_339 : i32
      %1515 = arith.index_cast %1514 : i32 to index
      %1516 = memref.load %arg1[%1515] : memref<640xf32, #tpu.memory_space<smem>>
      %c4_i32_340 = arith.constant 4 : i32
      %1517 = arith.addi %1504, %c4_i32_340 : i32
      %1518 = arith.index_cast %1517 : i32 to index
      %1519 = memref.load %arg1[%1518] : memref<640xf32, #tpu.memory_space<smem>>
      %c5_i32_341 = arith.constant 5 : i32
      %1520 = arith.addi %1504, %c5_i32_341 : i32
      %1521 = arith.index_cast %1520 : i32 to index
      %1522 = memref.load %arg1[%1521] : memref<640xf32, #tpu.memory_space<smem>>
      %c6_i32_342 = arith.constant 6 : i32
      %1523 = arith.addi %1504, %c6_i32_342 : i32
      %1524 = arith.index_cast %1523 : i32 to index
      %1525 = memref.load %arg1[%1524] : memref<640xf32, #tpu.memory_space<smem>>
      %c7_i32_343 = arith.constant 7 : i32
      %1526 = arith.addi %1504, %c7_i32_343 : i32
      %1527 = arith.index_cast %1526 : i32 to index
      %1528 = memref.load %arg1[%1527] : memref<640xf32, #tpu.memory_space<smem>>
      %c8_i32_344 = arith.constant 8 : i32
      %1529 = arith.addi %1504, %c8_i32_344 : i32
      %1530 = arith.index_cast %1529 : i32 to index
      %1531 = memref.load %arg1[%1530] : memref<640xf32, #tpu.memory_space<smem>>
      %c9_i32_345 = arith.constant 9 : i32
      %1532 = arith.addi %1504, %c9_i32_345 : i32
      %1533 = arith.index_cast %1532 : i32 to index
      %1534 = memref.load %arg1[%1533] : memref<640xf32, #tpu.memory_space<smem>>
      %1535 = vector.broadcast %1507 : f32 to vector<8x128xf32>
      %1536 = arith.subf %1535, %11 : vector<8x128xf32>
      %1537 = vector.broadcast %1510 : f32 to vector<8x128xf32>
      %1538 = arith.subf %1537, %8 : vector<8x128xf32>
      %1539 = vector.broadcast %1513 : f32 to vector<8x128xf32>
      %1540 = arith.mulf %1539, %1536 : vector<8x128xf32>
      %1541 = arith.mulf %1540, %1536 : vector<8x128xf32>
      %1542 = vector.broadcast %1519 : f32 to vector<8x128xf32>
      %1543 = arith.mulf %1542, %1538 : vector<8x128xf32>
      %1544 = arith.mulf %1543, %1538 : vector<8x128xf32>
      %1545 = arith.addf %1541, %1544 : vector<8x128xf32>
      %1546 = arith.mulf %1536, %1538 : vector<8x128xf32>
      %1547 = vector.broadcast %1516 : f32 to vector<8x128xf32>
      %1548 = arith.mulf %1547, %1546 : vector<8x128xf32>
      %1549 = arith.addf %1545, %1548 : vector<8x128xf32>
      %1550 = math.exp %1549 : vector<8x128xf32>
      %1551 = vector.broadcast %1522 : f32 to vector<8x128xf32>
      %1552 = arith.mulf %1551, %1550 : vector<8x128xf32>
      %cst_346 = arith.constant 9.900000e-01 : f32
      %1553 = vector.broadcast %cst_346 : f32 to vector<8x128xf32>
      %1554 = arith.minimumf %1553, %1552 : vector<8x128xf32>
      %cst_347 = arith.constant 0.000000e+00 : f32
      %1555 = vector.broadcast %cst_347 : f32 to vector<8x128xf32>
      %1556 = arith.cmpf ole, %1549, %1555 : vector<8x128xf32>
      %cst_348 = arith.constant 0.00392156886 : f32
      %1557 = vector.broadcast %cst_348 : f32 to vector<8x128xf32>
      %1558 = arith.cmpf oge, %1554, %1557 : vector<8x128xf32>
      %1559 = arith.andi %1556, %1558 : vector<8x128xi1>
      %cst_349 = arith.constant 1.000000e+00 : f32
      %1560 = vector.broadcast %cst_349 : f32 to vector<8x128xf32>
      %1561 = arith.subf %1560, %1554 : vector<8x128xf32>
      %1562 = arith.mulf %1493, %1561 : vector<8x128xf32>
      %cst_350 = arith.constant 9.99999974E-5 : f32
      %1563 = vector.broadcast %cst_350 : f32 to vector<8x128xf32>
      %1564 = arith.cmpf oge, %1562, %1563 : vector<8x128xf32>
      %1565 = arith.andi %1559, %1564 : vector<8x128xi1>
      %cst_351 = arith.constant 0.000000e+00 : f32
      %1566 = vector.broadcast %cst_351 : f32 to vector<8x128xf32>
      %1567 = arith.cmpf ogt, %1493, %1566 : vector<8x128xf32>
      %1568 = arith.andi %1559, %1567 : vector<8x128xi1>
      %cst_352 = arith.constant 9.99999974E-5 : f32
      %1569 = vector.broadcast %cst_352 : f32 to vector<8x128xf32>
      %1570 = arith.cmpf olt, %1562, %1569 : vector<8x128xf32>
      %1571 = arith.andi %1568, %1570 : vector<8x128xi1>
      %1572 = arith.mulf %1554, %1493 : vector<8x128xf32>
      %cst_353 = arith.constant 0.000000e+00 : f32
      %1573 = vector.broadcast %cst_353 : f32 to vector<8x128xf32>
      %1574 = arith.select %1565, %1572, %1573 : vector<8x128xi1>, vector<8x128xf32>
      %1575 = vector.broadcast %1525 : f32 to vector<8x128xf32>
      %1576 = arith.mulf %1575, %1574 : vector<8x128xf32>
      %1577 = arith.addf %1480, %1576 : vector<8x128xf32>
      %1578 = vector.broadcast %1528 : f32 to vector<8x128xf32>
      %1579 = arith.mulf %1578, %1574 : vector<8x128xf32>
      %1580 = arith.addf %1483, %1579 : vector<8x128xf32>
      %1581 = vector.broadcast %1531 : f32 to vector<8x128xf32>
      %1582 = arith.mulf %1581, %1574 : vector<8x128xf32>
      %1583 = arith.addf %1486, %1582 : vector<8x128xf32>
      %1584 = vector.broadcast %1534 : f32 to vector<8x128xf32>
      %1585 = arith.mulf %1584, %1574 : vector<8x128xf32>
      %1586 = arith.addf %1489, %1585 : vector<8x128xf32>
      %1587 = arith.select %1565, %1562, %1493 : vector<8x128xi1>, vector<8x128xf32>
      %cst_354 = arith.constant 0.000000e+00 : f32
      %1588 = vector.broadcast %cst_354 : f32 to vector<8x128xf32>
      %1589 = arith.subf %1588, %1587 : vector<8x128xf32>
      %1590 = arith.select %1571, %1589, %1587 : vector<8x128xi1>, vector<8x128xf32>
      %1591 = arith.extui %1565 : vector<8x128xi1> to vector<8x128xi32>
      %1592 = arith.sitofp %1591 : vector<8x128xi32> to vector<8x128xf32>
      %1593 = vector.shape_cast %1592 : vector<8x128xf32> to vector<1x8x128xf32>
      %cst_355 = arith.constant dense<0.000000e+00> : vector<1xf32>
      %1594 = vector.multi_reduction <add>, %1593, %cst_355 [1, 2] : vector<1x8x128xf32> to vector<1xf32>
      %1595 = vector.shape_cast %1594 : vector<1xf32> to vector<1x1x1xf32>
      %1596 = vector.extract %1595[0, 0, 0] : f32 from vector<1x1x1xf32>
      %1597 = arith.fptosi %1596 : f32 to i32
      %1598 = arith.index_cast %1503 : i32 to index
      %1599 = memref.load %arg5[%1598] : memref<64xi32, #tpu.memory_space<smem>>
      memref.store %1597, %arg5[%1598] : memref<64xi32, #tpu.memory_space<smem>>
      %1600 = vector.shape_cast %1590 : vector<8x128xf32> to vector<1x8x128xf32>
      %cst_356 = arith.constant dense<0xFF800000> : vector<1xf32>
      %1601 = vector.multi_reduction <maximumf>, %1600, %cst_356 [1, 2] : vector<1x8x128xf32> to vector<1xf32>
      %1602 = vector.shape_cast %1601 : vector<1xf32> to vector<1x1x1xf32>
      %1603 = vector.extract %1602[0, 0, 0] : f32 from vector<1x1x1xf32>
      %cst_357 = arith.constant 0.000000e+00 : f32
      %1604 = arith.cmpf ogt, %1603, %cst_357 : f32
      %c1_i32_358 = arith.constant 1 : i32
      %1605 = arith.addi %arg7, %c1_i32_358 : i32
      scf.yield %1605, %1604, %1590, %1577, %1580, %1583, %1586 : i32, i1, vector<8x128xf32>, vector<8x128xf32>, vector<8x128xf32>, vector<8x128xf32>, vector<8x128xf32>
    }
    %c16_i32 = arith.constant 16 : i32
    %20 = arith.muli %19#0, %c16_i32 : i32
    %c0_4 = arith.constant 0 : index
    %21 = memref.load %arg6[%c0_4] : memref<1xi32, #tpu.memory_space<smem>>
    memref.store %20, %arg6[%c0_4] : memref<1xi32, #tpu.memory_space<smem>>
    %22 = math.absf %19#2 : vector<8x128xf32>
    %c0_5 = arith.constant 0 : index
    %23 = memref.load %arg2[%c0_5] : memref<3xf32, #tpu.memory_space<smem>>
    %24 = vector.broadcast %23 : f32 to vector<8x128xf32>
    %25 = arith.mulf %22, %24 : vector<8x128xf32>
    %26 = arith.addf %19#3, %25 : vector<8x128xf32>
    %c0_6 = arith.constant 0 : index
    %c0_7 = arith.constant 0 : index
    %c0_8 = arith.constant 0 : index
    %27 = vector.load %arg3[%c0_6, %c0_7, %c0_8] : memref<3x8x128xf32, #tpu.memory_space<vmem>>, vector<1x8x128xf32>
    %28 = vector.shape_cast %27 : vector<1x8x128xf32> to vector<8x128xf32>
    %29 = vector.shape_cast %26 : vector<8x128xf32> to vector<1x8x128xf32>
    tpu.vector_store %arg3[%c0_6, %c0_7, %c0_8], %29 {strides = array<i32>} : memref<3x8x128xf32, #tpu.memory_space<vmem>>, vector<1x8x128xf32>,
    %c1 = arith.constant 1 : index
    %30 = memref.load %arg2[%c1] : memref<3xf32, #tpu.memory_space<smem>>
    %31 = vector.broadcast %30 : f32 to vector<8x128xf32>
    %32 = arith.mulf %22, %31 : vector<8x128xf32>
    %33 = arith.addf %19#4, %32 : vector<8x128xf32>
    %c1_9 = arith.constant 1 : index
    %c0_10 = arith.constant 0 : index
    %c0_11 = arith.constant 0 : index
    %34 = vector.load %arg3[%c1_9, %c0_10, %c0_11] : memref<3x8x128xf32, #tpu.memory_space<vmem>>, vector<1x8x128xf32>
    %35 = vector.shape_cast %34 : vector<1x8x128xf32> to vector<8x128xf32>
    %36 = vector.shape_cast %33 : vector<8x128xf32> to vector<1x8x128xf32>
    tpu.vector_store %arg3[%c1_9, %c0_10, %c0_11], %36 {strides = array<i32>} : memref<3x8x128xf32, #tpu.memory_space<vmem>>, vector<1x8x128xf32>,
    %c2 = arith.constant 2 : index
    %37 = memref.load %arg2[%c2] : memref<3xf32, #tpu.memory_space<smem>>
    %38 = vector.broadcast %37 : f32 to vector<8x128xf32>
    %39 = arith.mulf %22, %38 : vector<8x128xf32>
    %40 = arith.addf %19#5, %39 : vector<8x128xf32>
    %c2_12 = arith.constant 2 : index
    %c0_13 = arith.constant 0 : index
    %c0_14 = arith.constant 0 : index
    %41 = vector.load %arg3[%c2_12, %c0_13, %c0_14] : memref<3x8x128xf32, #tpu.memory_space<vmem>>, vector<1x8x128xf32>
    %42 = vector.shape_cast %41 : vector<1x8x128xf32> to vector<8x128xf32>
    %43 = vector.shape_cast %40 : vector<8x128xf32> to vector<1x8x128xf32>
    tpu.vector_store %arg3[%c2_12, %c0_13, %c0_14], %43 {strides = array<i32>} : memref<3x8x128xf32, #tpu.memory_space<vmem>>, vector<1x8x128xf32>,
    %c0_15 = arith.constant 0 : index
    %c0_16 = arith.constant 0 : index
    %c0_17 = arith.constant 0 : index
    %44 = vector.load %arg4[%c0_15, %c0_16, %c0_17] : memref<1x8x128xf32, #tpu.memory_space<vmem>>, vector<1x8x128xf32>
    %45 = vector.shape_cast %44 : vector<1x8x128xf32> to vector<8x128xf32>
    %46 = vector.shape_cast %19#6 : vector<8x128xf32> to vector<1x8x128xf32>
    tpu.vector_store %arg4[%c0_15, %c0_16, %c0_17], %46 {strides = array<i32>} : memref<1x8x128xf32, #tpu.memory_space<vmem>>, vector<1x8x128xf32>,
    return
  }
}

</mosaic_0001>

<bundles_post_ra>
// kernel: tpu_custom_call.1
= control target key start
LH: loop header
LB: loop body
LE: loop exit
PB: predicated region body
PF: predicated region fallthrough
CT: control target
= control target key end

     0   :  { %s3486_s0 = inlined_call_operand.<no memory space> [shape: s32[1], index: 0, kind: input, shape index: {}]   ;;  %s3487_s1 = inlined_call_operand.hbm [shape: f32[640], index: 1, kind: input, shape index: {}]   ;;  %s3488_s2 = inlined_call_operand.vmem [shape: f32[3], index: 2, kind: input, shape index: {}]   ;;  %s3489_s3 = inlined_call_operand.hbm [shape: f32[3,8,128], index: 3, kind: output, shape index: {0}]   ;;  %s3490_s4 = inlined_call_operand.hbm [shape: f32[1,8,128], index: 4, kind: output, shape index: {1}]   ;;  %s3491_s5 = inlined_call_operand.hbm [shape: s32[64], index: 5, kind: output, shape index: {2}]   ;;  %s3492_s6 = inlined_call_operand.hbm [shape: s32[1], index: 6, kind: output, shape index: {3}]  }
   0x1   :  { %3493 = sst [smem:[#allocation21_spill]] %s3489_s3 }
   0x2   :  { %3494 = sst [smem:[#allocation22_spill]] %s3490_s4 }
   0x3   :  { %3495 = sst [smem:[#allocation23_spill]] %s3491_s5 }
   0x4   :  { %3496 = sst [smem:[#allocation24_spill]] %s3492_s6 }
   0x5   :  { %13 = vsyncpa [#allocation5], 0 }
   0x6   :  { %14 = vsyncpa [#allocation7], 0 }
   0x7   :  { %15 = vsyncpa [#allocation4], 0 }
   0x8   :  { %16 = vsyncpa [#allocation11], 0 }
   0x9   :  { %17 = vsyncpa [#allocation6], 0 }
   0xa   :  { %18 = vsyncpa [#allocation14], 0  ;;  %s35_s23 = sshll.u32 %s3488_s2, 4  ;;  %s2040_s24 = smov [#allocation3]   ;;  %s36_s23 = int_to_ptr.vmem [resolvable:$true] %s35_s23 }
   0xb   :  { %28 = dma.hbm_to_smem %s3487_s1, 80, %s2040_s24, [#allocation5]  }
   0xc   :  { %s1864_s27 = scalar_lea.vmem %s36_s23, 16  ;;  %p1869_p1 = scmp.lt.s32.totalorder %s36_s23, %s36_s23 }
   0xd   :  { %p1865_p0 = scmp.ne.s32.totalorder %s36_s23, %s1864_s27  ;;  %p1870_p2 = scmp.lt.s32.totalorder %s1864_s27, %s1864_s27 }
   0xf   :  { %p1871_p3 = por %p1870_p2, %p1869_p1 }
  0x11   :  { %p1872_p4 = pnand %p1871_p3, %p1865_p0 }
  0x13   :  { %1875 = shalt.err (!%p1872_p4)
}
  0x14   :  { %s2041_s28 = smov [#allocation8]  }
  0x15   :  { %38 = dma.vmem_to_smem %s36_s23, 16, %s2041_s28, [#allocation7]  }
  0x16   :  { %1980 = dma.done.wait [#allocation5], 80  }
  0x17   :  { %1981 = vsyncadd [#allocation5], 4294967216 }
  0x18   :  { %1982 = dma.done.wait [#allocation7], 16  }
  0x19   :  { %1983 = vsyncadd [#allocation7], 4294967280 }
  0x1a   :  { %45 = sfence }
  0x1b   :  { %v46_v0 = vlaneseq  ;;  %v2042_v6 = vmov 0.0   ;;  %p1563_p5 = scmp.gt.s32.totalorder %s3486_s0, 0  ;;  %v2099_v12 = vmov 0.0   ;;  %v2101_v13 = vmov 0.0   ;;  %s2109_s29 = smov 0  }
  0x1c   :  { %v2103_v14 = vmov 0.0   ;;  %v2105_v15 = vmov 0.0   ;;  %v2111_v17 = vmov (%p1563_p5), 0.0   ;;  %v2113_v18 = vmov (%p1563_p5), 0.0   ;;  %s2121_s30 = smov (%p1563_p5), 0  }
  0x1d   :  { %v47_v1 = vshrl.u32 %v46_v0, 7  ;;  %v49_v2 = vand.u32 127, %v46_v0  ;;  %v2115_v19 = vmov (%p1563_p5), 0.0   ;;  %v2117_v20 = vmov (%p1563_p5), 0.0  }
  0x1f   :  { %v50_v3 = vmul.u32 128, %v47_v1 }
  0x21   :  { %v51_v4 = vadd.s32 %v50_v3, %v49_v2 }
  0x23   :  { %v52_v5 = vcvt.s32.f32 %v51_v4  ;;  %vm58_vm0 = vcmp.lt.s32.totalorder %v51_v4, 256 }
  0x24   :  { %v59_v7 = vsel %vm58_vm0, 1.0, %v2042_v6  }
  0x25   :  { %v54_v8 = vmul.f32 0.0625, %v52_v5  ;;  %v3497_v16 = vmov %v59_v7 }
  0x27   :  { %v2091_v9 = vfloor.f32 %v54_v8  ;;  %1550 = sbr.rel (!%p1563_p5) target bundleno = 477 (0x1dd), region = 84 }
  0x29   :  { %v56_v10 = vmul.f32 16.0, %v2091_v9 }
  0x2b   :  { %v2094_v11 = vsub.f32 %v52_v5, %v56_v10 }
  0x2c LB: > { %s3498_s7 = smov %s2014_s30  ;;  %vm123_vm1 = vcmp.gt.f32.partialorder %v2010_v7, 0.0  ;;  %s2014_s30 = sphi %s2121_s30, %s3593_s30   ;;  %v2010_v7 = vphi %v59_v7, %v3592_v7   ;;  %v2006_v20 = vphi %v2117_v20, %v3591_v20   ;;  %v2002_v19 = vphi %v2115_v19, %v3590_v19   ;;  %v1998_v18 = vphi %v2113_v18, %v3589_v18   ;;  %v1994_v17 = vphi %v2111_v17, %v3588_v17  }
  0x2d   : > { %s2142_s8 = sshll.u32 %s3498_s7, 4  ;;  %s76_s9 = smul.u32 160, %s3498_s7 }
  0x2e   : > { %s158_s11 = sadd.s32 1, %s2142_s8  ;;  %s241_s30 = sadd.s32 2, %s2142_s8 }
  0x2f   : > { %s77_s12 = sld [smem:[#allocation3 + %s76_s9]]  ;;  %s78_s13 = sadd.s32 1, %s76_s9 }
  0x30   : > { %s79_s14 = sld [smem:[#allocation3 + %s78_s13]]  ;;  %s80_s15 = sadd.s32 2, %s76_s9 }
  0x31   : > { %s81_s16 = sld [smem:[#allocation3 + %s80_s15]]  ;;  %s82_s17 = sadd.s32 3, %s76_s9 }
  0x32   : > { %s2147_s18 = sld [smem:[#allocation3 + %s82_s17]]  ;;  %s84_s19 = sadd.s32 4, %s76_s9 }
  0x33   : > { %s85_s20 = sld [smem:[#allocation3 + %s84_s19]]  ;;  %s86_s21 = sadd.s32 5, %s76_s9 }
  0x34   : > { %s2149_s22 = sld [smem:[#allocation3 + %s86_s21]]  ;;  %s88_s23 = sadd.s32 6, %s76_s9 }
  0x35   : > { %s2151_s24 = sld [smem:[#allocation3 + %s88_s23]]  ;;  %s90_s25 = sadd.s32 7, %s76_s9  ;;  %v96_v21 = vstv %s77_s12 }
  0x36   : > { %s2153_s26 = sld [smem:[#allocation3 + %s90_s25]]  ;;  %s92_s27 = sadd.s32 8, %s76_s9  ;;  %v97_v22 = vsub.f32 %v96_v21, %v2094_v11  ;;  %v98_v23 = vstv %s79_s14 }
  0x37   : > { %s2156_s28 = sld [smem:[#allocation3 + %s92_s27]]  ;;  %s94_s1 = sadd.s32 9, %s76_s9  ;;  %v99_v24 = vsub.f32 %v98_v23, %v2091_v9  ;;  %v100_v25 = vstv %s81_s16 }
  0x38   : > { %s2159_s2 = sld [smem:[#allocation3 + %s94_s1]]  ;;  %v101_v26 = vmul.f32 %v100_v25, %v97_v22  ;;  %s2161_s29 = smul.u32 10, %s158_s11  ;;  %v108_v29 = vstv %s2147_s18 }
  0x39   : > { %v103_v27 = vstv %s85_s20  ;;  %v107_v28 = vmul.f32 %v99_v24, %v97_v22  ;;  %s324_s12 = sadd.s32 3, %s2142_s8 }
  0x3a   : > { %v102_v30 = vmul.f32 %v101_v26, %v97_v22  ;;  %v104_v31 = vmul.f32 %v103_v27, %v99_v24  ;;  %s160_s9 = sld [smem:[#allocation3 + %s2161_s29]]  ;;  %s161_s13 = sadd.s32 1, %s2161_s29  ;;  %v113_v58 = vstv %s2149_s22 }
  0x3b   : > { %s162_s14 = sld [smem:[#allocation3 + %s161_s13]]  ;;  %s163_s11 = sadd.s32 2, %s2161_s29  ;;  %v109_v33 = vmul.f32 %v108_v29, %v107_v28  ;;  %v129_v8 = vstv %s2151_s24 }
  0x3c   : > { %v105_v32 = vmul.f32 %v104_v31, %v99_v24  ;;  %s164_s15 = sld [smem:[#allocation3 + %s163_s11]]  ;;  %s165_s16 = sadd.s32 3, %s2161_s29  ;;  %v132_v15 = vstv %s2153_s26 }
  0x3d   : > { %s2170_s17 = sld [smem:[#allocation3 + %s165_s16]]  ;;  %s167_s19 = sadd.s32 4, %s2161_s29  ;;  %v135_v25 = vstv %s2156_s28 }
  0x3e   : > { %v106_v34 = vadd.f32 %v105_v32, %v102_v30  ;;  %s168_s18 = sld [smem:[#allocation3 + %s167_s19]]  ;;  %s169_s20 = sadd.s32 5, %s2161_s29  ;;  %v138_v28 = vstv %s2159_s2 }
  0x3f   : > { %s2174_s21 = sld [smem:[#allocation3 + %s169_s20]]  ;;  %s171_s23 = sadd.s32 6, %s2161_s29 }
  0x40   : > { %v2177_v35 = vadd.f32 %v109_v33, %v106_v34  ;;  %s2179_s25 = sld [smem:[#allocation3 + %s171_s23]]  ;;  %s173_s27 = sadd.s32 7, %s2161_s29  ;;  %v179_v36 = vstv %s160_s9 }
  0x41   : > { %s2182_s1 = sld [smem:[#allocation3 + %s173_s27]]  ;;  %s175_s13 = sadd.s32 8, %s2161_s29  ;;  %v180_v37 = vsub.f32 %v179_v36, %v2094_v11  ;;  %v181_v38 = vstv %s162_s14 }
  0x42   : > { %v111_v39 = vmul.f32 1.442695, %v2177_v35  ;;  %s2187_s11 = sld [smem:[#allocation3 + %s175_s13]]  ;;  %s177_s16 = sadd.s32 9, %s2161_s29  ;;  %v182_v40 = vsub.f32 %v181_v38, %v2091_v9  ;;  %v183_v41 = vstv %s164_s15  ;;  %vm116_vm2 = vcmp.le.f32.partialorder %v2177_v35, 0.0 }
  0x43   : > { %s2191_s19 = sld [smem:[#allocation3 + %s177_s16]]  ;;  %v184_v42 = vmul.f32 %v183_v41, %v180_v37  ;;  %s2195_s9 = smul.u32 10, %s241_s30  ;;  %v191_v45 = vstv %s2170_s17 }
  0x44   : > { %1824 = vpow2.f32 %v111_v39  ;;  %v186_v43 = vstv %s168_s18  ;;  %v190_v44 = vmul.f32 %v182_v40, %v180_v37  ;;  %s2200_s29 = smul.u32 10, %s324_s12  ;;  %s3499_s24 = sadd.s32 4, %s2142_s8  ;;  %v2043_v39 = vmov 0.0  }
  0x45   : > { %v185_v46 = vmul.f32 %v184_v42, %v180_v37  ;;  %v187_v47 = vmul.f32 %v186_v43, %v182_v40  ;;  %s243_s15 = sld [smem:[#allocation3 + %s2195_s9]]  ;;  %s244_s30 = sadd.s32 1, %s2195_s9  ;;  %v196_v29 = vstv %s2174_s21 }
  0x46   : > { %s245_s20 = sld [smem:[#allocation3 + %s244_s30]]  ;;  %s246_s23 = sadd.s32 2, %s2195_s9  ;;  %v192_v49 = vmul.f32 %v191_v45, %v190_v44  ;;  %v212_v33 = vstv %s2179_s25 }
  0x47   : > { %v188_v48 = vmul.f32 %v187_v47, %v182_v40  ;;  %s247_s18 = sld [smem:[#allocation3 + %s246_s23]]  ;;  %s248_s27 = sadd.s32 3, %s2195_s9 }
  0x48   : > { %s2207_s13 = sld [smem:[#allocation3 + %s248_s27]]  ;;  %s250_s17 = sadd.s32 4, %s2195_s9 }
  0x49   : > { %v189_v50 = vadd.f32 %v188_v48, %v185_v46  ;;  %s251_s12 = sld [smem:[#allocation3 + %s250_s17]]  ;;  %s252_s16 = sadd.s32 5, %s2195_s9 }
  0x4a   : > { %s2211_s10 = sld [smem:[#allocation3 + %s252_s16]]  ;;  %s254_s14 = sadd.s32 6, %s2195_s9 }
  0x4b   : > { %v2214_v51 = vadd.f32 %v192_v49, %v189_v50  ;;  %s2216_s30 = sld [smem:[#allocation3 + %s254_s14]]  ;;  %s256_s3 = sadd.s32 7, %s2195_s9  ;;  %v262_v52 = vstv %s243_s15 }
  0x4c   : > { %s2219_s23 = sld [smem:[#allocation3 + %s256_s3]]  ;;  %s258_s27 = sadd.s32 8, %s2195_s9  ;;  %v263_v53 = vsub.f32 %v262_v52, %v2094_v11  ;;  %v264_v54 = vstv %s245_s20 }
  0x4d   : > { %v194_v55 = vmul.f32 1.442695, %v2214_v51  ;;  %s2224_s17 = sld [smem:[#allocation3 + %s258_s27]]  ;;  %s260_s16 = sadd.s32 9, %s2195_s9  ;;  %v265_v56 = vsub.f32 %v264_v54, %v2091_v9  ;;  %v266_v57 = vstv %s247_s18  ;;  %vm199_vm10 = vcmp.le.f32.partialorder %v2214_v51, 0.0 }
  0x4e   : > { %s2229_s3 = sld [smem:[#allocation3 + %s260_s16]]  ;;  %v267_v59 = vmul.f32 %v266_v57, %v263_v53  ;;  %s327_s14 = sadd.s32 1, %s2200_s29  ;;  %v274_v62 = vstv %s2207_s13  ;;  %v218_v54 = vstv %s2187_s11 }
  0x4f   : > { %1826 = vpow2.f32 %v194_v55  ;;  %v269_v60 = vstv %s251_s12  ;;  %v273_v61 = vmul.f32 %v265_v56, %v263_v53  ;;  %s2234_s15 = sld [smem:[#allocation3 + %s2200_s29]]  ;;  %s329_s20 = sadd.s32 2, %s2200_s29  ;;  %v221_v55 = vstv %s2191_s19 }
  0x50   : > { %v268_v63 = vmul.f32 %v267_v59, %v263_v53  ;;  %v270_v0 = vmul.f32 %v269_v60, %v265_v56  ;;  %s2237_s9 = sld [smem:[#allocation3 + %s327_s14]]  ;;  %s331_s22 = sadd.s32 3, %s2200_s29  ;;  %v215_v53 = vstv %s2182_s1  ;;  %v279_v57 = vstv %s2211_s10 }
  0x51   : > { %v1825_v1 = vpop.eup %1824  ;;  %s2240_s18 = sld [smem:[#allocation3 + %s329_s20]]  ;;  %s333_s27 = sadd.s32 4, %s2200_s29  ;;  %v275_v4 = vmul.f32 %v274_v62, %v273_v61 }
  0x52   : > { %v114_v2 = vmul.f32 %v1825_v1, %v113_v58  ;;  %v271_v3 = vmul.f32 %v270_v0, %v265_v56  ;;  %s2243_s13 = sld [smem:[#allocation3 + %s331_s22]]  ;;  %s335_s12 = sadd.s32 5, %s2200_s29  ;;  %v295_v58 = vstv %s2216_s30  ;;  %v298_v61 = vstv %s2219_s23 }
  0x53   : > { %s2247_s16 = sld [smem:[#allocation3 + %s333_s27]]  ;;  %s337_s14 = sadd.s32 6, %s2200_s29  ;;  %v301_v62 = vstv %s2224_s17 }
  0x54   : > { %v115_v5 = vmin.f32 %v114_v2, 0.99  ;;  %v272_v6 = vadd.f32 %v271_v3, %v268_v63  ;;  %s2250_s20 = sld [smem:[#allocation3 + %s335_s12]]  ;;  %s339_s6 = sadd.s32 7, %s2200_s29 }
  0x55   : > { %s2255_s22 = sld [smem:[#allocation3 + %s337_s14]]  ;;  %s341_s5 = sadd.s32 8, %s2200_s29  ;;  %v345_v10 = vstv %s2234_s15 }
  0x56   : > { %vm117_vm3 = vcmp.ge.f32.partialorder %v115_v5, 0.003921569  ;;  %v119_v12 = vsub.f32 1.0, %v115_v5  ;;  %v127_v13 = vmul.f32 %v2010_v7, %v115_v5  ;;  %v2260_v14 = vadd.f32 %v275_v4, %v272_v6  ;;  %s2262_s27 = sld [smem:[#allocation3 + %s339_s6]]  ;;  %s343_s12 = sadd.s32 9, %s2200_s29 }
  0x57   : > { %s2266_s4 = sld [smem:[#allocation3 + %s341_s5]]  ;;  %v346_v16 = vsub.f32 %v345_v10, %v2094_v11  ;;  %v347_v21 = vstv %s2237_s9  ;;  %v349_v22 = vstv %s2240_s18  ;;  %s2273_s15 = smul.u32 10, %s3499_s24  ;;  %vm2277_vm4 = vmand %vm116_vm2, %vm117_vm3 }
  0x58   : > { %v120_v24 = vmul.f32 %v2010_v7, %v119_v12  ;;  %v277_v26 = vmul.f32 1.442695, %v2260_v14  ;;  %s2284_s5 = sld [smem:[#allocation3 + %s343_s12]]  ;;  %v348_v27 = vsub.f32 %v347_v21, %v2091_v9  ;;  %vm2298_vm6 = vmand %vm2277_vm4, %vm123_vm1  ;;  %v357_v37 = vstv %s2243_s13  ;;  %s490_s14 = sadd.s32 5, %s2142_s8 }
  0x59   : > { %v350_v30 = vmul.f32 %v349_v22, %v346_v16  ;;  %v352_v31 = vstv %s2247_s16  ;;  %s2291_s6 = sld [smem:[#allocation3 + %s2273_s15]]  ;;  %s410_s26 = sadd.s32 1, %s2273_s15  ;;  %vm282_vm14 = vcmp.le.f32.partialorder %v2260_v14, 0.0 }
  0x5a   : > { %vm121_vm5 = vcmp.ge.f32.partialorder %v120_v24, 0.0001  ;;  %1828 = vpow2.f32 %v277_v26  ;;  %v353_v34 = vmul.f32 %v352_v31, %v348_v27  ;;  %s2303_s28 = sld [smem:[#allocation3 + %s410_s26]]  ;;  %s412_s2 = sadd.s32 2, %s2273_s15  ;;  %vm125_vm8 = vcmp.lt.f32.partialorder %v120_v24, 0.0001 }
  0x5b   : > { %vm122_vm7 = vmand %vm2277_vm4, %vm121_vm5  ;;  %v351_v35 = vmul.f32 %v350_v30, %v346_v16  ;;  %v356_v36 = vmul.f32 %v348_v27, %v346_v16  ;;  %s2309_s21 = sld [smem:[#allocation3 + %s412_s2]]  ;;  %s414_s29 = sadd.s32 3, %s2273_s15 }
  0x5c   : > { %v1827_v38 = vpop.eup %1826  ;;  %v1566_v40 = vsel %vm122_vm7, 1.0, %v2043_v39  ;;  %v128_v41 = vsel %vm122_vm7, %v127_v13, 0.0  ;;  %v141_v42 = vsel %vm122_vm7, %v120_v24, %v2010_v7  ;;  %v354_v43 = vmul.f32 %v353_v34, %v348_v27  ;;  %s416_s9 = sadd.s32 4, %s2273_s15  ;;  %s418_s13 = sadd.s32 5, %s2273_s15  ;;  %vm2321_vm9 = vmand %vm2298_vm6, %vm125_vm8 }
  0x5d   : > { %146 = vadd.xlane.f32.xlu0 %v1566_v40  ;;  %v130_v44 = vmul.f32 %v129_v8, %v128_v41  ;;  %v133_v45 = vmul.f32 %v132_v15, %v128_v41  ;;  %v136_v46 = vmul.f32 %v135_v25, %v128_v41  ;;  %v139_v47 = vmul.f32 %v138_v28, %v128_v41  ;;  %s2315_s18 = sld [smem:[#allocation3 + %s416_s9]]  ;;  %s420_s16 = sadd.s32 6, %s2273_s15 }
  0x5e   : > { %v142_v48 = vsub.f32 0.0, %v141_v42  ;;  %v197_v49 = vmul.f32 %v1827_v38, %v196_v29  ;;  %v355_v50 = vadd.f32 %v354_v43, %v351_v35  ;;  %v358_v52 = vmul.f32 %v357_v37, %v356_v36  ;;  %s2331_s12 = sld [smem:[#allocation3 + %s414_s29]]  ;;  %s422_s24 = sadd.s32 7, %s2273_s15 }
  0x5f   : > { %s2338_s26 = sld [smem:[#allocation3 + %s418_s13]]  ;;  %s424_s2 = sadd.s32 8, %s2273_s15  ;;  %v428_v63 = vstv %s2291_s6  ;;  %v131_v13 = vadd.f32 %v2006_v20, %v130_v44  ;;  %v134_v15 = vadd.f32 %v2002_v19, %v133_v45  ;;  %v137_v22 = vadd.f32 %v1998_v18, %v136_v46 }
  0x60   : > { %v198_v56 = vmin.f32 %v197_v49, 0.99  ;;  %v2336_v59 = vadd.f32 %v358_v52, %v355_v50  ;;  %v143_v60 = vsel %vm2321_vm9, %v142_v48, %v141_v42  ;;  %s2345_s9 = sld [smem:[#allocation3 + %s420_s16]]  ;;  %v429_v3 = vsub.f32 %v428_v63, %v2094_v11  ;;  %s2356_s13 = smul.u32 10, %s490_s14 }
  0x61   : > { %s2349_s10 = sld [smem:[#allocation3 + %s422_s24]]  ;;  %vm206_vm12 = vcmp.gt.f32.partialorder %v143_v60, 0.0  ;;  %v430_v4 = vstv %s2303_s28  ;;  %v432_v5 = vstv %s2309_s21  ;;  %s573_s16 = sadd.s32 6, %s2142_s8  ;;  %v140_v23 = vadd.f32 %v1994_v17, %v139_v47 }
  0x62   : > { %vm200_vm11 = vcmp.ge.f32.partialorder %v198_v56, 0.003921569  ;;  %v202_v0 = vsub.f32 1.0, %v198_v56  ;;  %v210_v1 = vmul.f32 %v198_v56, %v143_v60  ;;  %v360_v2 = vmul.f32 1.442695, %v2336_v59  ;;  %s2351_s29 = sld [smem:[#allocation3 + %s424_s2]] }
  0x63   : > { %vm2360_vm13 = vmand %vm199_vm10, %vm200_vm11  ;;  %v431_v10 = vsub.f32 %v430_v4, %v2091_v9  ;;  %v435_v12 = vstv %s2315_s18  ;;  %v433_v51 = vmul.f32 %v432_v5, %v429_v3  ;;  %s2372_s28 = sld [smem:[#allocation3 + %s2356_s13]]  ;;  %s493_s21 = sadd.s32 1, %s2356_s13  ;;  %v304_v46 = vstv %s2229_s3 }
  0x64   : > { %v203_v8 = vmul.f32 %v202_v0, %v143_v60  ;;  %1830 = vpow2.f32 %v360_v2  ;;  %vm2378_vm0 = vmand %vm2360_vm13, %vm206_vm12  ;;  %s2382_s18 = sld [smem:[#allocation3 + %s493_s21]]  ;;  %s495_s14 = sadd.s32 2, %s2356_s13  ;;  %v440_v25 = vstv %s2331_s12  ;;  %vm365_vm11 = vcmp.le.f32.partialorder %v2336_v59, 0.0 }
  0x65   : > { %v436_v20 = vmul.f32 %v435_v12, %v431_v10  ;;  %v439_v21 = vmul.f32 %v431_v10, %v429_v3  ;;  %v434_v24 = vmul.f32 %v433_v51, %v429_v3  ;;  %s2390_s24 = sld [smem:[#allocation3 + %s495_s14]]  ;;  %s497_s2 = sadd.s32 3, %s2356_s13  ;;  %v384_v17 = vstv %s2266_s4 }
  0x66   : > { %vm204_vm15 = vcmp.ge.f32.partialorder %v203_v8, 0.0001  ;;  %vm208_vm1 = vcmp.lt.f32.partialorder %v203_v8, 0.0001  ;;  %s2394_s21 = sld [smem:[#allocation3 + %s497_s2]]  ;;  %s499_s6 = sadd.s32 4, %s2356_s13 }
  0x67   : > { %v1829_v19 = vpop.eup %1828  ;;  %vm205_vm2 = vmand %vm2360_vm13, %vm204_vm15  ;;  %s2412_s12 = sld [smem:[#allocation3 + %s499_s6]]  ;;  %s501_s14 = sadd.s32 5, %s2356_s13  ;;  %v437_v36 = vmul.f32 %v436_v20, %v431_v10  ;;  %v441_v37 = vmul.f32 %v440_v25, %v439_v21  ;;  %v378_v25 = vstv %s2255_s22 }
  0x68   : > { %v1567_v26 = vsel %vm205_vm2, 1.0, %v2043_v39  ;;  %v211_v27 = vsel %vm205_vm2, %v210_v1, 0.0  ;;  %v224_v28 = vsel %vm205_vm2, %v203_v8, %v143_v60  ;;  %v280_v18 = vmul.f32 %v1829_v19, %v279_v57  ;;  %vm2400_vm3 = vmand %vm2378_vm0, %vm208_vm1  ;;  %s503_s2 = sadd.s32 6, %s2356_s13  ;;  %s2418_s25 = smul.u32 10, %s573_s16 }
  0x69   : > { %229 = vadd.xlane.f32.xlu0 %v1567_v26  ;;  %v213_v29 = vmul.f32 %v212_v33, %v211_v27  ;;  %v216_v30 = vmul.f32 %v215_v53, %v211_v27  ;;  %v219_v31 = vmul.f32 %v218_v54, %v211_v27  ;;  %v222_v32 = vmul.f32 %v221_v55, %v211_v27  ;;  %s3512_s1 = sadd.s32 9, %s2273_s15  ;;  %s505_s19 = sadd.s32 7, %s2356_s13 }
  0x6a   : > { %v225_v34 = vsub.f32 0.0, %v224_v28  ;;  %v281_v35 = vmin.f32 %v280_v18, 0.99  ;;  %s2422_s11 = sld [smem:[#allocation3 + %s3512_s1]]  ;;  %v438_v44 = vadd.f32 %v437_v36, %v434_v24  ;;  %v511_v47 = vstv %s2372_s28  ;;  %s578_s28 = sadd.s32 2, %s2418_s25 }
  0x6b   : > { %v214_v33 = vadd.f32 %v213_v29, %v131_v13  ;;  %v217_v38 = vadd.f32 %v216_v30, %v134_v15  ;;  %v220_v40 = vadd.f32 %v219_v31, %v137_v22  ;;  %v223_v41 = vadd.f32 %v222_v32, %v140_v23  ;;  %s2427_s6 = sld [smem:[#allocation3 + %s501_s14]]  ;;  %s576_s14 = sadd.s32 1, %s2418_s25 }
  0x6c   : > { %v226_v42 = vsel %vm2400_vm3, %v225_v34, %v224_v28  ;;  %vm283_vm4 = vcmp.ge.f32.partialorder %v281_v35, 0.003921569  ;;  %v285_v43 = vsub.f32 1.0, %v281_v35  ;;  %s2430_s15 = sld [smem:[#allocation3 + %s503_s2]]  ;;  %v2439_v49 = vadd.f32 %v441_v37, %v438_v44  ;;  %s509_s2 = sadd.s32 9, %s2356_s13 }
  0x6d   : > { %vm289_vm5 = vcmp.gt.f32.partialorder %v226_v42, 0.0  ;;  %v293_v45 = vmul.f32 %v281_v35, %v226_v42  ;;  %vm2435_vm6 = vmand %vm282_vm14, %vm283_vm4  ;;  %s2441_s16 = sld [smem:[#allocation3 + %s505_s19]]  ;;  %v512_v50 = vsub.f32 %v511_v47, %v2094_v11  ;;  %v513_v52 = vstv %s2382_s18  ;;  %s507_s18 = sadd.s32 8, %s2356_s13 }
  0x6e   : > { %v286_v48 = vmul.f32 %v285_v43, %v226_v42  ;;  %v362_v53 = vstv %s2250_s20  ;;  %v514_v54 = vsub.f32 %v513_v52, %v2091_v9  ;;  %v515_v55 = vstv %s2390_s24  ;;  %s2451_s3 = sld [smem:[#allocation3 + %s2418_s25]]  ;;  %vm2457_vm8 = vmand %vm2435_vm6, %vm289_vm5  ;;  %s582_s24 = sadd.s32 4, %s2418_s25 }
  0x6f   : > { %v518_v56 = vstv %s2412_s12  ;;  %v443_v57 = vmul.f32 1.442695, %v2439_v49  ;;  %v516_v60 = vmul.f32 %v515_v55, %v512_v50  ;;  %v523_v2 = vstv %s2394_s21  ;;  %s2466_s20 = sld [smem:[#allocation3 + %s576_s14]]  ;;  %s580_s12 = sadd.s32 3, %s2418_s25 }
  0x70   : > { %vm287_vm7 = vcmp.ge.f32.partialorder %v286_v48, 0.0001  ;;  %vm291_vm9 = vcmp.lt.f32.partialorder %v286_v48, 0.0001  ;;  %v519_v0 = vmul.f32 %v518_v56, %v514_v54  ;;  %v522_v1 = vmul.f32 %v514_v54, %v512_v50  ;;  %s2484_s21 = sld [smem:[#allocation3 + %s578_s28]]  ;;  %s656_s23 = sadd.s32 7, %s2142_s8 }
  0x71   : > { %v1831_v63 = vpop.eup %1830  ;;  %vm288_vm10 = vmand %vm2435_vm6, %vm287_vm7  ;;  %1832 = vpow2.f32 %v443_v57  ;;  %v517_v20 = vmul.f32 %v516_v60, %v512_v50  ;;  %s2488_s1 = sld [smem:[#allocation3 + %s582_s24]]  ;;  %s584_s13 = sadd.s32 5, %s2418_s25  ;;  %v381_v18 = vstv %s2262_s27  ;;  %v387_v30 = vstv %s2284_s5 }
  0x72   : > { %v1569_v3 = vsel %vm288_vm10, 1.0, %v2043_v39  ;;  %v294_v4 = vsel %vm288_vm10, %v293_v45, 0.0  ;;  %v307_v5 = vsel %vm288_vm10, %v286_v48, %v226_v42  ;;  %v363_v6 = vmul.f32 %v1831_v63, %v362_v53  ;;  %vm2474_vm12 = vmand %vm2457_vm8, %vm291_vm9  ;;  %s2490_s30 = sld [smem:[#allocation3 + %s507_s18]]  ;;  %s586_s14 = sadd.s32 6, %s2418_s25 }
  0x73   : > { %312 = vadd.xlane.f32.xlu1 %v1569_v3  ;;  %v296_v10 = vmul.f32 %v295_v58, %v294_v4  ;;  %v299_v12 = vmul.f32 %v298_v61, %v294_v4  ;;  %v302_v13 = vmul.f32 %v301_v62, %v294_v4  ;;  %v305_v15 = vmul.f32 %v304_v46, %v294_v4  ;;  %s2495_s17 = sld [smem:[#allocation3 + %s580_s12]]  ;;  %s2510_s28 = smul.u32 10, %s656_s23 }
  0x74   : > { %v308_v51 = vsub.f32 0.0, %v307_v5  ;;  %v364_v16 = vmin.f32 %v363_v6, 0.99  ;;  %v520_v23 = vmul.f32 %v519_v0, %v514_v54  ;;  %s2499_s19 = sld [smem:[#allocation3 + %s509_s2]]  ;;  %v524_v26 = vmul.f32 %v523_v2, %v522_v1  ;;  %s588_s18 = sadd.s32 7, %s2418_s25 }
  0x75   : > { %v297_v21 = vadd.f32 %v296_v10, %v214_v33  ;;  %v300_v58 = vadd.f32 %v299_v12, %v217_v38  ;;  %v303_v19 = vadd.f32 %v302_v13, %v220_v40  ;;  %v306_v61 = vadd.f32 %v305_v15, %v223_v41  ;;  %s2514_s22 = sld [smem:[#allocation3 + %s584_s13]]  ;;  %s659_s27 = sadd.s32 1, %s2510_s28 }
  0x76   : > { %v309_v62 = vsel %vm2474_vm12, %v308_v51, %v307_v5  ;;  %vm366_vm13 = vcmp.ge.f32.partialorder %v364_v16, 0.003921569  ;;  %v368_v22 = vsub.f32 1.0, %v364_v16  ;;  %v521_v29 = vadd.f32 %v520_v23, %v517_v20  ;;  %s2523_s4 = sld [smem:[#allocation3 + %s2510_s28]]  ;;  %s590_s12 = sadd.s32 8, %s2418_s25 }
  0x77   : > { %v376_v24 = vmul.f32 %v364_v16, %v309_v62  ;;  %vm2503_vm14 = vmand %vm365_vm11, %vm366_vm13  ;;  %v445_v31 = vstv %s2338_s26  ;;  %v594_v59 = vstv %s2451_s3  ;;  %v596_v32 = vstv %s2466_s20  ;;  %s2531_s5 = sld [smem:[#allocation3 + %s659_s27]]  ;;  %s661_s26 = sadd.s32 2, %s2510_s28 }
  0x78   : > { %v369_v28 = vmul.f32 %v368_v22, %v309_v62  ;;  %vm372_vm0 = vcmp.gt.f32.partialorder %v309_v62, 0.0  ;;  %v2519_v34 = vadd.f32 %v524_v26, %v521_v29  ;;  %v595_v35 = vsub.f32 %v594_v59, %v2094_v11  ;;  %s2536_s3 = sld [smem:[#allocation3 + %s661_s26]]  ;;  %s663_s20 = sadd.s32 3, %s2510_s28 }
  0x79   : > { %v597_v36 = vsub.f32 %v596_v32, %v2091_v9  ;;  %v598_v37 = vstv %s2484_s21  ;;  %v601_v33 = vstv %s2488_s1  ;;  %vm2542_vm3 = vmand %vm2503_vm14, %vm372_vm0  ;;  %s2548_s24 = sld [smem:[#allocation3 + %s586_s14]]  ;;  %s665_s21 = sadd.s32 4, %s2510_s28  ;;  %v606_v50 = vstv %s2495_s17 }
  0x7a   : > { %vm370_vm15 = vcmp.ge.f32.partialorder %v369_v28, 0.0001  ;;  %vm374_vm2 = vcmp.lt.f32.partialorder %v369_v28, 0.0001  ;;  %v526_v42 = vmul.f32 1.442695, %v2519_v34  ;;  %v599_v48 = vmul.f32 %v598_v37, %v595_v35 }
  0x7b   : > { %vm371_vm1 = vmand %vm2503_vm14, %vm370_vm15  ;;  %s2553_s2 = sld [smem:[#allocation3 + %s665_s21]]  ;;  %s592_s1 = sadd.s32 9, %s2418_s25  ;;  %v602_v57 = vmul.f32 %v601_v33, %v597_v36  ;;  %v605_v60 = vmul.f32 %v597_v36, %v595_v35  ;;  %v461_v0 = vstv %s2345_s9  ;;  %v464_v1 = vstv %s2349_s10 }
  0x7c   : > { %v1571_v38 = vsel %vm371_vm1, 1.0, %v2043_v39  ;;  %v377_v40 = vsel %vm371_vm1, %v376_v24, 0.0  ;;  %v390_v41 = vsel %vm371_vm1, %v369_v28, %v309_v62  ;;  %1834 = vpow2.f32 %v526_v42  ;;  %s2564_s23 = sld [smem:[#allocation3 + %s663_s20]]  ;;  %vm2569_vm4 = vmand %vm2542_vm3, %vm374_vm2  ;;  %s739_s13 = sadd.s32 8, %s2142_s8 }
  0x7d   : > { %395 = vadd.xlane.f32.xlu1 %v1571_v38  ;;  %v379_v44 = vmul.f32 %v378_v25, %v377_v40  ;;  %v382_v45 = vmul.f32 %v381_v18, %v377_v40  ;;  %v385_v46 = vmul.f32 %v384_v17, %v377_v40  ;;  %v388_v47 = vmul.f32 %v387_v30, %v377_v40  ;;  %s2575_s17 = sld [smem:[#allocation3 + %s588_s18]]  ;;  %s667_s27 = sadd.s32 5, %s2510_s28 }
  0x7e   : > { %v391_v7 = vsub.f32 0.0, %v390_v41  ;;  %v600_v14 = vmul.f32 %v599_v48, %v595_v35  ;;  %v1833_v63 = vpop.eup %1832  ;;  %s2580_s14 = sld [smem:[#allocation3 + %s590_s12]]  ;;  %v467_v3 = vstv %s2351_s29  ;;  %v603_v4 = vmul.f32 %v602_v57, %v597_v36  ;;  %s669_s18 = sadd.s32 6, %s2510_s28 }
  0x7f   : > { %v2555_v52 = vadd.f32 %v379_v44, %v297_v21  ;;  %v2557_v53 = vadd.f32 %v382_v45, %v300_v58  ;;  %v2559_v54 = vadd.f32 %v385_v46, %v303_v19  ;;  %v2561_v55 = vadd.f32 %v388_v47, %v306_v61  ;;  %s2584_s25 = sld [smem:[#allocation3 + %s592_s1]]  ;;  %s2592_s26 = smul.u32 10, %s739_s13 }
  0x80   : > { %v446_v2 = vmul.f32 %v1833_v63, %v445_v31  ;;  %v607_v5 = vmul.f32 %v606_v50, %v605_v60  ;;  %v392_v6 = vsel %vm2569_vm4, %v391_v7, %v390_v41  ;;  %v677_v8 = vstv %s2523_s4  ;;  %s2594_s20 = sld [smem:[#allocation3 + %s667_s27]]  ;;  %s671_s21 = sadd.s32 7, %s2510_s28 }
  0x81   : > { %v679_v10 = vstv %s2531_s5  ;;  %v681_v12 = vstv %s2536_s3  ;;  %v604_v15 = vadd.f32 %v603_v4, %v600_v14  ;;  %v678_v51 = vsub.f32 %v677_v8, %v2094_v11  ;;  %s2603_s4 = sld [smem:[#allocation3 + %s2592_s26]]  ;;  %s742_s3 = sadd.s32 1, %s2592_s26 }
  0x82   : > { %v447_v13 = vmin.f32 %v446_v2, 0.99  ;;  %v680_v16 = vsub.f32 %v679_v10, %v2091_v9  ;;  %vm448_vm5 = vcmp.le.f32.partialorder %v2439_v49, 0.0  ;;  %vm455_vm6 = vcmp.gt.f32.partialorder %v392_v6, 0.0  ;;  %s2607_s5 = sld [smem:[#allocation3 + %s669_s18]]  ;;  %s748_s1 = sadd.s32 4, %s2592_s26 }
  0x83   : > { %v470_v20 = vstv %s2422_s11  ;;  %v684_v21 = vstv %s2553_s2  ;;  %v2605_v61 = vadd.f32 %v607_v5, %v604_v15  ;;  %s2610_s12 = sld [smem:[#allocation3 + %s671_s21]]  ;;  %v682_v62 = vmul.f32 %v681_v12, %v678_v51  ;;  %s744_s11 = sadd.s32 2, %s2592_s26 }
  0x84   : > { %vm449_vm7 = vcmp.ge.f32.partialorder %v447_v13, 0.003921569  ;;  %v451_v58 = vsub.f32 1.0, %v447_v13  ;;  %v459_v19 = vmul.f32 %v447_v13, %v392_v6  ;;  %v685_v22 = vmul.f32 %v684_v21, %v680_v16  ;;  %s673_s2 = sadd.s32 8, %s2510_s28  ;;  %s675_s13 = sadd.s32 9, %s2510_s28 }
  0x85   : > { %v688_v23 = vmul.f32 %v680_v16, %v678_v51  ;;  %v689_v24 = vstv %s2564_s23  ;;  %vm2616_vm8 = vmand %vm448_vm5, %vm449_vm7  ;;  %v528_v27 = vstv %s2427_s6  ;;  %v544_v28 = vstv %s2430_s15  ;;  %s2628_s23 = sld [smem:[#allocation3 + %s742_s3]]  ;;  %s746_s27 = sadd.s32 3, %s2592_s26 }
  0x86   : > { %v452_v26 = vmul.f32 %v451_v58, %v392_v6  ;;  %v609_v18 = vmul.f32 1.442695, %v2605_v61  ;;  %v547_v17 = vstv %s2441_s16  ;;  %v550_v29 = vstv %s2490_s30  ;;  %vm2633_vm10 = vmand %vm2616_vm8, %vm455_vm6  ;;  %s2637_s6 = sld [smem:[#allocation3 + %s744_s11]]  ;;  %s822_s21 = sadd.s32 9, %s2142_s8 }
  0x87   : > { %v683_v30 = vmul.f32 %v682_v62, %v678_v51  ;;  %v686_v31 = vmul.f32 %v685_v22, %v680_v16  ;;  %v690_v59 = vmul.f32 %v689_v24, %v688_v23  ;;  %vm531_vm13 = vcmp.le.f32.partialorder %v2519_v34, 0.0  ;;  %s2644_s18 = sld [smem:[#allocation3 + %s748_s1]]  ;;  %s750_s11 = sadd.s32 5, %s2592_s26 }
  0x88   : > { %vm453_vm9 = vcmp.ge.f32.partialorder %v452_v26, 0.0001  ;;  %vm457_vm11 = vcmp.lt.f32.partialorder %v452_v26, 0.0001  ;;  %1836 = vpow2.f32 %v609_v18  ;;  %v553_v35 = vstv %s2499_s19  ;;  %s2649_s3 = sld [smem:[#allocation3 + %s673_s2]]  ;;  %s2674_s9 = smul.u32 10, %s822_s21 }
  0x89   : > { %v1835_v32 = vpop.eup %1834  ;;  %vm454_vm12 = vmand %vm2616_vm8, %vm453_vm9  ;;  %v687_v36 = vadd.f32 %v686_v31, %v683_v30  ;;  %v760_v37 = vstv %s2603_s4  ;;  %s2665_s4 = sld [smem:[#allocation3 + %s746_s27]]  ;;  %s752_s29 = sadd.s32 6, %s2592_s26  ;;  %v627_v5 = vstv %s2548_s24  ;;  %v633_v12 = vstv %s2580_s14 }
  0x8a   : > { %v1573_v33 = vsel %vm454_vm12, 1.0, %v2043_v39  ;;  %v460_v38 = vsel %vm454_vm12, %v459_v19, 0.0  ;;  %v473_v40 = vsel %vm454_vm12, %v452_v26, %v392_v6  ;;  %v529_v41 = vmul.f32 %v1835_v32, %v528_v27  ;;  %vm2655_vm14 = vmand %vm2633_vm10, %vm457_vm11  ;;  %s2669_s2 = sld [smem:[#allocation3 + %s675_s13]]  ;;  %s825_s1 = sadd.s32 1, %s2674_s9 }
  0x8b   : > { %478 = vadd.xlane.f32.xlu0 %v1573_v33  ;;  %v462_v43 = vmul.f32 %v461_v0, %v460_v38  ;;  %v465_v44 = vmul.f32 %v464_v1, %v460_v38  ;;  %v468_v45 = vmul.f32 %v467_v3, %v460_v38  ;;  %v471_v46 = vmul.f32 %v470_v20, %v460_v38  ;;  %s2688_s10 = sld [smem:[#allocation3 + %s750_s11]]  ;;  %s827_s13 = sadd.s32 2, %s2674_s9 }
  0x8c   : > { %v474_v47 = vsub.f32 0.0, %v473_v40  ;;  %v530_v7 = vmin.f32 %v529_v41, 0.99  ;;  %v2671_v48 = vadd.f32 %v690_v59, %v687_v36  ;;  %v761_v50 = vsub.f32 %v760_v37, %v2094_v11  ;;  %s2695_s28 = sld [smem:[#allocation3 + %s2674_s9]]  ;;  %s831_s21 = sadd.s32 4, %s2674_s9 }
  0x8d   : > { %v2677_v56 = vadd.f32 %v462_v43, %v2555_v52  ;;  %v2680_v14 = vadd.f32 %v465_v44, %v2557_v53  ;;  %v2683_v57 = vadd.f32 %v468_v45, %v2559_v54  ;;  %v2686_v60 = vadd.f32 %v471_v46, %v2561_v55  ;;  %s2709_s27 = sld [smem:[#allocation3 + %s825_s1]]  ;;  %s754_s11 = sadd.s32 7, %s2592_s26 }
  0x8e   : > { %v475_v63 = vsel %vm2655_vm14, %v474_v47, %v473_v40  ;;  %vm532_vm15 = vcmp.ge.f32.partialorder %v530_v7, 0.003921569  ;;  %v534_v52 = vsub.f32 1.0, %v530_v7  ;;  %v692_v53 = vmul.f32 1.442695, %v2671_v48  ;;  %s905_s1 = sadd.s32 10, %s2142_s8 }
  0x8f   : > { %vm538_vm0 = vcmp.gt.f32.partialorder %v475_v63, 0.0  ;;  %v542_v54 = vmul.f32 %v530_v7, %v475_v63  ;;  %v611_v55 = vstv %s2514_s22  ;;  %v762_v0 = vstv %s2628_s23  ;;  %vm2703_vm1 = vmand %vm531_vm13, %vm532_vm15  ;;  %s829_s22 = sadd.s32 3, %s2674_s9  ;;  %s2715_s23 = sld [smem:[#allocation3 + %s827_s13]] }
  0x90   : > { %v535_v2 = vmul.f32 %v534_v52, %v475_v63  ;;  %1838 = vpow2.f32 %v692_v53  ;;  %v763_v3 = vsub.f32 %v762_v0, %v2091_v9  ;;  %v764_v4 = vstv %s2637_s6  ;;  %vm2721_vm3 = vmand %vm2703_vm1, %vm538_vm0  ;;  %s2726_s6 = sld [smem:[#allocation3 + %s752_s29]]  ;;  %s756_s29 = sadd.s32 8, %s2592_s26 }
  0x91   : > { %v630_v6 = vstv %s2575_s17  ;;  %v765_v8 = vmul.f32 %v764_v4, %v761_v50  ;;  %v767_v34 = vstv %s2644_s18  ;;  %v636_v51 = vstv %s2584_s25  ;;  %s2733_s18 = sld [smem:[#allocation3 + %s831_s21]]  ;;  %s758_s21 = sadd.s32 9, %s2592_s26 }
  0x92   : > { %vm536_vm2 = vcmp.ge.f32.partialorder %v535_v2, 0.0001  ;;  %v768_v13 = vmul.f32 %v767_v34, %v763_v3  ;;  %v771_v15 = vmul.f32 %v763_v3, %v761_v50  ;;  %vm540_vm5 = vcmp.lt.f32.partialorder %v535_v2, 0.0001  ;;  %s2738_s13 = sld [smem:[#allocation3 + %s829_s22]]  ;;  %s833_s15 = sadd.s32 5, %s2674_s9 }
  0x93   : > { %vm537_vm4 = vmand %vm2703_vm1, %vm536_vm2  ;;  %v766_v16 = vmul.f32 %v765_v8, %v761_v50  ;;  %v772_v20 = vstv %s2665_s4  ;;  %s2748_s4 = sld [smem:[#allocation3 + %s754_s11]]  ;;  %s2759_s16 = smul.u32 10, %s905_s1  ;;  %vm614_vm7 = vcmp.le.f32.partialorder %v2605_v61, 0.0  ;;  %v843_v33 = vstv %s2695_s28 }
  0x94   : > { %v1575_v21 = vsel %vm537_vm4, 1.0, %v2043_v39  ;;  %v543_v58 = vsel %vm537_vm4, %v542_v54, 0.0  ;;  %v556_v19 = vsel %vm537_vm4, %v535_v2, %v475_v63  ;;  %v769_v62 = vmul.f32 %v768_v13, %v763_v3  ;;  %vm2754_vm6 = vmand %vm2721_vm3, %vm540_vm5  ;;  %s2773_s30 = sld [smem:[#allocation3 + %s756_s29]]  ;;  %s835_s26 = sadd.s32 6, %s2674_s9 }
  0x95   : > { %v1837_v22 = vpop.eup %1836  ;;  %561 = vadd.xlane.f32.xlu1 %v1575_v21  ;;  %v545_v23 = vmul.f32 %v544_v28, %v543_v58  ;;  %v548_v24 = vmul.f32 %v547_v17, %v543_v58  ;;  %v551_v25 = vmul.f32 %v550_v29, %v543_v58  ;;  %v554_v26 = vmul.f32 %v553_v35, %v543_v58  ;;  %s2777_s19 = sld [smem:[#allocation3 + %s758_s21]]  ;;  %s910_s28 = sadd.s32 2, %s2759_s16 }
  0x96   : > { %v557_v18 = vsub.f32 0.0, %v556_v19  ;;  %v612_v28 = vmul.f32 %v1837_v22, %v611_v55  ;;  %v770_v30 = vadd.f32 %v769_v62, %v766_v16  ;;  %v773_v17 = vmul.f32 %v772_v20, %v771_v15  ;;  %s2784_s22 = sld [smem:[#allocation3 + %s833_s15]]  ;;  %s914_s1 = sadd.s32 4, %s2759_s16 }
  0x97   : > { %v2762_v29 = vadd.f32 %v545_v23, %v2677_v56  ;;  %v2765_v31 = vadd.f32 %v548_v24, %v2680_v14  ;;  %v2768_v49 = vadd.f32 %v551_v25, %v2683_v57  ;;  %v2771_v59 = vadd.f32 %v554_v26, %v2686_v60  ;;  %s2791_s11 = sld [smem:[#allocation3 + %s835_s26]]  ;;  %s837_s21 = sadd.s32 7, %s2674_s9 }
  0x98   : > { %v613_v32 = vmin.f32 %v612_v28, 0.99  ;;  %v694_v35 = vstv %s2594_s20  ;;  %v2779_v36 = vadd.f32 %v773_v17, %v770_v30  ;;  %v558_v37 = vsel %vm2754_vm6, %v557_v18, %v556_v19  ;;  %s908_s20 = sadd.s32 1, %s2759_s16  ;;  %s2821_s29 = sld [smem:[#allocation3 + %s910_s28]] }
  0x99   : > { %v845_v38 = vstv %s2709_s27  ;;  %v847_v40 = vstv %s2715_s23  ;;  %vm621_vm9 = vcmp.gt.f32.partialorder %v558_v37, 0.0  ;;  %v844_v44 = vsub.f32 %v843_v33, %v2094_v11  ;;  %s2806_s27 = sld [smem:[#allocation3 + %s2759_s16]]  ;;  %s912_s23 = sadd.s32 3, %s2759_s16 }
  0x9a   : > { %vm615_vm8 = vcmp.ge.f32.partialorder %v613_v32, 0.003921569  ;;  %v617_v41 = vsub.f32 1.0, %v613_v32  ;;  %v625_v42 = vmul.f32 %v613_v32, %v558_v37  ;;  %v775_v43 = vmul.f32 1.442695, %v2779_v36  ;;  %s2828_s15 = sld [smem:[#allocation3 + %s912_s23]] }
  0x9b   : > { %v846_v45 = vsub.f32 %v845_v38, %v2091_v9  ;;  %v850_v46 = vstv %s2733_s18  ;;  %vm2799_vm10 = vmand %vm614_vm7, %vm615_vm8  ;;  %v710_v50 = vstv %s2607_s5  ;;  %v855_v56 = vstv %s2738_s13  ;;  %s2810_s18 = sld [smem:[#allocation3 + %s908_s20]]  ;;  %s988_s13 = sadd.s32 11, %s2142_s8 }
  0x9c   : > { %v618_v7 = vmul.f32 %v617_v41, %v558_v37  ;;  %1840 = vpow2.f32 %v775_v43  ;;  %v713_v57 = vstv %s2610_s12  ;;  %v848_v60 = vmul.f32 %v847_v40, %v844_v44  ;;  %vm2816_vm12 = vmand %vm2799_vm10, %vm621_vm9  ;;  %s839_s26 = sadd.s32 8, %s2674_s9  ;;  %s2832_s20 = sld [smem:[#allocation3 + %s914_s1]] }
  0x9d   : > { %v1839_v14 = vpop.eup %1838  ;;  %v851_v63 = vmul.f32 %v850_v46, %v846_v45  ;;  %v854_v52 = vmul.f32 %v846_v45, %v844_v44  ;;  %v716_v54 = vstv %s2649_s3  ;;  %vm697_vm15 = vcmp.le.f32.partialorder %v2671_v48, 0.0  ;;  %s841_s28 = sadd.s32 9, %s2674_s9  ;;  %s2850_s23 = smul.u32 10, %s988_s13 }
  0x9e   : > { %vm619_vm11 = vcmp.ge.f32.partialorder %v618_v7, 0.0001  ;;  %vm623_vm13 = vcmp.lt.f32.partialorder %v618_v7, 0.0001  ;;  %v695_v53 = vmul.f32 %v1839_v14, %v694_v35  ;;  %v849_v55 = vmul.f32 %v848_v60, %v844_v44  ;;  %s2852_s1 = sld [smem:[#allocation3 + %s837_s21]]  ;;  %s916_s24 = sadd.s32 5, %s2759_s16 }
  0x9f   : > { %vm620_vm14 = vmand %vm2799_vm10, %vm619_vm11  ;;  %v852_v0 = vmul.f32 %v851_v63, %v846_v45  ;;  %v856_v1 = vmul.f32 %v855_v56, %v854_v52  ;;  %s2859_s17 = sld [smem:[#allocation3 + %s839_s26]]  ;;  %v719_v62 = vstv %s2669_s2  ;;  %v926_v23 = vstv %s2806_s27  ;;  %s991_s25 = sadd.s32 1, %s2850_s23 }
  0xa0   : > { %v1577_v2 = vsel %vm620_vm14, 1.0, %v2043_v39  ;;  %v626_v3 = vsel %vm620_vm14, %v625_v42, 0.0  ;;  %v639_v4 = vsel %vm620_vm14, %v618_v7, %v558_v37  ;;  %v696_v8 = vmin.f32 %v695_v53, 0.99  ;;  %vm2837_vm0 = vmand %vm2816_vm12, %vm623_vm13  ;;  %s2864_s14 = sld [smem:[#allocation3 + %s841_s28]]  ;;  %s993_s9 = sadd.s32 2, %s2850_s23 }
  0xa1   : > { %644 = vadd.xlane.f32.xlu0 %v1577_v2  ;;  %v628_v10 = vmul.f32 %v627_v5, %v626_v3  ;;  %v631_v13 = vmul.f32 %v630_v6, %v626_v3  ;;  %v634_v15 = vmul.f32 %v633_v12, %v626_v3  ;;  %v637_v16 = vmul.f32 %v636_v51, %v626_v3  ;;  %s2877_s2 = sld [smem:[#allocation3 + %s916_s24]]  ;;  %s995_s13 = sadd.s32 3, %s2850_s23 }
  0xa2   : > { %v640_v20 = vsub.f32 0.0, %v639_v4  ;;  %vm698_vm1 = vcmp.ge.f32.partialorder %v696_v8, 0.003921569  ;;  %v700_v21 = vsub.f32 1.0, %v696_v8  ;;  %v853_v58 = vadd.f32 %v852_v0, %v849_v55  ;;  %s2886_s27 = sld [smem:[#allocation3 + %s2850_s23]]  ;;  %s1071_s21 = sadd.s32 12, %s2142_s8 }
  0xa3   : > { %v629_v5 = vadd.f32 %v628_v10, %v2762_v29  ;;  %v632_v6 = vadd.f32 %v631_v13, %v2765_v31  ;;  %v635_v12 = vadd.f32 %v634_v15, %v2768_v49  ;;  %v638_v51 = vadd.f32 %v637_v16, %v2771_v59  ;;  %vm2873_vm2 = vmand %vm697_vm15, %vm698_vm1  ;;  %s920_s5 = sadd.s32 7, %s2759_s16  ;;  %s2934_s12 = sld [smem:[#allocation3 + %s995_s13]] }
  0xa4   : > { %v641_v19 = vsel %vm2837_vm0, %v640_v20, %v639_v4  ;;  %v2866_v22 = vadd.f32 %v856_v1, %v853_v58  ;;  %v927_v27 = vsub.f32 %v926_v23, %v2094_v11  ;;  %v777_v18 = vstv %s2688_s10  ;;  %s2896_s10 = sld [smem:[#allocation3 + %s991_s25]]  ;;  %s2936_s3 = smul.u32 10, %s1071_s21 }
  0xa5   : > { %v701_v25 = vmul.f32 %v700_v21, %v641_v19  ;;  %vm704_vm3 = vcmp.gt.f32.partialorder %v641_v19, 0.0  ;;  %v708_v26 = vmul.f32 %v696_v8, %v641_v19  ;;  %v928_v30 = vstv %s2810_s18  ;;  %s997_s18 = sadd.s32 4, %s2850_s23  ;;  %s2946_s24 = sld [smem:[#allocation3 + %s920_s5]] }
  0xa6   : > { %v858_v28 = vmul.f32 1.442695, %v2866_v22  ;;  %v930_v48 = vstv %s2821_s29  ;;  %vm2890_vm5 = vmand %vm2873_vm2, %vm704_vm3  ;;  %v793_v29 = vstv %s2726_s6  ;;  %v929_v31 = vsub.f32 %v928_v30, %v2091_v9  ;;  %s2903_s29 = sld [smem:[#allocation3 + %s993_s9]]  ;;  %s1074_s25 = sadd.s32 1, %s2936_s3 }
  0xa7   : > { %vm702_vm4 = vcmp.ge.f32.partialorder %v701_v25, 0.0001  ;;  %v931_v49 = vmul.f32 %v930_v48, %v927_v27  ;;  %vm706_vm7 = vcmp.lt.f32.partialorder %v701_v25, 0.0001  ;;  %v933_v59 = vstv %s2832_s20  ;;  %s2915_s26 = sld [smem:[#allocation3 + %s997_s18]]  ;;  %s922_s20 = sadd.s32 8, %s2759_s16 }
  0xa8   : > { %vm703_vm6 = vmand %vm2873_vm2, %vm702_vm4  ;;  %1842 = vpow2.f32 %v858_v28  ;;  %v938_v32 = vstv %s2828_s15  ;;  %s918_s15 = sadd.s32 6, %s2759_s16  ;;  %v934_v7 = vmul.f32 %v933_v59, %v929_v31  ;;  %v796_v52 = vstv %s2748_s4  ;;  %s2949_s4 = sld [smem:[#allocation3 + %s922_s20]] }
  0xa9   : > { %v1841_v35 = vpop.eup %1840  ;;  %v1579_v37 = vsel %vm703_vm6, 1.0, %v2043_v39  ;;  %v709_v33 = vsel %vm703_vm6, %v708_v26, 0.0  ;;  %v722_v38 = vsel %vm703_vm6, %v701_v25, %v641_v19  ;;  %v932_v40 = vmul.f32 %v931_v49, %v927_v27  ;;  %vm2920_vm8 = vmand %vm2890_vm5, %vm706_vm7  ;;  %s2939_s28 = sld [smem:[#allocation3 + %s918_s15]]  ;;  %s1076_s9 = sadd.s32 2, %s2936_s3 }
  0xaa   : > { %727 = vadd.xlane.f32.xlu1 %v1579_v37  ;;  %v711_v41 = vmul.f32 %v710_v50, %v709_v33  ;;  %v714_v42 = vmul.f32 %v713_v57, %v709_v33  ;;  %v717_v43 = vmul.f32 %v716_v54, %v709_v33  ;;  %v720_v44 = vmul.f32 %v719_v62, %v709_v33  ;;  %s2976_s18 = sld [smem:[#allocation3 + %s1076_s9]]  ;;  %s999_s21 = sadd.s32 5, %s2850_s23 }
  0xab   : > { %v723_v46 = vsub.f32 0.0, %v722_v38  ;;  %v778_v47 = vmul.f32 %v1841_v35, %v777_v18  ;;  %v937_v50 = vmul.f32 %v929_v31, %v927_v27  ;;  %v935_v61 = vmul.f32 %v934_v7, %v929_v31  ;;  %s1001_s15 = sadd.s32 6, %s2850_s23  ;;  %s3027_s20 = sld [smem:[#allocation3 + %s999_s21]] }
  0xac   : > { %v2926_v56 = vadd.f32 %v711_v41, %v629_v5  ;;  %v2928_v14 = vadd.f32 %v714_v42, %v632_v6  ;;  %v2930_v57 = vadd.f32 %v717_v43, %v635_v12  ;;  %v2932_v60 = vadd.f32 %v720_v44, %v638_v51 }
  0xad   : > { %v779_v63 = vmin.f32 %v778_v47, 0.99  ;;  %v939_v53 = vmul.f32 %v938_v32, %v937_v50  ;;  %v724_v54 = vsel %vm2920_vm8, %v723_v46, %v722_v38  ;;  %vm780_vm9 = vcmp.le.f32.partialorder %v2779_v36, 0.0 }
  0xae   : > { %v799_v55 = vstv %s2773_s30  ;;  %v802_v0 = vstv %s2777_s19  ;;  %v936_v3 = vadd.f32 %v935_v61, %v932_v40  ;;  %vm787_vm11 = vcmp.gt.f32.partialorder %v724_v54, 0.0  ;;  %s2956_s30 = sld [smem:[#allocation3 + %s2936_s3]] }
  0xaf   : > { %vm781_vm10 = vcmp.ge.f32.partialorder %v779_v63, 0.003921569  ;;  %v783_v1 = vsub.f32 1.0, %v779_v63  ;;  %v791_v2 = vmul.f32 %v779_v63, %v724_v54  ;;  %v1009_v4 = vstv %s2886_s27  ;;  %s2968_s19 = sld [smem:[#allocation3 + %s1074_s25]]  ;;  %s1080_s27 = sadd.s32 4, %s2936_s3 }
  0xb0   : > { %v1011_v8 = vstv %s2896_s10  ;;  %v1013_v34 = vstv %s2903_s29  ;;  %vm2960_vm12 = vmand %vm780_vm9, %vm781_vm10  ;;  %v2964_v15 = vadd.f32 %v939_v53, %v936_v3  ;;  %v1010_v16 = vsub.f32 %v1009_v4, %v2094_v11  ;;  %s924_s10 = sadd.s32 9, %s2759_s16  ;;  %s2990_s16 = sld [smem:[#allocation3 + %s1080_s27]] }
  0xb1   : > { %v784_v13 = vmul.f32 %v783_v1, %v724_v54  ;;  %v1012_v20 = vsub.f32 %v1011_v8, %v2091_v9  ;;  %v860_v21 = vstv %s2784_s22  ;;  %v876_v58 = vstv %s2791_s11  ;;  %vm2981_vm14 = vmand %vm2960_vm12, %vm787_vm11  ;;  %s1078_s22 = sadd.s32 3, %s2936_s3  ;;  %s1154_s29 = sadd.s32 13, %s2142_s8 }
  0xb2   : > { %v879_v5 = vstv %s2852_s1  ;;  %v1016_v36 = vstv %s2915_s26  ;;  %v941_v12 = vmul.f32 1.442695, %v2964_v15  ;;  %v1014_v51 = vmul.f32 %v1013_v34, %v1010_v16  ;;  %s3004_s13 = sld [smem:[#allocation3 + %s924_s10]]  ;;  %s1003_s26 = sadd.s32 7, %s2850_s23 }
  0xb3   : > { %vm785_vm13 = vcmp.ge.f32.partialorder %v784_v13, 0.0001  ;;  %vm789_vm15 = vcmp.lt.f32.partialorder %v784_v13, 0.0001  ;;  %v882_v19 = vstv %s2859_s17  ;;  %v1017_v62 = vmul.f32 %v1016_v36, %v1012_v20  ;;  %s3021_s6 = sld [smem:[#allocation3 + %s1078_s22]]  ;;  %s3023_s5 = smul.u32 10, %s1154_s29 }
  0xb4   : > { %vm786_vm0 = vmand %vm2960_vm12, %vm785_vm13  ;;  %v1020_v23 = vmul.f32 %v1012_v20, %v1010_v16  ;;  %v1021_v24 = vstv %s2934_s12  ;;  %1844 = vpow2.f32 %v941_v12  ;;  %v1015_v32 = vmul.f32 %v1014_v51, %v1010_v16  ;;  %s3031_s12 = sld [smem:[#allocation3 + %s1001_s15]]  ;;  %s1005_s10 = sadd.s32 8, %s2850_s23 }
  0xb5   : > { %v1843_v25 = vpop.eup %1842  ;;  %v1581_v26 = vsel %vm786_vm0, 1.0, %v2043_v39  ;;  %v792_v27 = vsel %vm786_vm0, %v791_v2, 0.0  ;;  %v805_v18 = vsel %vm786_vm0, %v784_v13, %v724_v54  ;;  %vm2998_vm1 = vmand %vm2981_vm14, %vm789_vm15  ;;  %v1018_v35 = vmul.f32 %v1017_v62, %v1012_v20  ;;  %s1157_s25 = sadd.s32 1, %s3023_s5  ;;  %s3035_s9 = sld [smem:[#allocation3 + %s1003_s26]] }
  0xb6   : > { %810 = vadd.xlane.f32.xlu0 %v1581_v26  ;;  %v794_v30 = vmul.f32 %v793_v29, %v792_v27  ;;  %v797_v48 = vmul.f32 %v796_v52, %v792_v27  ;;  %v800_v17 = vmul.f32 %v799_v55, %v792_v27  ;;  %v803_v31 = vmul.f32 %v802_v0, %v792_v27  ;;  %s1159_s27 = sadd.s32 2, %s3023_s5  ;;  %s1237_s22 = sadd.s32 14, %s2142_s8 }
  0xb7   : > { %v806_v49 = vsub.f32 0.0, %v805_v18  ;;  %v861_v59 = vmul.f32 %v1843_v25, %v860_v21  ;;  %v1019_v42 = vadd.f32 %v1018_v35, %v1015_v32  ;;  %v1022_v43 = vmul.f32 %v1021_v24, %v1020_v23  ;;  %s1007_s29 = sadd.s32 9, %s2850_s23  ;;  %s1082_s23 = sadd.s32 5, %s2936_s3 }
  0xb8   : > { %v3010_v37 = vadd.f32 %v794_v30, %v2926_v56  ;;  %v3013_v33 = vadd.f32 %v797_v48, %v2928_v14  ;;  %v3016_v29 = vadd.f32 %v800_v17, %v2930_v57  ;;  %v3019_v38 = vadd.f32 %v803_v31, %v2932_v60  ;;  %s3093_s26 = smul.u32 10, %s1237_s22  ;;  %s3102_s11 = sld [smem:[#allocation3 + %s1007_s29]] }
  0xb9   : > { %v807_v40 = vsel %vm2998_vm1, %v806_v49, %v805_v18  ;;  %v862_v41 = vmin.f32 %v861_v59, 0.99  ;;  %vm863_vm2 = vcmp.le.f32.partialorder %v2866_v22, 0.0  ;;  %v885_v44 = vstv %s2864_s14  ;;  %s3046_s14 = sld [smem:[#allocation3 + %s3023_s5]]  ;;  %s1084_s17 = sadd.s32 6, %s2936_s3 }
  0xba   : > { %vm870_vm3 = vcmp.gt.f32.partialorder %v807_v40, 0.0  ;;  %v1092_v45 = vstv %s2956_s30  ;;  %v3037_v7 = vadd.f32 %v1022_v43, %v1019_v42  ;;  %v1094_v56 = vstv %s2968_s19  ;;  %s3057_s30 = sld [smem:[#allocation3 + %s1157_s25]]  ;;  %s1163_s19 = sadd.s32 4, %s3023_s5 }
  0xbb   : > { %vm864_vm4 = vcmp.ge.f32.partialorder %v862_v41, 0.003921569  ;;  %v866_v46 = vsub.f32 1.0, %v862_v41  ;;  %v874_v47 = vmul.f32 %v862_v41, %v807_v40  ;;  %v1093_v50 = vsub.f32 %v1092_v45, %v2094_v11  ;;  %s3081_s21 = sld [smem:[#allocation3 + %s1163_s19]]  ;;  %s1240_s25 = sadd.s32 1, %s3093_s26 }
  0xbc   : > { %v1096_v14 = vstv %s2976_s18  ;;  %v1099_v57 = vstv %s2990_s16  ;;  %vm3050_vm5 = vmand %vm863_vm2, %vm864_vm4  ;;  %v943_v52 = vstv %s2877_s2  ;;  %v1024_v61 = vmul.f32 1.442695, %v3037_v7  ;;  %s3063_s18 = sld [smem:[#allocation3 + %s1159_s27]]  ;;  %s1161_s16 = sadd.s32 3, %s3023_s5 }
  0xbd   : > { %v867_v63 = vmul.f32 %v866_v46, %v807_v40  ;;  %v1095_v53 = vsub.f32 %v1094_v56, %v2091_v9  ;;  %v959_v54 = vstv %s2939_s28  ;;  %v962_v55 = vstv %s2946_s24  ;;  %vm3069_vm7 = vmand %vm3050_vm5, %vm870_vm3  ;;  %s3074_s2 = sld [smem:[#allocation3 + %s1005_s10]]  ;;  %s1242_s10 = sadd.s32 2, %s3093_s26 }
  0xbe   : > { %v965_v0 = vstv %s2949_s4  ;;  %v1097_v22 = vmul.f32 %v1096_v14, %v1093_v50  ;;  %v968_v2 = vstv %s3004_s13  ;;  %1846 = vpow2.f32 %v1024_v61  ;;  %s3084_s15 = sld [smem:[#allocation3 + %s1161_s16]]  ;;  %s1244_s22 = sadd.s32 3, %s3093_s26 }
  0xbf   : > { %vm868_vm6 = vcmp.ge.f32.partialorder %v867_v63, 0.0001  ;;  %v1100_v3 = vmul.f32 %v1099_v57, %v1095_v53  ;;  %vm872_vm9 = vcmp.lt.f32.partialorder %v867_v63, 0.0001  ;;  %v1103_v8 = vmul.f32 %v1095_v53, %v1093_v50  ;;  %s3118_s1 = sld [smem:[#allocation3 + %s1082_s23]]  ;;  %s1165_s28 = sadd.s32 5, %s3023_s5 }
  0xc0   : > { %vm869_vm8 = vmand %vm3050_vm5, %vm868_vm6  ;;  %v1098_v4 = vmul.f32 %v1097_v22, %v1093_v50  ;;  %v1104_v34 = vstv %s3021_s6  ;;  %vm946_vm11 = vcmp.le.f32.partialorder %v2964_v15, 0.0  ;;  %v1026_v28 = vstv %s3027_s20  ;;  %s1086_s6 = sadd.s32 7, %s2936_s3  ;;  %s3132_s20 = sld [smem:[#allocation3 + %s3093_s26]] }
  0xc1   : > { %v1583_v10 = vsel %vm869_vm8, 1.0, %v2043_v39  ;;  %v875_v13 = vsel %vm869_vm8, %v874_v47, 0.0  ;;  %v888_v16 = vsel %vm869_vm8, %v867_v63, %v807_v40  ;;  %v1101_v20 = vmul.f32 %v1100_v3, %v1095_v53  ;;  %v1845_v21 = vpop.eup %1844  ;;  %vm3098_vm10 = vmand %vm3069_vm7, %vm872_vm9  ;;  %s3134_s27 = sld [smem:[#allocation3 + %s1084_s17]]  ;;  %s1090_s17 = sadd.s32 9, %s2936_s3 }
  0xc2   : > { %893 = vadd.xlane.f32.xlu1 %v1583_v10  ;;  %v877_v36 = vmul.f32 %v876_v58, %v875_v13  ;;  %v880_v6 = vmul.f32 %v879_v5, %v875_v13  ;;  %v883_v12 = vmul.f32 %v882_v19, %v875_v13  ;;  %v886_v51 = vmul.f32 %v885_v44, %v875_v13  ;;  %s3152_s19 = sld [smem:[#allocation3 + %s1240_s25]] }
  0xc3   : > { %v889_v23 = vsub.f32 0.0, %v888_v16  ;;  %v944_v58 = vmul.f32 %v1845_v21, %v943_v52  ;;  %v1102_v5 = vadd.f32 %v1101_v20, %v1098_v4  ;;  %v1105_v19 = vmul.f32 %v1104_v34, %v1103_v8  ;;  %s3164_s16 = sld [smem:[#allocation3 + %s1242_s10]] }
  0xc4   : > { %v3105_v24 = vadd.f32 %v877_v36, %v3010_v37  ;;  %v3108_v25 = vadd.f32 %v880_v6, %v3013_v33  ;;  %v3111_v26 = vadd.f32 %v883_v12, %v3016_v29  ;;  %v3114_v27 = vadd.f32 %v886_v51, %v3019_v38  ;;  %s3206_s24 = sld [smem:[#allocation3 + %s1090_s17]]  ;;  %s1254_s17 = sadd.s32 8, %s3093_s26 }
  0xc5   : > { %v945_v18 = vmin.f32 %v944_v58, 0.99  ;;  %v3121_v30 = vadd.f32 %v1105_v19, %v1102_v5  ;;  %v890_v48 = vsel %vm3098_vm10, %v889_v23, %v888_v16  ;;  %v1175_v17 = vstv %s3046_s14  ;;  %s3147_s14 = sld [smem:[#allocation3 + %s1086_s6]] }
  0xc6   : > { %v1177_v31 = vstv %s3057_s30  ;;  %v1179_v49 = vstv %s3063_s18  ;;  %vm953_vm13 = vcmp.gt.f32.partialorder %v890_v48, 0.0  ;;  %v1176_v37 = vsub.f32 %v1175_v17, %v2094_v11  ;;  %s1246_s30 = sadd.s32 4, %s3093_s26  ;;  %s1320_s18 = sadd.s32 15, %s2142_s8 }
  0xc7   : > { %vm947_vm12 = vcmp.ge.f32.partialorder %v945_v18, 0.003921569  ;;  %v949_v59 = vsub.f32 1.0, %v945_v18  ;;  %v957_v32 = vmul.f32 %v945_v18, %v890_v48  ;;  %v1107_v35 = vmul.f32 1.442695, %v3121_v30  ;;  %s3170_s29 = sld [smem:[#allocation3 + %s1246_s30]] }
  0xc8   : > { %v1178_v33 = vsub.f32 %v1177_v31, %v2091_v9  ;;  %v1182_v29 = vstv %s3081_s21  ;;  %vm3142_vm14 = vmand %vm946_vm11, %vm947_vm12  ;;  %v1042_v41 = vstv %s3031_s12  ;;  %v1187_v42 = vstv %s3084_s15  ;;  %s1088_s21 = sadd.s32 8, %s2936_s3  ;;  %s3189_s15 = sld [smem:[#allocation3 + %s1244_s22]] }
  0xc9   : > { %v950_v40 = vmul.f32 %v949_v59, %v890_v48  ;;  %1848 = vpow2.f32 %v1107_v35  ;;  %v1045_v43 = vstv %s3035_s9  ;;  %v1180_v44 = vmul.f32 %v1179_v49, %v1176_v37  ;;  %vm3158_vm0 = vmand %vm3142_vm14, %vm953_vm13  ;;  %s3191_s23 = smul.u32 10, %s1320_s18  ;;  %s3202_s3 = sld [smem:[#allocation3 + %s1088_s21]] }
  0xca   : > { %v1183_v45 = vmul.f32 %v1182_v29, %v1178_v33  ;;  %v1186_v46 = vmul.f32 %v1178_v33, %v1176_v37  ;;  %v1048_v47 = vstv %s3074_s2  ;;  %v1051_v50 = vstv %s3102_s11  ;;  %s3218_s13 = sld [smem:[#allocation3 + %s1165_s28]]  ;;  %s1167_s12 = sadd.s32 6, %s3023_s5 }
  0xcb   : > { %vm951_vm15 = vcmp.ge.f32.partialorder %v950_v40, 0.0001  ;;  %vm955_vm1 = vcmp.lt.f32.partialorder %v950_v40, 0.0001  ;;  %v1847_v56 = vpop.eup %1846  ;;  %vm1029_vm3 = vcmp.le.f32.partialorder %v3037_v7, 0.0  ;;  %v1181_v14 = vmul.f32 %v1180_v44, %v1176_v37  ;;  %s1323_s4 = sadd.s32 1, %s3191_s23 }
  0xcc   : > { %vm952_vm2 = vmand %vm3142_vm14, %vm951_vm15  ;;  %v1184_v57 = vmul.f32 %v1183_v45, %v1178_v33  ;;  %v1188_v60 = vmul.f32 %v1187_v42, %v1186_v46  ;;  %v1027_v53 = vmul.f32 %v1847_v56, %v1026_v28  ;;  %v1258_v16 = vstv %s3132_s20  ;;  %s1325_s6 = sadd.s32 2, %s3191_s23  ;;  %s3228_s25 = sld [smem:[#allocation3 + %s3191_s23]] }
  0xcd   : > { %v1585_v63 = vsel %vm952_vm2, 1.0, %v2043_v39  ;;  %v958_v52 = vsel %vm952_vm2, %v957_v32, 0.0  ;;  %v971_v61 = vsel %vm952_vm2, %v950_v40, %v890_v48  ;;  %vm3177_vm4 = vmand %vm3158_vm0, %vm955_vm1  ;;  %v1259_v12 = vsub.f32 %v1258_v16, %v2094_v11  ;;  %s1329_s20 = sadd.s32 4, %s3191_s23  ;;  %s1327_s10 = sadd.s32 3, %s3191_s23 }
  0xce   : > { %976 = vadd.xlane.f32.xlu0 %v1585_v63  ;;  %v960_v1 = vmul.f32 %v959_v54, %v958_v52  ;;  %v963_v3 = vmul.f32 %v962_v55, %v958_v52  ;;  %v966_v4 = vmul.f32 %v965_v0, %v958_v52  ;;  %v969_v8 = vmul.f32 %v968_v2, %v958_v52  ;;  %s3245_s30 = sld [smem:[#allocation3 + %s1325_s6]]  ;;  %s1169_s9 = sadd.s32 7, %s3023_s5 }
  0xcf   : > { %v972_v34 = vsub.f32 0.0, %v971_v61  ;;  %v1028_v10 = vmin.f32 %v1027_v53, 0.99  ;;  %v1185_v13 = vadd.f32 %v1184_v57, %v1181_v14  ;;  %v1260_v51 = vstv %s3152_s19  ;;  %s3248_s19 = sld [smem:[#allocation3 + %s1329_s20]]  ;;  %s1171_s2 = sadd.s32 8, %s3023_s5 }
  0xd0   : > { %v961_v20 = vadd.f32 %v960_v1, %v3105_v24  ;;  %v964_v54 = vadd.f32 %v963_v3, %v3108_v25  ;;  %v967_v55 = vadd.f32 %v966_v4, %v3111_v26  ;;  %v970_v0 = vadd.f32 %v969_v8, %v3114_v27  ;;  %s3261_s18 = sld [smem:[#allocation3 + %s1327_s10]]  ;;  %s1335_s20 = sadd.s32 7, %s3191_s23 }
  0xd1   : > { %v973_v2 = vsel %vm3177_vm4, %v972_v34, %v971_v61  ;;  %vm1030_vm5 = vcmp.ge.f32.partialorder %v1028_v10, 0.003921569  ;;  %v1032_v21 = vsub.f32 1.0, %v1028_v10  ;;  %v3204_v36 = vadd.f32 %v1188_v60, %v1185_v13  ;;  %s3292_s11 = sld [smem:[#allocation3 + %s1167_s12]] }
  0xd2   : > { %vm1036_vm6 = vcmp.gt.f32.partialorder %v973_v2, 0.0  ;;  %v1040_v6 = vmul.f32 %v1028_v10, %v973_v2  ;;  %vm3213_vm7 = vmand %vm1029_vm3, %vm1030_vm5  ;;  %v1109_v58 = vstv %s3118_s1  ;;  %v1261_v19 = vsub.f32 %v1260_v51, %v2091_v9  ;;  %s3238_s1 = sld [smem:[#allocation3 + %s1323_s4]]  ;;  %s1256_s4 = sadd.s32 9, %s3093_s26 }
  0xd3   : > { %v1033_v23 = vmul.f32 %v1032_v21, %v973_v2  ;;  %v1190_v5 = vmul.f32 1.442695, %v3204_v36  ;;  %v1125_v24 = vstv %s3134_s27  ;;  %v1128_v25 = vstv %s3147_s14  ;;  %vm3234_vm9 = vmand %vm3213_vm7, %vm1036_vm6  ;;  %s3298_s22 = sld [smem:[#allocation3 + %s1169_s9]]  ;;  %s1250_s14 = sadd.s32 6, %s3093_s26 }
  0xd4   : > { %v1262_v26 = vstv %s3164_s16  ;;  %v1265_v27 = vstv %s3170_s29  ;;  %vm1112_vm12 = vcmp.le.f32.partialorder %v3121_v30, 0.0  ;;  %v1269_v17 = vmul.f32 %v1261_v19, %v1259_v12  ;;  %s1173_s16 = sadd.s32 9, %s3023_s5  ;;  %s1248_s29 = sadd.s32 5, %s3093_s26 }
  0xd5   : > { %vm1034_vm8 = vcmp.ge.f32.partialorder %v1033_v23, 0.0001  ;;  %vm1038_vm10 = vcmp.lt.f32.partialorder %v1033_v23, 0.0001  ;;  %1850 = vpow2.f32 %v1190_v5  ;;  %v1263_v18 = vmul.f32 %v1262_v26, %v1259_v12  ;;  %s3305_s5 = sld [smem:[#allocation3 + %s1171_s2]] }
  0xd6   : > { %v1849_v28 = vpop.eup %1848  ;;  %vm1035_vm11 = vmand %vm3213_vm7, %vm1034_vm8  ;;  %v1266_v48 = vmul.f32 %v1265_v27, %v1261_v19  ;;  %v1270_v31 = vstv %s3189_s15  ;;  %v1131_v57 = vstv %s3202_s3  ;;  %v1134_v61 = vstv %s3206_s24  ;;  %s3310_s21 = sld [smem:[#allocation3 + %s1173_s16]]  ;;  %s1252_s15 = sadd.s32 7, %s3093_s26 }
  0xd7   : > { %v1587_v49 = vsel %vm1035_vm11, 1.0, %v2043_v39  ;;  %v1041_v59 = vsel %vm1035_vm11, %v1040_v6, 0.0  ;;  %v1054_v32 = vsel %vm1035_vm11, %v1033_v23, %v973_v2  ;;  %v1110_v35 = vmul.f32 %v1849_v28, %v1109_v58  ;;  %vm1039_vm13 = vmand %vm3234_vm9, %vm1038_vm10  ;;  %s3312_s27 = sld [smem:[#allocation3 + %s1248_s29]]  ;;  %s1331_s3 = sadd.s32 5, %s3191_s23 }
  0xd8   : > { %1059 = vadd.xlane.f32.xlu1 %v1587_v49  ;;  %v1043_v37 = vmul.f32 %v1042_v41, %v1041_v59  ;;  %v1046_v33 = vmul.f32 %v1045_v43, %v1041_v59  ;;  %v1049_v29 = vmul.f32 %v1048_v47, %v1041_v59  ;;  %v1052_v38 = vmul.f32 %v1051_v50, %v1041_v59  ;;  %s3333_s28 = sld [smem:[#allocation3 + %s1250_s14]]  ;;  %s1333_s26 = sadd.s32 6, %s3191_s23 }
  0xd9   : > { %v1055_v40 = vsub.f32 0.0, %v1054_v32  ;;  %v1111_v42 = vmin.f32 %v1110_v35, 0.99  ;;  %v1264_v44 = vmul.f32 %v1263_v18, %v1259_v12  ;;  %v1267_v45 = vmul.f32 %v1266_v48, %v1261_v19  ;;  %s3343_s24 = sld [smem:[#allocation3 + %s1252_s15]]  ;;  %s3408_s16 = scalar_lea.smem [#allocation12], %s2142_s8 }
  0xda   : > { %v1044_v46 = vadd.f32 %v1043_v37, %v961_v20  ;;  %v1047_v15 = vadd.f32 %v1046_v33, %v964_v54  ;;  %v1050_v41 = vadd.f32 %v1049_v29, %v967_v55  ;;  %v1053_v43 = vadd.f32 %v1052_v38, %v970_v0  ;;  %s3348_s6 = sld [smem:[#allocation3 + %s1331_s3]] }
  0xdb   : > { %v1056_v56 = vsel %vm1039_vm13, %v1055_v40, %v1054_v32  ;;  %vm1113_vm14 = vcmp.ge.f32.partialorder %v1111_v42, 0.003921569  ;;  %v1115_v47 = vsub.f32 1.0, %v1111_v42  ;;  %v1268_v50 = vadd.f32 %v1267_v45, %v1264_v44  ;;  %s3366_s10 = sld [smem:[#allocation3 + %s1333_s26]] }
  0xdc   : > { %vm1119_vm15 = vcmp.gt.f32.partialorder %v1056_v56, 0.0  ;;  %v1123_v14 = vmul.f32 %v1111_v42, %v1056_v56  ;;  %v1271_v60 = vmul.f32 %v1270_v31, %v1269_v17  ;;  %vm3266_vm0 = vmand %vm1112_vm12, %vm1113_vm14  ;;  %v1341_v53 = vstv %s3228_s25  ;;  %s3353_s25 = sld [smem:[#allocation3 + %s1256_s4]] }
  0xdd   : > { %v1116_v52 = vmul.f32 %v1115_v47, %v1056_v56  ;;  %v1343_v22 = vstv %s3238_s1  ;;  %v1342_v3 = vsub.f32 %v1341_v53, %v2094_v11  ;;  %v1345_v4 = vstv %s3245_s30  ;;  %vm3283_vm2 = vmand %vm3266_vm0, %vm1119_vm15  ;;  %s1337_s1 = sadd.s32 8, %s3191_s23  ;;  %s1339_s30 = sadd.s32 9, %s3191_s23 }
  0xde   : > { %v3275_v1 = vadd.f32 %v1271_v60, %v1268_v50  ;;  %v1344_v30 = vsub.f32 %v1343_v22, %v2091_v9  ;;  %v1192_v34 = vstv %s3218_s13  ;;  %v1348_v10 = vstv %s3248_s19  ;;  %s3346_s13 = sld [smem:[#allocation3 + %s1254_s17]] }
  0xdf   : > { %vm1117_vm1 = vcmp.ge.f32.partialorder %v1116_v52, 0.0001  ;;  %vm1121_vm3 = vcmp.lt.f32.partialorder %v1116_v52, 0.0001  ;;  %v1346_v16 = vmul.f32 %v1345_v4, %v1342_v3  ;;  %v1353_v54 = vstv %s3261_s18  ;;  %s3377_s19 = sld [smem:[#allocation3 + %s1335_s20]] }
  0xe0   : > { %vm1118_vm4 = vmand %vm3266_vm0, %vm1117_vm1  ;;  %v1273_v13 = vmul.f32 1.442695, %v3275_v1  ;;  %v1349_v20 = vmul.f32 %v1348_v10, %v1344_v30  ;;  %v1352_v21 = vmul.f32 %v1344_v30, %v1342_v3  ;;  %vm1195_vm6 = vcmp.le.f32.partialorder %v3204_v36, 0.0  ;;  %s3381_s18 = sld [smem:[#allocation3 + %s1337_s1]] }
  0xe1   : > { %v1589_v55 = vsel %vm1118_vm4, 1.0, %v2043_v39  ;;  %v1124_v0 = vsel %vm1118_vm4, %v1123_v14, 0.0  ;;  %v1137_v2 = vsel %vm1118_vm4, %v1116_v52, %v1056_v56  ;;  %vm1122_vm5 = vmand %vm3283_vm2, %vm1121_vm3  ;;  %v1347_v19 = vmul.f32 %v1346_v16, %v1342_v3  ;;  %s3385_s23 = sld [smem:[#allocation3 + %s1339_s30]] }
  0xe2   : > { %v1851_v6 = vpop.eup %1850  ;;  %1142 = vadd.xlane.f32.xlu0 %v1589_v55  ;;  %v1126_v12 = vmul.f32 %v1125_v24, %v1124_v0  ;;  %v1129_v51 = vmul.f32 %v1128_v25, %v1124_v0  ;;  %v1132_v62 = vmul.f32 %v1131_v57, %v1124_v0  ;;  %v1135_v23 = vmul.f32 %v1134_v61, %v1124_v0 }
  0xe3   : > { %v1138_v58 = vsub.f32 0.0, %v1137_v2  ;;  %v1193_v5 = vmul.f32 %v1851_v6, %v1192_v34  ;;  %1852 = vpow2.f32 %v1273_v13  ;;  %v1350_v18 = vmul.f32 %v1349_v20, %v1344_v30 }
  0xe4   : > { %v1127_v26 = vadd.f32 %v1126_v12, %v1044_v46  ;;  %v1130_v27 = vadd.f32 %v1129_v51, %v1047_v15  ;;  %v1133_v7 = vadd.f32 %v1132_v62, %v1050_v41  ;;  %v1136_v24 = vadd.f32 %v1135_v23, %v1053_v43 }
  0xe5   : > { %v1194_v25 = vmin.f32 %v1193_v5, 0.99  ;;  %v1354_v28 = vmul.f32 %v1353_v54, %v1352_v21  ;;  %v1139_v48 = vsel %vm1122_vm5, %v1138_v58, %v1137_v2  ;;  %v1351_v49 = vadd.f32 %v1350_v18, %v1347_v19 }
  0xe6   : > { %v147_v59 = vpop.xlane.xlu0 %146  ;;  %v1208_v29 = vstv %s3292_s11  ;;  %v1211_v38 = vstv %s3298_s22  ;;  %v1214_v36 = vstv %s3305_s5  ;;  %vm1202_vm10 = vcmp.gt.f32.partialorder %v1139_v48, 0.0 }
  0xe7   : > { %vm1196_vm7 = vcmp.ge.f32.partialorder %v1194_v25, 0.003921569  ;;  %v1198_v17 = vsub.f32 1.0, %v1194_v25  ;;  %v1206_v31 = vmul.f32 %v1194_v25, %v1139_v48  ;;  %v148_v32 = vrot.slane %v147_v59, 4 }
  0xe8   : > { %vm3315_vm8 = vmand %vm1195_vm6, %vm1196_vm7  ;;  %v3319_v33 = vadd.f32 %v1354_v28, %v1351_v49  ;;  %v1217_v42 = vstv %s3310_s21  ;;  %v1275_v45 = vstv %s3312_s27  ;;  %vm1278_vm15 = vcmp.le.f32.partialorder %v3275_v1, 0.0  ;;  %s1497_s21 = scalar_lea.smem %s3408_s16, 1 [#allocation12] }
  0xe9   : > { %v1199_v37 = vmul.f32 %v1198_v17, %v1139_v48  ;;  %v149_v40 = vadd.f32 %v148_v32, %v147_v59  ;;  %vm3339_vm13 = vmand %vm3315_vm8, %vm1202_vm10  ;;  %v1291_v12 = vstv %s3333_s28  ;;  %v1294_v1 = vstv %s3343_s24  ;;  %s1500_s28 = scalar_lea.smem %s3408_s16, 2 [#allocation12] }
  0xea   : > { %v1356_v44 = vmul.f32 1.442695, %v3319_v33  ;;  %v1297_v51 = vstv %s3346_s13  ;;  %v1358_v62 = vstv %s3348_s6  ;;  %v1300_v58 = vstv %s3353_s25  ;;  %s1503_s6 = scalar_lea.smem %s3408_s16, 3 [#allocation12] }
  0xeb   : > { %vm1200_vm9 = vcmp.ge.f32.partialorder %v1199_v37, 0.0001  ;;  %vm1204_vm12 = vcmp.lt.f32.partialorder %v1199_v37, 0.0001  ;;  %v150_v46 = vrot.slane %v149_v40, 2  ;;  %vm1361_vm7 = vcmp.le.f32.partialorder %v3319_v33, 0.0 }
  0xec   : > { %vm1201_vm11 = vmand %vm3315_vm8, %vm1200_vm9  ;;  %1854 = vpow2.f32 %v1356_v44  ;;  %v1383_v56 = vstv %s3385_s23 }
  0xed   : > { %v1591_v15 = vsel %vm1201_vm11, 1.0, %v2043_v39  ;;  %v1207_v41 = vsel %vm1201_vm11, %v1206_v31, 0.0  ;;  %v1220_v43 = vsel %vm1201_vm11, %v1199_v37, %v1139_v48  ;;  %v151_v63 = vadd.f32 %v150_v46, %v149_v40  ;;  %vm1205_vm14 = vmand %vm3339_vm13, %vm1204_vm12 }
  0xee   : > { %1225 = vadd.xlane.f32.xlu1 %v1591_v15  ;;  %v1209_v47 = vmul.f32 %v1208_v29, %v1207_v41  ;;  %v1212_v50 = vmul.f32 %v1211_v38, %v1207_v41  ;;  %v1215_v14 = vmul.f32 %v1214_v36, %v1207_v41  ;;  %v1218_v57 = vmul.f32 %v1217_v42, %v1207_v41 }
  0xef   : > { %v1221_v60 = vsub.f32 0.0, %v1220_v43  ;;  %v152_v34 = vrot.slane %v151_v63, 1  ;;  %v1374_v15 = vstv %s3366_s10  ;;  %v1377_v41 = vstv %s3377_s19  ;;  %s1506_s10 = scalar_lea.smem %s3408_s16, 4 [#allocation12] }
  0xf0   : > { %v1853_v52 = vpop.eup %1852  ;;  %v1210_v61 = vadd.f32 %v1209_v47, %v1127_v26  ;;  %v1213_v53 = vadd.f32 %v1212_v50, %v1130_v27  ;;  %v1216_v22 = vadd.f32 %v1215_v14, %v1133_v7  ;;  %v1219_v3 = vadd.f32 %v1218_v57, %v1136_v24 }
  0xf1   : > { %v1276_v4 = vmul.f32 %v1853_v52, %v1275_v45  ;;  %v153_v16 = vadd.f32 %v152_v34, %v151_v63  ;;  %v1222_v20 = vsel %vm1205_vm14, %v1221_v60, %v1220_v43  ;;  %v1380_v43 = vstv %s3381_s18 }
  0xf2   : > { %v230_v30 = vpop.xlane.xlu0 %229  ;;  %vm1285_vm1 = vcmp.gt.f32.partialorder %v1222_v20, 0.0 }
  0xf3   : > { %v231_v8 = vrot.slane %v230_v30, 4  ;;  %v1277_v10 = vmin.f32 %v1276_v4, 0.99  ;;  %1604 = vpush %v153_v16 }
  0xf5   : > { %v232_v13 = vadd.f32 %v231_v8, %v230_v30  ;;  %vm1279_vm0 = vcmp.ge.f32.partialorder %v1277_v10, 0.003921569  ;;  %v1281_v54 = vsub.f32 1.0, %v1277_v10  ;;  %v1289_v55 = vmul.f32 %v1277_v10, %v1222_v20 }
  0xf6   : > { %vm3358_vm2 = vmand %vm1278_vm15, %vm1279_vm0 }
  0xf7   : > { %v233_v0 = vrot.slane %v232_v13, 2  ;;  %v1282_v21 = vmul.f32 %v1281_v54, %v1222_v20  ;;  %vm3372_vm4 = vmand %vm3358_vm2, %vm1285_vm1 }
  0xf9   : > { %v234_v6 = vadd.f32 %v233_v0, %v232_v13  ;;  %vm1283_vm3 = vcmp.ge.f32.partialorder %v1282_v21, 0.0001  ;;  %vm1287_vm5 = vcmp.lt.f32.partialorder %v1282_v21, 0.0001  ;;  %v1855_v19 = vpop.eup %1854 }
  0xfa   : > { %vm1284_vm6 = vmand %vm3358_vm2, %vm1283_vm3  ;;  %v1359_v25 = vmul.f32 %v1855_v19, %v1358_v62 }
  0xfb   : > { %v235_v5 = vrot.slane %v234_v6, 1  ;;  %v1593_v27 = vsel %vm1284_vm6, 1.0, %v2043_v39  ;;  %v1290_v7 = vsel %vm1284_vm6, %v1289_v55, 0.0  ;;  %v1303_v24 = vsel %vm1284_vm6, %v1282_v21, %v1222_v20  ;;  %vm1288_vm8 = vmand %vm3372_vm4, %vm1287_vm5 }
  0xfc   : > { %v313_v26 = vpop.xlane.xlu1 %312  ;;  %1308 = vadd.xlane.f32.xlu0 %v1593_v27  ;;  %v1292_v18 = vmul.f32 %v1291_v12, %v1290_v7  ;;  %v1295_v28 = vmul.f32 %v1294_v1, %v1290_v7  ;;  %v1298_v48 = vmul.f32 %v1297_v51, %v1290_v7  ;;  %v1301_v17 = vmul.f32 %v1300_v58, %v1290_v7 }
  0xfd   : > { %v1304_v31 = vsub.f32 0.0, %v1303_v24  ;;  %v1360_v49 = vmin.f32 %v1359_v25, 0.99  ;;  %v314_v59 = vrot.slane %v313_v26, 4  ;;  %v236_v32 = vadd.f32 %v235_v5, %v234_v6 }
  0xfe   : > { %v1293_v35 = vadd.f32 %v1292_v18, %v1210_v61  ;;  %v1296_v37 = vadd.f32 %v1295_v28, %v1213_v53  ;;  %v1299_v29 = vadd.f32 %v1298_v48, %v1216_v22  ;;  %v1302_v38 = vadd.f32 %v1301_v17, %v1219_v3 }
  0xff   : > { %v1305_v36 = vsel %vm1288_vm8, %v1304_v31, %v1303_v24  ;;  %vm1362_vm9 = vcmp.ge.f32.partialorder %v1360_v49, 0.003921569  ;;  %v1364_v40 = vsub.f32 1.0, %v1360_v49  ;;  %v315_v42 = vadd.f32 %v314_v59, %v313_v26  ;;  %1611 = vpush %v236_v32 }
 0x100   : > { %v1372_v44 = vmul.f32 %v1360_v49, %v1305_v36  ;;  %vm1368_vm10 = vcmp.gt.f32.partialorder %v1305_v36, 0.0  ;;  %vm1363_vm11 = vmand %vm1361_vm7, %vm1362_vm9 }
 0x101   : > { %v1365_v45 = vmul.f32 %v1364_v40, %v1305_v36  ;;  %v316_v46 = vrot.slane %v315_v42, 2  ;;  %vm1369_vm13 = vmand %vm1363_vm11, %vm1368_vm10 }
 0x103   : > { %vm1366_vm12 = vcmp.ge.f32.partialorder %v1365_v45, 0.0001  ;;  %vm1370_vm14 = vcmp.lt.f32.partialorder %v1365_v45, 0.0001  ;;  %v317_v47 = vadd.f32 %v316_v46, %v315_v42 }
 0x104   : > { %vm1367_vm15 = vmand %vm1363_vm11, %vm1366_vm12 }
 0x105   : > { %v1595_v14 = vsel %vm1367_vm15, 1.0, %v2043_v39  ;;  %v1373_v57 = vsel %vm1367_vm15, %v1372_v44, 0.0  ;;  %v1386_v60 = vsel %vm1367_vm15, %v1365_v45, %v1305_v36  ;;  %vm1371_vm0 = vmand %vm1369_vm13, %vm1370_vm14  ;;  %v318_v30 = vrot.slane %v317_v47, 1 }
 0x106   : > { %v396_v50 = vpop.xlane.xlu1 %395  ;;  %1391 = vadd.xlane.f32.xlu1 %v1595_v14  ;;  %v1375_v33 = vmul.f32 %v1374_v15, %v1373_v57  ;;  %v1378_v52 = vmul.f32 %v1377_v41, %v1373_v57  ;;  %v1381_v61 = vmul.f32 %v1380_v43, %v1373_v57  ;;  %v1384_v53 = vmul.f32 %v1383_v56, %v1373_v57 }
 0x107   : > { %v397_v63 = vrot.slane %v396_v50, 4  ;;  %v1387_v22 = vsub.f32 0.0, %v1386_v60  ;;  %v319_v16 = vadd.f32 %v318_v30, %v317_v47 }
 0x108   : > { %v3396_v20 = vadd.f32 %v1375_v33, %v1293_v35   ;;  %v3398_v19 = vadd.f32 %v1378_v52, %v1296_v37   ;;  %v3400_v18 = vadd.f32 %v1381_v61, %v1299_v29   ;;  %v3402_v17 = vadd.f32 %v1384_v53, %v1302_v38  }
 0x109   : > { %v398_v3 = vadd.f32 %v397_v63, %v396_v50  ;;  %v3404_v7 = vsel %vm1371_vm0, %v1387_v22, %v1386_v60   ;;  %1618 = vpush %v319_v16 }
 0x10a   : > { %v3583_v4 = vmov %v3396_v20  ;;  %v3584_v8 = vmov %v3398_v19  ;;  %v3585_v34 = vmov %v3400_v18  ;;  %v3586_v39 = vmov %v3402_v17 }
 0x10b   : > { %v3587_v10 = vmov %v3404_v7  ;;  %v399_v13 = vrot.slane %v398_v3, 2 }
 0x10c   : > { %1403 = vmax.xlane.f32.xlu0 %v3587_v10 }
 0x10d   : > { %v400_v54 = vadd.f32 %v399_v13, %v398_v3 }
 0x10f   : > { %v401_v55 = vrot.slane %v400_v54, 1 }
 0x111   : > { %v402_v0 = vadd.f32 %v401_v55, %v400_v54 }
 0x113   : > { %1625 = vpush %v402_v0 }
 0x114   : > { %v479_v2 = vpop.xlane.xlu0 %478 }
 0x115   : > { %v480_v21 = vrot.slane %v479_v2, 4 }
 0x117   : > { %v481_v20 = vadd.f32 %v480_v21, %v479_v2 }
 0x119   : > { %v482_v6 = vrot.slane %v481_v20, 2 }
 0x11b   : > { %v483_v12 = vadd.f32 %v482_v6, %v481_v20 }
 0x11d   : > { %v484_v1 = vrot.slane %v483_v12, 1 }
 0x11e   : > { %v562_v51 = vpop.xlane.xlu1 %561 }
 0x11f   : > { %v563_v62 = vrot.slane %v562_v51, 4  ;;  %v485_v23 = vadd.f32 %v484_v1, %v483_v12 }
 0x121   : > { %v564_v58 = vadd.f32 %v563_v62, %v562_v51  ;;  %1632 = vpush %v485_v23 }
 0x123   : > { %v565_v5 = vrot.slane %v564_v58, 2 }
 0x124   : > { %s1605_s12 = spop %1604 }
 0x125   : > { %v566_v19 = vadd.f32 %v565_v5, %v564_v58  ;;  %p1606_p6 = scmp.lt.s32.totalorder %s1605_s12, 0  ;;  %s1607_s9 = sceil.f32 %s1605_s12 }
 0x126   : > { %s1608_s2 = sfloor.f32 %s1605_s12  ;;  %s1509_s12 = scalar_lea.smem %s3408_s16, 5 [#allocation12] }
 0x127   : > { %v567_v26 = vrot.slane %v566_v19, 1  ;;  %s3605_s9 = smov (!%p1606_p6, %s1607_s9), %s1608_s2 }
 0x128   : > { %s1610_s11 = scvt.f32.s32 %s3605_s9 }
 0x129   : > { %v568_v27 = vadd.f32 %v567_v26, %v566_v19 }
 0x12a   : > { %v645_v7 = vpop.xlane.xlu0 %644  ;;  %157 = sst [smem:[%s3408_s16]] %s1610_s11 }
 0x12b   : > { %v646_v24 = vrot.slane %v645_v7, 4  ;;  %1639 = vpush %v568_v27 }
 0x12d   : > { %v647_v25 = vadd.f32 %v646_v24, %v645_v7 }
 0x12f   : > { %v648_v18 = vrot.slane %v647_v25, 2 }
 0x130   : > { %s1612_s22 = spop %1611 }
 0x131   : > { %v649_v28 = vadd.f32 %v648_v18, %v647_v25  ;;  %p1613_p7 = scmp.lt.s32.totalorder %s1612_s22, 0  ;;  %s1614_s29 = sceil.f32 %s1612_s22 }
 0x132   : > { %s1615_s5 = sfloor.f32 %s1612_s22 }
 0x133   : > { %v728_v48 = vpop.xlane.xlu1 %727  ;;  %v650_v17 = vrot.slane %v649_v28, 1  ;;  %s3607_s29 = smov (!%p1613_p7, %s1614_s29), %s1615_s5 }
 0x134   : > { %v729_v31 = vrot.slane %v728_v48, 4  ;;  %s1617_s27 = scvt.f32.s32 %s3607_s29  ;;  %s1512_s29 = scalar_lea.smem %s3408_s16, 6 [#allocation12] }
 0x135   : > { %v651_v49 = vadd.f32 %v650_v17, %v649_v28 }
 0x136   : > { %v730_v59 = vadd.f32 %v729_v31, %v728_v48  ;;  %240 = sst [smem:[%s1497_s21]] %s1617_s27 }
 0x137   : > { %1646 = vpush %v651_v49 }
 0x138   : > { %v731_v32 = vrot.slane %v730_v59, 2 }
 0x13a   : > { %v732_v35 = vadd.f32 %v731_v32, %v730_v59  ;;  %s1619_s14 = spop %1618 }
 0x13b   : > { %p1620_p8 = scmp.lt.s32.totalorder %s1619_s14, 0  ;;  %s1621_s15 = sceil.f32 %s1619_s14 }
 0x13c   : > { %v733_v37 = vrot.slane %v732_v35, 1  ;;  %s1622_s17 = sfloor.f32 %s1619_s14 }
 0x13d   : > { %s3609_s15 = smov (!%p1620_p8, %s1621_s15), %s1622_s17 }
 0x13e   : > { %v734_v29 = vadd.f32 %v733_v37, %v732_v35  ;;  %s1624_s3 = scvt.f32.s32 %s3609_s15  ;;  %s1515_s15 = scalar_lea.smem %s3408_s16, 7 [#allocation12] }
 0x13f   : > { %v811_v38 = vpop.xlane.xlu0 %810 }
 0x140   : > { %v812_v36 = vrot.slane %v811_v38, 4  ;;  %1653 = vpush %v734_v29  ;;  %323 = sst [smem:[%s1500_s28]] %s1624_s3 }
 0x142   : > { %v813_v40 = vadd.f32 %v812_v36, %v811_v38 }
 0x144   : > { %s1626_s24 = spop %1625  ;;  %v814_v42 = vrot.slane %v813_v40, 2 }
 0x145   : > { %p1627_p9 = scmp.lt.s32.totalorder %s1626_s24, 0  ;;  %s1628_s4 = sceil.f32 %s1626_s24 }
 0x146   : > { %s1629_s13 = sfloor.f32 %s1626_s24  ;;  %v815_v44 = vadd.f32 %v814_v42, %v813_v40 }
 0x147   : > { %s3611_s4 = smov (!%p1627_p9, %s1628_s4), %s1629_s13 }
 0x148   : > { %s1631_s25 = scvt.f32.s32 %s3611_s4  ;;  %v816_v45 = vrot.slane %v815_v44, 1  ;;  %s1518_s4 = scalar_lea.smem %s3408_s16, 8 [#allocation12] }
 0x14a   : > { %406 = sst [smem:[%s1503_s6]] %s1631_s25  ;;  %v817_v46 = vadd.f32 %v816_v45, %v815_v44 }
 0x14b   : > { %v894_v15 = vpop.xlane.xlu1 %893 }
 0x14c   : > { %v895_v41 = vrot.slane %v894_v15, 4  ;;  %1660 = vpush %v817_v46 }
 0x14e   : > { %v896_v43 = vadd.f32 %v895_v41, %v894_v15 }
 0x150   : > { %v897_v56 = vrot.slane %v896_v43, 2 }
 0x152   : > { %v898_v47 = vadd.f32 %v897_v56, %v896_v43  ;;  %s1633_s26 = spop %1632 }
 0x153   : > { %p1634_p10 = scmp.lt.s32.totalorder %s1633_s26, 0  ;;  %s1635_s20 = sceil.f32 %s1633_s26 }
 0x154   : > { %v899_v50 = vrot.slane %v898_v47, 1  ;;  %s1636_s1 = sfloor.f32 %s1633_s26 }
 0x155   : > { %s3613_s20 = smov (!%p1634_p10, %s1635_s20), %s1636_s1 }
 0x156   : > { %v900_v14 = vadd.f32 %v899_v50, %v898_v47  ;;  %s1638_s30 = scvt.f32.s32 %s3613_s20  ;;  %s1521_s20 = scalar_lea.smem %s3408_s16, 9 [#allocation12] }
 0x157   : > { %v977_v57 = vpop.xlane.xlu0 %976 }
 0x158   : > { %v978_v60 = vrot.slane %v977_v57, 4  ;;  %1667 = vpush %v900_v14  ;;  %489 = sst [smem:[%s1506_s10]] %s1638_s30 }
 0x15a   : > { %v979_v63 = vadd.f32 %v978_v60, %v977_v57 }
 0x15c   : > { %v980_v33 = vrot.slane %v979_v63, 2  ;;  %s1640_s19 = spop %1639 }
 0x15d   : > { %p1641_p11 = scmp.lt.s32.totalorder %s1640_s19, 0  ;;  %s1642_s18 = sceil.f32 %s1640_s19 }
 0x15e   : > { %v981_v52 = vadd.f32 %v980_v33, %v979_v63  ;;  %s1643_s23 = sfloor.f32 %s1640_s19 }
 0x15f   : > { %s3615_s18 = smov (!%p1641_p11, %s1642_s18), %s1643_s23 }
 0x160   : > { %v982_v61 = vrot.slane %v981_v52, 1  ;;  %s1645_s9 = scvt.f32.s32 %s3615_s18  ;;  %s1524_s18 = scalar_lea.smem %s3408_s16, 10 [#allocation12] }
 0x161   : > { %v1060_v53 = vpop.xlane.xlu1 %1059 }
 0x162   : > { %v1061_v22 = vrot.slane %v1060_v53, 4  ;;  %v983_v3 = vadd.f32 %v982_v61, %v981_v52  ;;  %572 = sst [smem:[%s1509_s12]] %s1645_s9 }
 0x164   : > { %v1062_v30 = vadd.f32 %v1061_v22, %v1060_v53  ;;  %1674 = vpush %v983_v3 }
 0x166   : > { %v1063_v13 = vrot.slane %v1062_v30, 2 }
 0x168   : > { %v1064_v16 = vadd.f32 %v1063_v13, %v1062_v30  ;;  %s1647_s2 = spop %1646 }
 0x169   : > { %p1648_p12 = scmp.lt.s32.totalorder %s1647_s2, 0  ;;  %s1649_s11 = sceil.f32 %s1647_s2 }
 0x16a   : > { %v1065_v54 = vrot.slane %v1064_v16, 1  ;;  %s1650_s22 = sfloor.f32 %s1647_s2 }
 0x16b   : > { %v1143_v55 = vpop.xlane.xlu0 %1142  ;;  %s3617_s11 = smov (!%p1648_p12, %s1649_s11), %s1650_s22 }
 0x16c   : > { %v1144_v0 = vrot.slane %v1143_v55, 4  ;;  %v1066_v2 = vadd.f32 %v1065_v54, %v1064_v16  ;;  %s1652_s5 = scvt.f32.s32 %s3617_s11  ;;  %s1527_s11 = scalar_lea.smem %s3408_s16, 11 [#allocation12] }
 0x16e   : > { %v1145_v21 = vadd.f32 %v1144_v0, %v1143_v55  ;;  %1681 = vpush %v1066_v2  ;;  %655 = sst [smem:[%s1512_s29]] %s1652_s5 }
 0x170   : > { %v1146_v20 = vrot.slane %v1145_v21, 2 }
 0x171   : > { %s1654_s21 = spop %1653 }
 0x172   : > { %v1147_v6 = vadd.f32 %v1146_v20, %v1145_v21  ;;  %p1655_p13 = scmp.lt.s32.totalorder %s1654_s21, 0  ;;  %s1656_s27 = sceil.f32 %s1654_s21  ;;  %v3591_v20 = vmov %v3583_v4 }
 0x173   : > { %s1657_s14 = sfloor.f32 %s1654_s21 }
 0x174   : > { %v1148_v12 = vrot.slane %v1147_v6, 1  ;;  %s3619_s27 = smov (!%p1655_p13, %s1656_s27), %s1657_s14 }
 0x175   : > { %s1659_s17 = scvt.f32.s32 %s3619_s27  ;;  %s1530_s27 = scalar_lea.smem %s3408_s16, 12 [#allocation12] }
 0x176   : > { %v1149_v1 = vadd.f32 %v1148_v12, %v1147_v6 }
 0x177   : > { %v1226_v51 = vpop.xlane.xlu1 %1225  ;;  %738 = sst [smem:[%s1515_s15]] %s1659_s17 }
 0x178   : > { %v1227_v62 = vrot.slane %v1226_v51, 4  ;;  %1688 = vpush %v1149_v1 }
 0x17a   : > { %v1228_v23 = vadd.f32 %v1227_v62, %v1226_v51 }
 0x17c   : > { %v1229_v58 = vrot.slane %v1228_v23, 2 }
 0x17d   : > { %s1661_s28 = spop %1660 }
 0x17e   : > { %v1230_v5 = vadd.f32 %v1229_v58, %v1228_v23  ;;  %p1662_p0 = scmp.lt.s32.totalorder %s1661_s28, 0  ;;  %s1663_s3 = sceil.f32 %s1661_s28 }
 0x17f   : > { %s1664_s24 = sfloor.f32 %s1661_s28 }
 0x180   : > { %v1231_v19 = vrot.slane %v1230_v5, 1  ;;  %s3621_s3 = smov (!%p1662_p0, %s1663_s3), %s1664_s24 }
 0x181   : > { %s1666_s13 = scvt.f32.s32 %s3621_s3  ;;  %s1533_s3 = scalar_lea.smem %s3408_s16, 13 [#allocation12] }
 0x182   : > { %v1232_v26 = vadd.f32 %v1231_v19, %v1230_v5  ;;  %v3590_v19 = vmov %v3584_v8 }
 0x183   : > { %821 = sst [smem:[%s1518_s4]] %s1666_s13 }
 0x184   : > { %1695 = vpush %v1232_v26 }
 0x185   : > { %v1309_v27 = vpop.xlane.xlu0 %1308 }
 0x186   : > { %v1310_v7 = vrot.slane %v1309_v27, 4 }
 0x188   : > { %v1311_v24 = vadd.f32 %v1310_v7, %v1309_v27  ;;  %v3592_v7 = vmov %v3587_v10 }
 0x189   : > { %s1668_s6 = spop %1667 }
 0x18a   : > { %v1312_v25 = vrot.slane %v1311_v24, 2  ;;  %p1669_p1 = scmp.lt.s32.totalorder %s1668_s6, 0  ;;  %s1670_s25 = sceil.f32 %s1668_s6 }
 0x18b   : > { %s1671_s26 = sfloor.f32 %s1668_s6 }
 0x18c   : > { %v1313_v18 = vadd.f32 %v1312_v25, %v1311_v24  ;;  %s3623_s25 = smov (!%p1669_p1, %s1670_s25), %s1671_s26 }
 0x18d   : > { %s1673_s1 = scvt.f32.s32 %s3623_s25  ;;  %s1536_s25 = scalar_lea.smem %s3408_s16, 14 [#allocation12] }
 0x18e   : > { %v1314_v28 = vrot.slane %v1313_v18, 1 }
 0x18f   : > { %v1392_v48 = vpop.xlane.xlu1 %1391  ;;  %904 = sst [smem:[%s1521_s20]] %s1673_s1 }
 0x190   : > { %v1393_v17 = vrot.slane %v1392_v48, 4  ;;  %v1315_v31 = vadd.f32 %v1314_v28, %v1313_v18  ;;  %v3589_v18 = vmov %v3585_v34 }
 0x192   : > { %v1394_v49 = vadd.f32 %v1393_v17, %v1392_v48  ;;  %1702 = vpush %v1315_v31  ;;  %v3588_v17 = vmov %v3586_v39 }
 0x194   : > { %v1395_v32 = vrot.slane %v1394_v49, 2 }
 0x195   : > { %v1404_v59 = vpop.xlane.xlu0 %1403  ;;  %s1675_s10 = spop %1674 }
 0x196   : > { %v1405_v35 = vrot.slane %v1404_v59, 4  ;;  %v1396_v37 = vadd.f32 %v1395_v32, %v1394_v49  ;;  %p1676_p2 = scmp.lt.s32.totalorder %s1675_s10, 0  ;;  %s1677_s30 = sceil.f32 %s1675_s10 }
 0x197   : > { %s1678_s19 = sfloor.f32 %s1675_s10 }
 0x198   : > { %v1406_v29 = vmax.f32 %v1404_v59, %v1405_v35  ;;  %v1397_v36 = vrot.slane %v1396_v37, 1  ;;  %s3625_s30 = smov (!%p1676_p2, %s1677_s30), %s1678_s19 }
 0x199   : > { %s1680_s23 = scvt.f32.s32 %s3625_s30  ;;  %s1539_s30 = scalar_lea.smem %s3408_s16, 15 [#allocation12] }
 0x19a   : > { %v1407_v38 = vrot.slane %v1406_v29, 2  ;;  %v1398_v42 = vadd.f32 %v1397_v36, %v1396_v37 }
 0x19b   : > { %987 = sst [smem:[%s1524_s18]] %s1680_s23  ;;  %s1603_s23 = sadd.s32 16, %s2142_s8 }
 0x19c   : > { %v1408_v40 = vmax.f32 %v1406_v29, %v1407_v38  ;;  %1709 = vpush %v1398_v42  ;;  %p70_p9 = scmp.lt.s32.totalorder %s1603_s23, %s3486_s0 }
 0x19e   : > { %v1409_v44 = vrot.slane %v1408_v40, 1 }
 0x19f   : > { %s1682_s12 = spop %1681 }
 0x1a0   : > { %v1410_v45 = vmax.f32 %v1408_v40, %v1409_v44  ;;  %p1683_p3 = scmp.lt.s32.totalorder %s1682_s12, 0  ;;  %s1684_s9 = sceil.f32 %s1682_s12 }
 0x1a1   : > { %s1685_s2 = sfloor.f32 %s1682_s12 }
 0x1a2   : > { %1716 = vpush %v1410_v45  ;;  %s3627_s9 = smov (!%p1683_p3, %s1684_s9), %s1685_s2 }
 0x1a3   : > { %s1687_s22 = scvt.f32.s32 %s3627_s9 }
 0x1a5   : > { %1070 = sst [smem:[%s1527_s11]] %s1687_s22 }
 0x1a9   : > { %s1689_s29 = spop %1688 }
 0x1aa   : > { %p1690_p4 = scmp.lt.s32.totalorder %s1689_s29, 0  ;;  %s1691_s5 = sceil.f32 %s1689_s29 }
 0x1ab   : > { %s1692_s21 = sfloor.f32 %s1689_s29 }
 0x1ac   : > { %s3629_s5 = smov (!%p1690_p4, %s1691_s5), %s1692_s21 }
 0x1ad   : > { %s1694_s14 = scvt.f32.s32 %s3629_s5 }
 0x1af   : > { %1153 = sst [smem:[%s1530_s27]] %s1694_s14 }
 0x1b5   : > { %s1696_s15 = spop %1695 }
 0x1b6   : > { %p1697_p5 = scmp.lt.s32.totalorder %s1696_s15, 0  ;;  %s1698_s17 = sceil.f32 %s1696_s15 }
 0x1b7   : > { %s1699_s28 = sfloor.f32 %s1696_s15 }
 0x1b8   : > { %s3631_s17 = smov (!%p1697_p5, %s1698_s17), %s1699_s28 }
 0x1b9   : > { %s1701_s24 = scvt.f32.s32 %s3631_s17 }
 0x1bb   : > { %1236 = sst [smem:[%s1533_s3]] %s1701_s24 }
 0x1c3   : > { %s1703_s4 = spop %1702 }
 0x1c4   : > { %p1704_p6 = scmp.lt.s32.totalorder %s1703_s4, 0  ;;  %s1705_s13 = sceil.f32 %s1703_s4 }
 0x1c5   : > { %s1706_s6 = sfloor.f32 %s1703_s4 }
 0x1c6   : > { %s3633_s13 = smov (!%p1704_p6, %s1705_s13), %s1706_s6 }
 0x1c7   : > { %s1708_s26 = scvt.f32.s32 %s3633_s13 }
 0x1c9   : > { %1319 = sst [smem:[%s1536_s25]] %s1708_s26 }
 0x1cd   : > { %s1710_s20 = spop %1709 }
 0x1ce   : > { %p1711_p7 = scmp.lt.s32.totalorder %s1710_s20, 0  ;;  %s1712_s1 = sceil.f32 %s1710_s20 }
 0x1cf   : > { %s1713_s10 = sfloor.f32 %s1710_s20 }
 0x1d0   : > { %s3635_s1 = smov (!%p1711_p7, %s1712_s1), %s1713_s10 }
 0x1d1   : > { %s1715_s18 = scvt.f32.s32 %s3635_s1 }
 0x1d3   : > { %s1717_s19 = spop %1716  ;;  %1402 = sst [smem:[%s1539_s30]] %s1715_s18 }
 0x1d4   : > { %p1412_p8 = scmp.gt.f32.partialorder %s1717_s19, 0.0  ;;  %s3593_s30 = sadd.s32 1, %s3498_s7  }
 0x1d6   : > { %p71_p10 = pnand %p1412_p8, %p70_p9 }
 0x1d7   :  { %v3594_v12 = vmov (%p71_p10), %v3586_v39  ;;  %v3595_v13 = vmov (%p71_p10), %v3585_v34  ;;  %v3596_v14 = vmov (%p71_p10), %v3584_v8  ;;  %v3597_v15 = vmov (%p71_p10), %v3583_v4  ;;  %s3599_s29 = sadd.s32 (%p71_p10), 1, %s3498_s7  }
 0x1d8   :  { %74 = sbr.rel (!%p71_p10) target bundleno = 44 (0x2c), region = 90  ;;  %v3598_v16 = vmov (%p71_p10), %v3587_v10 }
 0x1dd PF:  { %s1418_s0 = sld [smem:[#allocation8]]  ;;  %1435 = vst [vmem:[#allocation10] sm:$0xff] %v2018_v12  ;;  %v1417_v9 = vand.u32 2147483647, %v2034_v16  ;;  %s2044_s16 = smov [#allocation9]   ;;  %s2038_s29 = sphi %s2109_s29, %s3599_s29   ;;  %v2034_v16 = vphi %v3497_v16, %v3598_v16   ;;  %v2030_v15 = vphi %v2105_v15, %v3597_v15   ;;  %v2026_v14 = vphi %v2103_v14, %v3596_v14   ;;  %v2022_v13 = vphi %v2101_v13, %v3595_v13   ;;  %v2018_v12 = vphi %v2099_v12, %v3594_v12  }
 0x1de   :  { %s1599_s8 = sld [smem:[#allocation8 + $0x1]]  ;;  %s1441_s2 = sshll.u32 %s2044_s16, 4  ;;  %s1442_s2 = int_to_ptr.vmem [resolvable:$true] %s1441_s2 }
 0x1df   :  { %s1600_s7 = sld [smem:[#allocation8 + $0x2]]  ;;  %s2045_s11 = smov [#allocation10]  }
 0x1e0   :  { %s1454_s22 = sshll.u32 %s2045_s11, 4  ;;  %s1598_s5 = sshll.u32 %s2038_s29, 4  ;;  %s1455_s22 = int_to_ptr.vmem [resolvable:$true] %s1454_s22 }
 0x1e1   :  { %1416 = sst [smem:[#allocation13]] %s1598_s5  ;;  %s1876_s21 = scalar_lea.vmem %s1455_s22, 128 }
 0x1e2   :  { %p1877_p11 = scmp.ne.s32.totalorder %s1455_s22, %s1876_s21  ;;  %p1881_p12 = scmp.lt.s32.totalorder %s1455_s22, %s1455_s22 }
 0x1e3   :  { %v1419_v11 = vstv %s1418_s0  ;;  %p1882_p13 = scmp.lt.s32.totalorder %s1876_s21, %s1876_s21 }
 0x1e4   :  { %v1420_v4 = vmul.f32 %v1419_v11, %v1417_v9  ;;  %v1424_v8 = vstv %s1599_s8 }
 0x1e5   :  { %p1883_p0 = por %p1882_p13, %p1881_p12 }
 0x1e7   :  { %p1884_p1 = pnand %p1883_p0, %p1877_p11 }
 0x1e9   :  { %1887 = shalt.err (!%p1884_p1)
}
 0x1ea   :  { %s3600_s15 = sld [smem:[#allocation22_spill]]  ;;  %v1425_v34 = vmul.f32 %v1424_v8, %v1417_v9  ;;  %v1430_v39 = vstv %s1600_s7  ;;  %s2046_s17 = smov [#allocation12]   ;;  %v1421_v10 = vadd.f32 %v2030_v15, %v1420_v4 }
 0x1eb   :  { %s3601_s3 = sld [smem:[#allocation23_spill]]  ;;  %v1431_v46 = vmul.f32 %v1430_v39, %v1417_v9  ;;  %s2047_s24 = smov [#allocation13]  }
 0x1ec   :  { %v1426_v41 = vadd.f32 %v2026_v14, %v1425_v34  ;;  %s3602_s6 = sld [smem:[#allocation24_spill]]  ;;  %1422 = vst [vmem:[#allocation9] sm:$0xff] %v1421_v10  ;;  %s1912_s25 = scalar_lea.vmem %s1442_s2, 384 }
 0x1ed   :  { %v1432_v43 = vadd.f32 %v2022_v13, %v1431_v46  ;;  %p1913_p2 = scmp.ne.s32.totalorder %s1442_s2, %s1912_s25  ;;  %p1917_p3 = scmp.lt.s32.totalorder %s1442_s2, %s1442_s2 }
 0x1ee   :  { %1428 = vst [vmem:[#allocation9 + $0x8] sm:$0xff] %v1426_v41  ;;  %p1918_p4 = scmp.lt.s32.totalorder %s1912_s25, %s1912_s25 }
 0x1ef   :  { %1434 = vst [vmem:[#allocation9 + $0x10] sm:$0xff] %v1432_v43 }
 0x1f0   :  { %1457 = dma.vmem_to_hbm [thread:$0]  %s1455_s22, 128, %s3600_s15, [#allocation11]  }
 0x1f1   :  { %1465 = dma.smem_to_hbm %s2046_s17, 16, %s3601_s3, [#allocation6]  }
 0x1f2   :  { %1473 = dma.smem_to_hbm %s2047_s24, 16, %s3602_s6, [#allocation14]  }
 0x1f3   :  { %p1919_p5 = por %p1918_p4, %p1917_p3 }
 0x1f5   :  { %p1920_p6 = pnand %p1919_p5, %p1913_p2 }
 0x1f7   :  { %1923 = shalt.err (!%p1920_p6)
}
 0x1f8   :  { %s2048_s26 = smov 128   ;;  %s2049_s20 = smov 8  }
 0x1f9   :  { %s3603_s30 = sld [smem:[#allocation21_spill]] }
 0x1ff   :  { %1447 = dma.vmem_to_hbm [thread:$0]  %s1442_s2, 384, %s3603_s30, [#allocation4], %s2048_s26, %s2048_s26, %s2049_s20  }
 0x200   :  { %1984 = dma.done.wait [#allocation4], 384  }
 0x201   :  { %1985 = vsyncadd [#allocation4], 4294966912 }
 0x202   :  { %1986 = dma.done.wait [#allocation11], 128  }
 0x203   :  { %1987 = vsyncadd [#allocation11], 4294967168 }
 0x204   :  { %1988 = dma.done.wait [#allocation6], 16  }
 0x205   :  { %1989 = vsyncadd [#allocation6], 4294967280 }
 0x206   :  { %1990 = dma.done.wait [#allocation14], 16  }
 0x207   :  { %1991 = vsyncadd [#allocation14], 4294967280 }
 0x208   :  { %1486 = sfence }
 0x209   :  { %1487 = vsyncpa [#allocation4], 1 }
 0x20a   :  { %1488 = vsyncpa [#allocation11], 1 }
 0x20b   :  { %1489 = vsyncpa [#allocation5], 1 }
 0x20c   :  { %1490 = vsyncpa [#allocation6], 1 }
 0x20d   :  { %1491 = vsyncpa [#allocation14], 1 }
 0x20e   :  { %1492 = vsyncpa [#allocation7], 1 }

</bundles_post_ra>
